<compile_context>
chip_gen: v7x
topology: tpu7x:2x2x1
jax: 0.10.0
libtpu: 0.0.40
codegen_flags: <defaults>
</compile_context>

<pallas_src>
import functools

import jax
import jax.numpy as jnp
from jax.experimental import pallas as pl
from jax.experimental.pallas import tpu as pltpu


def agent_gru_kernel(num_layers, hidden_dim, seq_len, batch_pad,
                     x_ref, h0_ref, *rest):
    """rest = [w_i_0 .. w_i_{L-1}] + [w_h_all, bi_all, bhn_all, w_fc, b_fc]
              + [out_ref, h_out_ref] + [seq_buf, gi_r, gi_z, gi_n]."""
    H, L, T, Bp = hidden_dim, num_layers, seq_len, batch_pad

    w_i_refs = rest[:L]                               # each (3, in_l, H)
    w_h_ref, bi_ref, bhn_ref, w_fc_ref, b_fc_ref = rest[L:L + 5]
    out_ref, h_out_ref = rest[L + 5], rest[L + 6]
    seq_buf, gi_r_buf, gi_z_buf, gi_n_buf = rest[L + 7:L + 11]
    gi_bufs = (gi_r_buf, gi_z_buf, gi_n_buf)

    h = None
    for layer in range(L):                            # static unroll over layers
        is_top = (layer == L - 1)

        # ---- input-side GEMM, hoisted out of the recurrence (one per gate) ----
        # layer 0 reads the flattened input sequence; deeper layers read the
        # previous layer's outputs stored in the VMEM scratch buffer.
        xin = x_ref[...] if layer == 0 else seq_buf[...]       # (T*Bp, in_l)
        w_i = w_i_refs[layer]
        for g in range(3):
            gi_bufs[g][...] = (
                jnp.dot(xin, w_i[g], preferred_element_type=jnp.float32)
                + bi_ref[layer, g])                            # merged biases

        # ---- hidden-side weights, loaded once per layer ----
        w_hr = w_h_ref[layer, 0]
        w_hz = w_h_ref[layer, 1]
        w_hn = w_h_ref[layer, 2]
        bhn = jnp.broadcast_to(bhn_ref[layer], (Bp, H))        # hoisted broadcast

        h = h0_ref[layer]                                      # (Bp, H)
        for t in range(T):                                     # static unroll over time
            lo = t * Bp
            gh_r = jnp.dot(h, w_hr, preferred_element_type=jnp.float32)
            gh_z = jnp.dot(h, w_hz, preferred_element_type=jnp.float32)
            gh_n = jnp.dot(h, w_hn, preferred_element_type=jnp.float32) + bhn
            r = jax.nn.sigmoid(gi_r_buf[lo:lo + Bp, :] + gh_r)
            z = jax.nn.sigmoid(gi_z_buf[lo:lo + Bp, :] + gh_z)
            n = jnp.tanh(gi_n_buf[lo:lo + Bp, :] + r * gh_n)
            h = n + z * (h - n)
            if not is_top:                                     # top layer: skip stores
                seq_buf[lo:lo + Bp, :] = h

        h_out_ref[layer] = h

    # FC + sigmoid on the last timestep of the top layer (== final h).
    # Output is padded to a full 128-lane tile -> lane-dense store.
    logits = jnp.dot(h, w_fc_ref[...], preferred_element_type=jnp.float32) + b_fc_ref[...]
    out_ref[...] = jax.nn.sigmoid(logits)


def agent_gru_forward(x, h0, layer_params, fc_w, fc_b, hidden_dim, output_dim):
    """x: (B, T, D) batch_first (like PyTorch). h0: (L, B, H).

    Returns (out, h) == (sigmoid(fc(gru(x, h0)[0][:, -1])), final hidden state)."""
    B, T, D = x.shape
    L = len(layer_params)
    H = hidden_dim
    Bp = ((B + 7) // 8) * 8                 # pad batch to a sublane multiple
    OP = ((output_dim + 127) // 128) * 128  # pad FC output to full lanes

    # time-major, batch-padded, flattened to (T*Bp, D) so the per-layer input
    # GEMM is a single matmul and per-step slices are sublane-aligned.
    x_tm = jnp.transpose(x.astype(jnp.float32), (1, 0, 2))      # (T, B, D)
    x_tm = jnp.pad(x_tm, ((0, 0), (0, Bp - B), (0, 0)))
    x_flat = x_tm.reshape(T * Bp, D)

    h0_pad = jnp.pad(h0.astype(jnp.float32), ((0, 0), (0, Bp - B), (0, 0)))

    # Repack torch-layout weights: rows [r | z | n], shape (3H, in) -> per-gate (in, H).
    w_i_list, w_h_list, bi_list, bhn_list = [], [], [], []
    for (w_ih, w_hh, b_ih, b_hh) in layer_params:
        w_ih = w_ih.astype(jnp.float32)
        w_hh = w_hh.astype(jnp.float32)
        b_ih = b_ih.astype(jnp.float32)
        b_hh = b_hh.astype(jnp.float32)
        w_i_list.append(jnp.stack(
            [w_ih[0:H].T, w_ih[H:2 * H].T, w_ih[2 * H:3 * H].T]))          # (3, in, H)
        w_h_list.append(jnp.stack(
            [w_hh[0:H].T, w_hh[H:2 * H].T, w_hh[2 * H:3 * H].T]))          # (3, H, H)
        bi_list.append(jnp.stack(
            [(b_ih[0:H] + b_hh[0:H]).reshape(1, H),                        # r: b_ir+b_hr
             (b_ih[H:2 * H] + b_hh[H:2 * H]).reshape(1, H),                # z: b_iz+b_hz
             b_ih[2 * H:3 * H].reshape(1, H)]))                            # n: b_in only
        bhn_list.append(b_hh[2 * H:3 * H].reshape(1, H))                   # b_hn stays separate

    w_h_all = jnp.stack(w_h_list)        # (L, 3, H, H)
    bi_all = jnp.stack(bi_list)          # (L, 3, 1, H)
    bhn_all = jnp.stack(bhn_list)        # (L, 1, H)

    fc_w_p = jnp.zeros((H, OP), jnp.float32).at[:, :output_dim].set(
        fc_w.astype(jnp.float32).T)
    fc_b_p = jnp.zeros((1, OP), jnp.float32).at[:, :output_dim].set(
        fc_b.astype(jnp.float32).reshape(1, -1))

    inputs = [x_flat, h0_pad] + w_i_list + [w_h_all, bi_all, bhn_all, fc_w_p, fc_b_p]

    kernel = functools.partial(agent_gru_kernel, L, H, T, Bp)
    vmem = pl.BlockSpec(memory_space=pltpu.MemorySpace.VMEM)

    # Single gridless invocation: the whole problem (KBs) lives in VMEM.
    # At production sizes, tile T with a grid / emit_pipeline and add a
    # "parallel" batch axis for v7x's two TensorCores.
    out_p, h_p = pl.pallas_call(
        kernel,
        out_shape=(jax.ShapeDtypeStruct((Bp, OP), jnp.float32),
                   jax.ShapeDtypeStruct((L, Bp, H), jnp.float32)),
        in_specs=[vmem] * len(inputs),
        out_specs=(vmem, vmem),
        scratch_shapes=[pltpu.VMEM((T * Bp, H), jnp.float32),   # seq_buf (layer l -> l+1)
                        pltpu.VMEM((T * Bp, H), jnp.float32),   # GI_r
                        pltpu.VMEM((T * Bp, H), jnp.float32),   # GI_z
                        pltpu.VMEM((T * Bp, H), jnp.float32)],  # GI_n
    )(*inputs)

    return out_p[:B, :output_dim], h_p[:, :B, :]


def _reference_forward(x, h0, layer_params, fc_w, fc_b, hidden_dim):
    """Pure-JAX reference mirroring torch.nn.GRU + Linear + Sigmoid."""
    H = hidden_dim
    seq = x  # (B, T, D)
    h_finals = []
    for (w_ih, w_hh, b_ih, b_hh), l in zip(layer_params, range(len(layer_params))):
        h = h0[l]
        outs = []
        for t in range(seq.shape[1]):
            x_t = seq[:, t, :]
            gi = x_t @ w_ih.T + b_ih
            gh = h @ w_hh.T + b_hh
            r = jax.nn.sigmoid(gi[:, :H] + gh[:, :H])
            z = jax.nn.sigmoid(gi[:, H:2 * H] + gh[:, H:2 * H])
            n = jnp.tanh(gi[:, 2 * H:] + r * gh[:, 2 * H:])
            h = (1 - z) * n + z * h
            outs.append(h)
        seq = jnp.stack(outs, axis=1)
        h_finals.append(h)
    out = jax.nn.sigmoid(seq[:, -1, :] @ fc_w.T + fc_b)
    return out, jnp.stack(h_finals, axis=0)


if __name__ == "__main__":
    # Module hyperparameters
    input_size, hidden_dim, output_dim, num_layers = 16, 32, 4, 2
    B, T = 2, 8

    key = jax.random.PRNGKey(0)
    bound = 1.0 / (hidden_dim ** 0.5)   # torch.nn.GRU / Linear default init range

    layer_params = []
    for layer in range(num_layers):
        in_dim = input_size if layer == 0 else hidden_dim
        key, k1, k2, k3, k4 = jax.random.split(key, 5)
        w_ih = jax.random.uniform(k1, (3 * hidden_dim, in_dim), jnp.float32, -bound, bound)
        w_hh = jax.random.uniform(k2, (3 * hidden_dim, hidden_dim), jnp.float32, -bound, bound)
        b_ih = jax.random.uniform(k3, (3 * hidden_dim,), jnp.float32, -bound, bound)
        b_hh = jax.random.uniform(k4, (3 * hidden_dim,), jnp.float32, -bound, bound)
        layer_params.append((w_ih, w_hh, b_ih, b_hh))

    key, kf1, kf2, kx = jax.random.split(key, 4)
    fc_w = jax.random.uniform(kf1, (output_dim, hidden_dim), jnp.float32, -bound, bound)
    fc_b = jax.random.uniform(kf2, (output_dim,), jnp.float32, -bound, bound)

    x = jax.random.normal(kx, (B, T, input_size), jnp.float32)
    # forward(x, h=None) -> init_hidden: zeros (num_layers, batch, hidden_dim)
    h0 = jnp.zeros((num_layers, B, hidden_dim), jnp.float32)

    out, h = agent_gru_forward(x, h0, layer_params, fc_w, fc_b, hidden_dim, output_dim)
    out, h = jax.block_until_ready(out), jax.block_until_ready(h)

    ref_out, ref_h = _reference_forward(x, h0, layer_params, fc_w, fc_b, hidden_dim)
    assert out.shape == (B, output_dim) and h.shape == (num_layers, B, hidden_dim)
    assert jnp.allclose(out, ref_out, atol=1e-3, rtol=1e-3)
    assert jnp.allclose(h, ref_h, atol=1e-3, rtol=1e-3)

    print("KERNEL_OK")
</pallas_src>

<mosaic_0001>
module attributes {stable_mosaic.version = 11 : i64} {
  func.func @agent_gru_kernel(%arg0: memref<64x16xf32, #tpu.memory_space<vmem>>, %arg1: memref<2x8x32xf32, #tpu.memory_space<vmem>>, %arg2: memref<3x16x32xf32, #tpu.memory_space<vmem>>, %arg3: memref<3x32x32xf32, #tpu.memory_space<vmem>>, %arg4: memref<2x3x32x32xf32, #tpu.memory_space<vmem>>, %arg5: memref<2x3x1x32xf32, #tpu.memory_space<vmem>>, %arg6: memref<2x1x32xf32, #tpu.memory_space<vmem>>, %arg7: memref<32x128xf32, #tpu.memory_space<vmem>>, %arg8: memref<1x128xf32, #tpu.memory_space<vmem>>, %arg9: memref<8x128xf32, #tpu.memory_space<vmem>>, %arg10: memref<2x8x32xf32, #tpu.memory_space<vmem>>, %arg11: memref<64x32xf32, #tpu.memory_space<vmem>>, %arg12: memref<64x32xf32, #tpu.memory_space<vmem>>, %arg13: memref<64x32xf32, #tpu.memory_space<vmem>>, %arg14: memref<64x32xf32, #tpu.memory_space<vmem>>) attributes {dimension_semantics = [], scalar_prefetch = 0 : i64, scratch_operands = 4 : i64, tpu.core_type = #tpu.core_type<tc>} {
    %c0 = arith.constant 0 : index
    %c0_0 = arith.constant 0 : index
    %0 = vector.load %arg0[%c0, %c0_0] : memref<64x16xf32, #tpu.memory_space<vmem>>, vector<64x16xf32>
    %c0_1 = arith.constant 0 : index
    %c0_2 = arith.constant 0 : index
    %c0_3 = arith.constant 0 : index
    %1 = vector.load %arg2[%c0_1, %c0_2, %c0_3] : memref<3x16x32xf32, #tpu.memory_space<vmem>>, vector<1x16x32xf32>
    %2 = vector.shape_cast %1 : vector<1x16x32xf32> to vector<16x32xf32>
    %cst = arith.constant dense<0.000000e+00> : vector<64x32xf32>
    %3 = tpu.matmul %0, %2, %cst {dimension_numbers = #tpu.dot_dimension_numbers<[1], [0], [0], [1], [0, 0, 1, 1], [], []>} : vector<64x16xf32>, vector<16x32xf32>, vector<64x32xf32> -> vector<64x32xf32>
    %c0_4 = arith.constant 0 : index
    %c0_5 = arith.constant 0 : index
    %c0_6 = arith.constant 0 : index
    %c0_7 = arith.constant 0 : index
    %4 = vector.load %arg5[%c0_4, %c0_5, %c0_6, %c0_7] : memref<2x3x1x32xf32, #tpu.memory_space<vmem>>, vector<1x1x1x32xf32>
    %5 = vector.shape_cast %4 : vector<1x1x1x32xf32> to vector<1x32xf32>
    %6 = vector.broadcast %5 : vector<1x32xf32> to vector<64x32xf32>
    %7 = arith.addf %3, %6 : vector<64x32xf32>
    %c0_8 = arith.constant 0 : index
    %c0_9 = arith.constant 0 : index
    %8 = vector.load %arg12[%c0_8, %c0_9] : memref<64x32xf32, #tpu.memory_space<vmem>>, vector<64x32xf32>
    tpu.vector_store %arg12[%c0_8, %c0_9], %7 {strides = array<i32>} : memref<64x32xf32, #tpu.memory_space<vmem>>, vector<64x32xf32>,
    %c1 = arith.constant 1 : index
    %c0_10 = arith.constant 0 : index
    %c0_11 = arith.constant 0 : index
    %9 = vector.load %arg2[%c1, %c0_10, %c0_11] : memref<3x16x32xf32, #tpu.memory_space<vmem>>, vector<1x16x32xf32>
    %10 = vector.shape_cast %9 : vector<1x16x32xf32> to vector<16x32xf32>
    %cst_12 = arith.constant dense<0.000000e+00> : vector<64x32xf32>
    %11 = tpu.matmul %0, %10, %cst_12 {dimension_numbers = #tpu.dot_dimension_numbers<[1], [0], [0], [1], [0, 0, 1, 1], [], []>} : vector<64x16xf32>, vector<16x32xf32>, vector<64x32xf32> -> vector<64x32xf32>
    %c0_13 = arith.constant 0 : index
    %c1_14 = arith.constant 1 : index
    %c0_15 = arith.constant 0 : index
    %c0_16 = arith.constant 0 : index
    %12 = vector.load %arg5[%c0_13, %c1_14, %c0_15, %c0_16] : memref<2x3x1x32xf32, #tpu.memory_space<vmem>>, vector<1x1x1x32xf32>
    %13 = vector.shape_cast %12 : vector<1x1x1x32xf32> to vector<1x32xf32>
    %14 = vector.broadcast %13 : vector<1x32xf32> to vector<64x32xf32>
    %15 = arith.addf %11, %14 : vector<64x32xf32>
    %c0_17 = arith.constant 0 : index
    %c0_18 = arith.constant 0 : index
    %16 = vector.load %arg13[%c0_17, %c0_18] : memref<64x32xf32, #tpu.memory_space<vmem>>, vector<64x32xf32>
    tpu.vector_store %arg13[%c0_17, %c0_18], %15 {strides = array<i32>} : memref<64x32xf32, #tpu.memory_space<vmem>>, vector<64x32xf32>,
    %c2 = arith.constant 2 : index
    %c0_19 = arith.constant 0 : index
    %c0_20 = arith.constant 0 : index
    %17 = vector.load %arg2[%c2, %c0_19, %c0_20] : memref<3x16x32xf32, #tpu.memory_space<vmem>>, vector<1x16x32xf32>
    %18 = vector.shape_cast %17 : vector<1x16x32xf32> to vector<16x32xf32>
    %cst_21 = arith.constant dense<0.000000e+00> : vector<64x32xf32>
    %19 = tpu.matmul %0, %18, %cst_21 {dimension_numbers = #tpu.dot_dimension_numbers<[1], [0], [0], [1], [0, 0, 1, 1], [], []>} : vector<64x16xf32>, vector<16x32xf32>, vector<64x32xf32> -> vector<64x32xf32>
    %c0_22 = arith.constant 0 : index
    %c2_23 = arith.constant 2 : index
    %c0_24 = arith.constant 0 : index
    %c0_25 = arith.constant 0 : index
    %20 = vector.load %arg5[%c0_22, %c2_23, %c0_24, %c0_25] : memref<2x3x1x32xf32, #tpu.memory_space<vmem>>, vector<1x1x1x32xf32>
    %21 = vector.shape_cast %20 : vector<1x1x1x32xf32> to vector<1x32xf32>
    %22 = vector.broadcast %21 : vector<1x32xf32> to vector<64x32xf32>
    %23 = arith.addf %19, %22 : vector<64x32xf32>
    %c0_26 = arith.constant 0 : index
    %c0_27 = arith.constant 0 : index
    %24 = vector.load %arg14[%c0_26, %c0_27] : memref<64x32xf32, #tpu.memory_space<vmem>>, vector<64x32xf32>
    tpu.vector_store %arg14[%c0_26, %c0_27], %23 {strides = array<i32>} : memref<64x32xf32, #tpu.memory_space<vmem>>, vector<64x32xf32>,
    %c0_28 = arith.constant 0 : index
    %c0_29 = arith.constant 0 : index
    %c0_30 = arith.constant 0 : index
    %c0_31 = arith.constant 0 : index
    %25 = vector.load %arg4[%c0_28, %c0_29, %c0_30, %c0_31] : memref<2x3x32x32xf32, #tpu.memory_space<vmem>>, vector<1x1x32x32xf32>
    %26 = vector.shape_cast %25 : vector<1x1x32x32xf32> to vector<32x32xf32>
    %c0_32 = arith.constant 0 : index
    %c1_33 = arith.constant 1 : index
    %c0_34 = arith.constant 0 : index
    %c0_35 = arith.constant 0 : index
    %27 = vector.load %arg4[%c0_32, %c1_33, %c0_34, %c0_35] : memref<2x3x32x32xf32, #tpu.memory_space<vmem>>, vector<1x1x32x32xf32>
    %28 = vector.shape_cast %27 : vector<1x1x32x32xf32> to vector<32x32xf32>
    %c0_36 = arith.constant 0 : index
    %c2_37 = arith.constant 2 : index
    %c0_38 = arith.constant 0 : index
    %c0_39 = arith.constant 0 : index
    %29 = vector.load %arg4[%c0_36, %c2_37, %c0_38, %c0_39] : memref<2x3x32x32xf32, #tpu.memory_space<vmem>>, vector<1x1x32x32xf32>
    %30 = vector.shape_cast %29 : vector<1x1x32x32xf32> to vector<32x32xf32>
    %c0_40 = arith.constant 0 : index
    %c0_41 = arith.constant 0 : index
    %c0_42 = arith.constant 0 : index
    %31 = vector.load %arg6[%c0_40, %c0_41, %c0_42] : memref<2x1x32xf32, #tpu.memory_space<vmem>>, vector<1x1x32xf32>
    %32 = vector.shape_cast %31 : vector<1x1x32xf32> to vector<1x32xf32>
    %33 = vector.shape_cast %32 : vector<1x32xf32> to vector<1x32xf32>
    %34 = vector.broadcast %33 : vector<1x32xf32> to vector<8x32xf32>
    %c0_43 = arith.constant 0 : index
    %c0_44 = arith.constant 0 : index
    %c0_45 = arith.constant 0 : index
    %35 = vector.load %arg1[%c0_43, %c0_44, %c0_45] : memref<2x8x32xf32, #tpu.memory_space<vmem>>, vector<1x8x32xf32>
    %36 = vector.shape_cast %35 : vector<1x8x32xf32> to vector<8x32xf32>
    %cst_46 = arith.constant dense<0.000000e+00> : vector<8x32xf32>
    %37 = tpu.matmul %36, %26, %cst_46 {dimension_numbers = #tpu.dot_dimension_numbers<[1], [0], [0], [1], [0, 0, 1, 1], [], []>} : vector<8x32xf32>, vector<32x32xf32>, vector<8x32xf32> -> vector<8x32xf32>
    %cst_47 = arith.constant dense<0.000000e+00> : vector<8x32xf32>
    %38 = tpu.matmul %36, %28, %cst_47 {dimension_numbers = #tpu.dot_dimension_numbers<[1], [0], [0], [1], [0, 0, 1, 1], [], []>} : vector<8x32xf32>, vector<32x32xf32>, vector<8x32xf32> -> vector<8x32xf32>
    %cst_48 = arith.constant dense<0.000000e+00> : vector<8x32xf32>
    %39 = tpu.matmul %36, %30, %cst_48 {dimension_numbers = #tpu.dot_dimension_numbers<[1], [0], [0], [1], [0, 0, 1, 1], [], []>} : vector<8x32xf32>, vector<32x32xf32>, vector<8x32xf32> -> vector<8x32xf32>
    %40 = arith.addf %39, %34 : vector<8x32xf32>
    %c0_49 = arith.constant 0 : index
    %c0_50 = arith.constant 0 : index
    %41 = vector.load %arg12[%c0_49, %c0_50] : memref<64x32xf32, #tpu.memory_space<vmem>>, vector<8x32xf32>
    %42 = arith.addf %41, %37 : vector<8x32xf32>
    %43 = arith.negf %42 : vector<8x32xf32>
    %44 = math.exp %43 : vector<8x32xf32>
    %cst_51 = arith.constant 1.000000e+00 : f32
    %45 = vector.broadcast %cst_51 : f32 to vector<8x32xf32>
    %46 = arith.addf %45, %44 : vector<8x32xf32>
    %47 = arith.divf %45, %46 : vector<8x32xf32>
    %c0_52 = arith.constant 0 : index
    %c0_53 = arith.constant 0 : index
    %48 = vector.load %arg13[%c0_52, %c0_53] : memref<64x32xf32, #tpu.memory_space<vmem>>, vector<8x32xf32>
    %49 = arith.addf %48, %38 : vector<8x32xf32>
    %50 = arith.negf %49 : vector<8x32xf32>
    %51 = math.exp %50 : vector<8x32xf32>
    %cst_54 = arith.constant 1.000000e+00 : f32
    %52 = vector.broadcast %cst_54 : f32 to vector<8x32xf32>
    %53 = arith.addf %52, %51 : vector<8x32xf32>
    %54 = arith.divf %52, %53 : vector<8x32xf32>
    %c0_55 = arith.constant 0 : index
    %c0_56 = arith.constant 0 : index
    %55 = vector.load %arg14[%c0_55, %c0_56] : memref<64x32xf32, #tpu.memory_space<vmem>>, vector<8x32xf32>
    %56 = arith.mulf %47, %40 : vector<8x32xf32>
    %57 = arith.addf %55, %56 : vector<8x32xf32>
    %58 = math.tanh %57 : vector<8x32xf32>
    %59 = arith.subf %36, %58 : vector<8x32xf32>
    %60 = arith.mulf %54, %59 : vector<8x32xf32>
    %61 = arith.addf %58, %60 : vector<8x32xf32>
    %c0_57 = arith.constant 0 : index
    %c0_58 = arith.constant 0 : index
    %62 = vector.load %arg11[%c0_57, %c0_58] : memref<64x32xf32, #tpu.memory_space<vmem>>, vector<8x32xf32>
    tpu.vector_store %arg11[%c0_57, %c0_58], %61 {strides = array<i32>} : memref<64x32xf32, #tpu.memory_space<vmem>>, vector<8x32xf32>,
    %cst_59 = arith.constant dense<0.000000e+00> : vector<8x32xf32>
    %63 = tpu.matmul %61, %26, %cst_59 {dimension_numbers = #tpu.dot_dimension_numbers<[1], [0], [0], [1], [0, 0, 1, 1], [], []>} : vector<8x32xf32>, vector<32x32xf32>, vector<8x32xf32> -> vector<8x32xf32>
    %cst_60 = arith.constant dense<0.000000e+00> : vector<8x32xf32>
    %64 = tpu.matmul %61, %28, %cst_60 {dimension_numbers = #tpu.dot_dimension_numbers<[1], [0], [0], [1], [0, 0, 1, 1], [], []>} : vector<8x32xf32>, vector<32x32xf32>, vector<8x32xf32> -> vector<8x32xf32>
    %cst_61 = arith.constant dense<0.000000e+00> : vector<8x32xf32>
    %65 = tpu.matmul %61, %30, %cst_61 {dimension_numbers = #tpu.dot_dimension_numbers<[1], [0], [0], [1], [0, 0, 1, 1], [], []>} : vector<8x32xf32>, vector<32x32xf32>, vector<8x32xf32> -> vector<8x32xf32>
    %66 = arith.addf %65, %34 : vector<8x32xf32>
    %c8 = arith.constant 8 : index
    %c0_62 = arith.constant 0 : index
    %67 = vector.load %arg12[%c8, %c0_62] : memref<64x32xf32, #tpu.memory_space<vmem>>, vector<8x32xf32>
    %68 = arith.addf %67, %63 : vector<8x32xf32>
    %69 = arith.negf %68 : vector<8x32xf32>
    %70 = math.exp %69 : vector<8x32xf32>
    %cst_63 = arith.constant 1.000000e+00 : f32
    %71 = vector.broadcast %cst_63 : f32 to vector<8x32xf32>
    %72 = arith.addf %71, %70 : vector<8x32xf32>
    %73 = arith.divf %71, %72 : vector<8x32xf32>
    %c8_64 = arith.constant 8 : index
    %c0_65 = arith.constant 0 : index
    %74 = vector.load %arg13[%c8_64, %c0_65] : memref<64x32xf32, #tpu.memory_space<vmem>>, vector<8x32xf32>
    %75 = arith.addf %74, %64 : vector<8x32xf32>
    %76 = arith.negf %75 : vector<8x32xf32>
    %77 = math.exp %76 : vector<8x32xf32>
    %cst_66 = arith.constant 1.000000e+00 : f32
    %78 = vector.broadcast %cst_66 : f32 to vector<8x32xf32>
    %79 = arith.addf %78, %77 : vector<8x32xf32>
    %80 = arith.divf %78, %79 : vector<8x32xf32>
    %c8_67 = arith.constant 8 : index
    %c0_68 = arith.constant 0 : index
    %81 = vector.load %arg14[%c8_67, %c0_68] : memref<64x32xf32, #tpu.memory_space<vmem>>, vector<8x32xf32>
    %82 = arith.mulf %73, %66 : vector<8x32xf32>
    %83 = arith.addf %81, %82 : vector<8x32xf32>
    %84 = math.tanh %83 : vector<8x32xf32>
    %85 = arith.subf %61, %84 : vector<8x32xf32>
    %86 = arith.mulf %80, %85 : vector<8x32xf32>
    %87 = arith.addf %84, %86 : vector<8x32xf32>
    %c8_69 = arith.constant 8 : index
    %c0_70 = arith.constant 0 : index
    %88 = vector.load %arg11[%c8_69, %c0_70] : memref<64x32xf32, #tpu.memory_space<vmem>>, vector<8x32xf32>
    tpu.vector_store %arg11[%c8_69, %c0_70], %87 {strides = array<i32>} : memref<64x32xf32, #tpu.memory_space<vmem>>, vector<8x32xf32>,
    %cst_71 = arith.constant dense<0.000000e+00> : vector<8x32xf32>
    %89 = tpu.matmul %87, %26, %cst_71 {dimension_numbers = #tpu.dot_dimension_numbers<[1], [0], [0], [1], [0, 0, 1, 1], [], []>} : vector<8x32xf32>, vector<32x32xf32>, vector<8x32xf32> -> vector<8x32xf32>
    %cst_72 = arith.constant dense<0.000000e+00> : vector<8x32xf32>
    %90 = tpu.matmul %87, %28, %cst_72 {dimension_numbers = #tpu.dot_dimension_numbers<[1], [0], [0], [1], [0, 0, 1, 1], [], []>} : vector<8x32xf32>, vector<32x32xf32>, vector<8x32xf32> -> vector<8x32xf32>
    %cst_73 = arith.constant dense<0.000000e+00> : vector<8x32xf32>
    %91 = tpu.matmul %87, %30, %cst_73 {dimension_numbers = #tpu.dot_dimension_numbers<[1], [0], [0], [1], [0, 0, 1, 1], [], []>} : vector<8x32xf32>, vector<32x32xf32>, vector<8x32xf32> -> vector<8x32xf32>
    %92 = arith.addf %91, %34 : vector<8x32xf32>
    %c16 = arith.constant 16 : index
    %c0_74 = arith.constant 0 : index
    %93 = vector.load %arg12[%c16, %c0_74] : memref<64x32xf32, #tpu.memory_space<vmem>>, vector<8x32xf32>
    %94 = arith.addf %93, %89 : vector<8x32xf32>
    %95 = arith.negf %94 : vector<8x32xf32>
    %96 = math.exp %95 : vector<8x32xf32>
    %cst_75 = arith.constant 1.000000e+00 : f32
    %97 = vector.broadcast %cst_75 : f32 to vector<8x32xf32>
    %98 = arith.addf %97, %96 : vector<8x32xf32>
    %99 = arith.divf %97, %98 : vector<8x32xf32>
    %c16_76 = arith.constant 16 : index
    %c0_77 = arith.constant 0 : index
    %100 = vector.load %arg13[%c16_76, %c0_77] : memref<64x32xf32, #tpu.memory_space<vmem>>, vector<8x32xf32>
    %101 = arith.addf %100, %90 : vector<8x32xf32>
    %102 = arith.negf %101 : vector<8x32xf32>
    %103 = math.exp %102 : vector<8x32xf32>
    %cst_78 = arith.constant 1.000000e+00 : f32
    %104 = vector.broadcast %cst_78 : f32 to vector<8x32xf32>
    %105 = arith.addf %104, %103 : vector<8x32xf32>
    %106 = arith.divf %104, %105 : vector<8x32xf32>
    %c16_79 = arith.constant 16 : index
    %c0_80 = arith.constant 0 : index
    %107 = vector.load %arg14[%c16_79, %c0_80] : memref<64x32xf32, #tpu.memory_space<vmem>>, vector<8x32xf32>
    %108 = arith.mulf %99, %92 : vector<8x32xf32>
    %109 = arith.addf %107, %108 : vector<8x32xf32>
    %110 = math.tanh %109 : vector<8x32xf32>
    %111 = arith.subf %87, %110 : vector<8x32xf32>
    %112 = arith.mulf %106, %111 : vector<8x32xf32>
    %113 = arith.addf %110, %112 : vector<8x32xf32>
    %c16_81 = arith.constant 16 : index
    %c0_82 = arith.constant 0 : index
    %114 = vector.load %arg11[%c16_81, %c0_82] : memref<64x32xf32, #tpu.memory_space<vmem>>, vector<8x32xf32>
    tpu.vector_store %arg11[%c16_81, %c0_82], %113 {strides = array<i32>} : memref<64x32xf32, #tpu.memory_space<vmem>>, vector<8x32xf32>,
    %cst_83 = arith.constant dense<0.000000e+00> : vector<8x32xf32>
    %115 = tpu.matmul %113, %26, %cst_83 {dimension_numbers = #tpu.dot_dimension_numbers<[1], [0], [0], [1], [0, 0, 1, 1], [], []>} : vector<8x32xf32>, vector<32x32xf32>, vector<8x32xf32> -> vector<8x32xf32>
    %cst_84 = arith.constant dense<0.000000e+00> : vector<8x32xf32>
    %116 = tpu.matmul %113, %28, %cst_84 {dimension_numbers = #tpu.dot_dimension_numbers<[1], [0], [0], [1], [0, 0, 1, 1], [], []>} : vector<8x32xf32>, vector<32x32xf32>, vector<8x32xf32> -> vector<8x32xf32>
    %cst_85 = arith.constant dense<0.000000e+00> : vector<8x32xf32>
    %117 = tpu.matmul %113, %30, %cst_85 {dimension_numbers = #tpu.dot_dimension_numbers<[1], [0], [0], [1], [0, 0, 1, 1], [], []>} : vector<8x32xf32>, vector<32x32xf32>, vector<8x32xf32> -> vector<8x32xf32>
    %118 = arith.addf %117, %34 : vector<8x32xf32>
    %c24 = arith.constant 24 : index
    %c0_86 = arith.constant 0 : index
    %119 = vector.load %arg12[%c24, %c0_86] : memref<64x32xf32, #tpu.memory_space<vmem>>, vector<8x32xf32>
    %120 = arith.addf %119, %115 : vector<8x32xf32>
    %121 = arith.negf %120 : vector<8x32xf32>
    %122 = math.exp %121 : vector<8x32xf32>
    %cst_87 = arith.constant 1.000000e+00 : f32
    %123 = vector.broadcast %cst_87 : f32 to vector<8x32xf32>
    %124 = arith.addf %123, %122 : vector<8x32xf32>
    %125 = arith.divf %123, %124 : vector<8x32xf32>
    %c24_88 = arith.constant 24 : index
    %c0_89 = arith.constant 0 : index
    %126 = vector.load %arg13[%c24_88, %c0_89] : memref<64x32xf32, #tpu.memory_space<vmem>>, vector<8x32xf32>
    %127 = arith.addf %126, %116 : vector<8x32xf32>
    %128 = arith.negf %127 : vector<8x32xf32>
    %129 = math.exp %128 : vector<8x32xf32>
    %cst_90 = arith.constant 1.000000e+00 : f32
    %130 = vector.broadcast %cst_90 : f32 to vector<8x32xf32>
    %131 = arith.addf %130, %129 : vector<8x32xf32>
    %132 = arith.divf %130, %131 : vector<8x32xf32>
    %c24_91 = arith.constant 24 : index
    %c0_92 = arith.constant 0 : index
    %133 = vector.load %arg14[%c24_91, %c0_92] : memref<64x32xf32, #tpu.memory_space<vmem>>, vector<8x32xf32>
    %134 = arith.mulf %125, %118 : vector<8x32xf32>
    %135 = arith.addf %133, %134 : vector<8x32xf32>
    %136 = math.tanh %135 : vector<8x32xf32>
    %137 = arith.subf %113, %136 : vector<8x32xf32>
    %138 = arith.mulf %132, %137 : vector<8x32xf32>
    %139 = arith.addf %136, %138 : vector<8x32xf32>
    %c24_93 = arith.constant 24 : index
    %c0_94 = arith.constant 0 : index
    %140 = vector.load %arg11[%c24_93, %c0_94] : memref<64x32xf32, #tpu.memory_space<vmem>>, vector<8x32xf32>
    tpu.vector_store %arg11[%c24_93, %c0_94], %139 {strides = array<i32>} : memref<64x32xf32, #tpu.memory_space<vmem>>, vector<8x32xf32>,
    %cst_95 = arith.constant dense<0.000000e+00> : vector<8x32xf32>
    %141 = tpu.matmul %139, %26, %cst_95 {dimension_numbers = #tpu.dot_dimension_numbers<[1], [0], [0], [1], [0, 0, 1, 1], [], []>} : vector<8x32xf32>, vector<32x32xf32>, vector<8x32xf32> -> vector<8x32xf32>
    %cst_96 = arith.constant dense<0.000000e+00> : vector<8x32xf32>
    %142 = tpu.matmul %139, %28, %cst_96 {dimension_numbers = #tpu.dot_dimension_numbers<[1], [0], [0], [1], [0, 0, 1, 1], [], []>} : vector<8x32xf32>, vector<32x32xf32>, vector<8x32xf32> -> vector<8x32xf32>
    %cst_97 = arith.constant dense<0.000000e+00> : vector<8x32xf32>
    %143 = tpu.matmul %139, %30, %cst_97 {dimension_numbers = #tpu.dot_dimension_numbers<[1], [0], [0], [1], [0, 0, 1, 1], [], []>} : vector<8x32xf32>, vector<32x32xf32>, vector<8x32xf32> -> vector<8x32xf32>
    %144 = arith.addf %143, %34 : vector<8x32xf32>
    %c32 = arith.constant 32 : index
    %c0_98 = arith.constant 0 : index
    %145 = vector.load %arg12[%c32, %c0_98] : memref<64x32xf32, #tpu.memory_space<vmem>>, vector<8x32xf32>
    %146 = arith.addf %145, %141 : vector<8x32xf32>
    %147 = arith.negf %146 : vector<8x32xf32>
    %148 = math.exp %147 : vector<8x32xf32>
    %cst_99 = arith.constant 1.000000e+00 : f32
    %149 = vector.broadcast %cst_99 : f32 to vector<8x32xf32>
    %150 = arith.addf %149, %148 : vector<8x32xf32>
    %151 = arith.divf %149, %150 : vector<8x32xf32>
    %c32_100 = arith.constant 32 : index
    %c0_101 = arith.constant 0 : index
    %152 = vector.load %arg13[%c32_100, %c0_101] : memref<64x32xf32, #tpu.memory_space<vmem>>, vector<8x32xf32>
    %153 = arith.addf %152, %142 : vector<8x32xf32>
    %154 = arith.negf %153 : vector<8x32xf32>
    %155 = math.exp %154 : vector<8x32xf32>
    %cst_102 = arith.constant 1.000000e+00 : f32
    %156 = vector.broadcast %cst_102 : f32 to vector<8x32xf32>
    %157 = arith.addf %156, %155 : vector<8x32xf32>
    %158 = arith.divf %156, %157 : vector<8x32xf32>
    %c32_103 = arith.constant 32 : index
    %c0_104 = arith.constant 0 : index
    %159 = vector.load %arg14[%c32_103, %c0_104] : memref<64x32xf32, #tpu.memory_space<vmem>>, vector<8x32xf32>
    %160 = arith.mulf %151, %144 : vector<8x32xf32>
    %161 = arith.addf %159, %160 : vector<8x32xf32>
    %162 = math.tanh %161 : vector<8x32xf32>
    %163 = arith.subf %139, %162 : vector<8x32xf32>
    %164 = arith.mulf %158, %163 : vector<8x32xf32>
    %165 = arith.addf %162, %164 : vector<8x32xf32>
    %c32_105 = arith.constant 32 : index
    %c0_106 = arith.constant 0 : index
    %166 = vector.load %arg11[%c32_105, %c0_106] : memref<64x32xf32, #tpu.memory_space<vmem>>, vector<8x32xf32>
    tpu.vector_store %arg11[%c32_105, %c0_106], %165 {strides = array<i32>} : memref<64x32xf32, #tpu.memory_space<vmem>>, vector<8x32xf32>,
    %cst_107 = arith.constant dense<0.000000e+00> : vector<8x32xf32>
    %167 = tpu.matmul %165, %26, %cst_107 {dimension_numbers = #tpu.dot_dimension_numbers<[1], [0], [0], [1], [0, 0, 1, 1], [], []>} : vector<8x32xf32>, vector<32x32xf32>, vector<8x32xf32> -> vector<8x32xf32>
    %cst_108 = arith.constant dense<0.000000e+00> : vector<8x32xf32>
    %168 = tpu.matmul %165, %28, %cst_108 {dimension_numbers = #tpu.dot_dimension_numbers<[1], [0], [0], [1], [0, 0, 1, 1], [], []>} : vector<8x32xf32>, vector<32x32xf32>, vector<8x32xf32> -> vector<8x32xf32>
    %cst_109 = arith.constant dense<0.000000e+00> : vector<8x32xf32>
    %169 = tpu.matmul %165, %30, %cst_109 {dimension_numbers = #tpu.dot_dimension_numbers<[1], [0], [0], [1], [0, 0, 1, 1], [], []>} : vector<8x32xf32>, vector<32x32xf32>, vector<8x32xf32> -> vector<8x32xf32>
    %170 = arith.addf %169, %34 : vector<8x32xf32>
    %c40 = arith.constant 40 : index
    %c0_110 = arith.constant 0 : index
    %171 = vector.load %arg12[%c40, %c0_110] : memref<64x32xf32, #tpu.memory_space<vmem>>, vector<8x32xf32>
    %172 = arith.addf %171, %167 : vector<8x32xf32>
    %173 = arith.negf %172 : vector<8x32xf32>
    %174 = math.exp %173 : vector<8x32xf32>
    %cst_111 = arith.constant 1.000000e+00 : f32
    %175 = vector.broadcast %cst_111 : f32 to vector<8x32xf32>
    %176 = arith.addf %175, %174 : vector<8x32xf32>
    %177 = arith.divf %175, %176 : vector<8x32xf32>
    %c40_112 = arith.constant 40 : index
    %c0_113 = arith.constant 0 : index
    %178 = vector.load %arg13[%c40_112, %c0_113] : memref<64x32xf32, #tpu.memory_space<vmem>>, vector<8x32xf32>
    %179 = arith.addf %178, %168 : vector<8x32xf32>
    %180 = arith.negf %179 : vector<8x32xf32>
    %181 = math.exp %180 : vector<8x32xf32>
    %cst_114 = arith.constant 1.000000e+00 : f32
    %182 = vector.broadcast %cst_114 : f32 to vector<8x32xf32>
    %183 = arith.addf %182, %181 : vector<8x32xf32>
    %184 = arith.divf %182, %183 : vector<8x32xf32>
    %c40_115 = arith.constant 40 : index
    %c0_116 = arith.constant 0 : index
    %185 = vector.load %arg14[%c40_115, %c0_116] : memref<64x32xf32, #tpu.memory_space<vmem>>, vector<8x32xf32>
    %186 = arith.mulf %177, %170 : vector<8x32xf32>
    %187 = arith.addf %185, %186 : vector<8x32xf32>
    %188 = math.tanh %187 : vector<8x32xf32>
    %189 = arith.subf %165, %188 : vector<8x32xf32>
    %190 = arith.mulf %184, %189 : vector<8x32xf32>
    %191 = arith.addf %188, %190 : vector<8x32xf32>
    %c40_117 = arith.constant 40 : index
    %c0_118 = arith.constant 0 : index
    %192 = vector.load %arg11[%c40_117, %c0_118] : memref<64x32xf32, #tpu.memory_space<vmem>>, vector<8x32xf32>
    tpu.vector_store %arg11[%c40_117, %c0_118], %191 {strides = array<i32>} : memref<64x32xf32, #tpu.memory_space<vmem>>, vector<8x32xf32>,
    %cst_119 = arith.constant dense<0.000000e+00> : vector<8x32xf32>
    %193 = tpu.matmul %191, %26, %cst_119 {dimension_numbers = #tpu.dot_dimension_numbers<[1], [0], [0], [1], [0, 0, 1, 1], [], []>} : vector<8x32xf32>, vector<32x32xf32>, vector<8x32xf32> -> vector<8x32xf32>
    %cst_120 = arith.constant dense<0.000000e+00> : vector<8x32xf32>
    %194 = tpu.matmul %191, %28, %cst_120 {dimension_numbers = #tpu.dot_dimension_numbers<[1], [0], [0], [1], [0, 0, 1, 1], [], []>} : vector<8x32xf32>, vector<32x32xf32>, vector<8x32xf32> -> vector<8x32xf32>
    %cst_121 = arith.constant dense<0.000000e+00> : vector<8x32xf32>
    %195 = tpu.matmul %191, %30, %cst_121 {dimension_numbers = #tpu.dot_dimension_numbers<[1], [0], [0], [1], [0, 0, 1, 1], [], []>} : vector<8x32xf32>, vector<32x32xf32>, vector<8x32xf32> -> vector<8x32xf32>
    %196 = arith.addf %195, %34 : vector<8x32xf32>
    %c48 = arith.constant 48 : index
    %c0_122 = arith.constant 0 : index
    %197 = vector.load %arg12[%c48, %c0_122] : memref<64x32xf32, #tpu.memory_space<vmem>>, vector<8x32xf32>
    %198 = arith.addf %197, %193 : vector<8x32xf32>
    %199 = arith.negf %198 : vector<8x32xf32>
    %200 = math.exp %199 : vector<8x32xf32>
    %cst_123 = arith.constant 1.000000e+00 : f32
    %201 = vector.broadcast %cst_123 : f32 to vector<8x32xf32>
    %202 = arith.addf %201, %200 : vector<8x32xf32>
    %203 = arith.divf %201, %202 : vector<8x32xf32>
    %c48_124 = arith.constant 48 : index
    %c0_125 = arith.constant 0 : index
    %204 = vector.load %arg13[%c48_124, %c0_125] : memref<64x32xf32, #tpu.memory_space<vmem>>, vector<8x32xf32>
    %205 = arith.addf %204, %194 : vector<8x32xf32>
    %206 = arith.negf %205 : vector<8x32xf32>
    %207 = math.exp %206 : vector<8x32xf32>
    %cst_126 = arith.constant 1.000000e+00 : f32
    %208 = vector.broadcast %cst_126 : f32 to vector<8x32xf32>
    %209 = arith.addf %208, %207 : vector<8x32xf32>
    %210 = arith.divf %208, %209 : vector<8x32xf32>
    %c48_127 = arith.constant 48 : index
    %c0_128 = arith.constant 0 : index
    %211 = vector.load %arg14[%c48_127, %c0_128] : memref<64x32xf32, #tpu.memory_space<vmem>>, vector<8x32xf32>
    %212 = arith.mulf %203, %196 : vector<8x32xf32>
    %213 = arith.addf %211, %212 : vector<8x32xf32>
    %214 = math.tanh %213 : vector<8x32xf32>
    %215 = arith.subf %191, %214 : vector<8x32xf32>
    %216 = arith.mulf %210, %215 : vector<8x32xf32>
    %217 = arith.addf %214, %216 : vector<8x32xf32>
    %c48_129 = arith.constant 48 : index
    %c0_130 = arith.constant 0 : index
    %218 = vector.load %arg11[%c48_129, %c0_130] : memref<64x32xf32, #tpu.memory_space<vmem>>, vector<8x32xf32>
    tpu.vector_store %arg11[%c48_129, %c0_130], %217 {strides = array<i32>} : memref<64x32xf32, #tpu.memory_space<vmem>>, vector<8x32xf32>,
    %cst_131 = arith.constant dense<0.000000e+00> : vector<8x32xf32>
    %219 = tpu.matmul %217, %26, %cst_131 {dimension_numbers = #tpu.dot_dimension_numbers<[1], [0], [0], [1], [0, 0, 1, 1], [], []>} : vector<8x32xf32>, vector<32x32xf32>, vector<8x32xf32> -> vector<8x32xf32>
    %cst_132 = arith.constant dense<0.000000e+00> : vector<8x32xf32>
    %220 = tpu.matmul %217, %28, %cst_132 {dimension_numbers = #tpu.dot_dimension_numbers<[1], [0], [0], [1], [0, 0, 1, 1], [], []>} : vector<8x32xf32>, vector<32x32xf32>, vector<8x32xf32> -> vector<8x32xf32>
    %cst_133 = arith.constant dense<0.000000e+00> : vector<8x32xf32>
    %221 = tpu.matmul %217, %30, %cst_133 {dimension_numbers = #tpu.dot_dimension_numbers<[1], [0], [0], [1], [0, 0, 1, 1], [], []>} : vector<8x32xf32>, vector<32x32xf32>, vector<8x32xf32> -> vector<8x32xf32>
    %222 = arith.addf %221, %34 : vector<8x32xf32>
    %c56 = arith.constant 56 : index
    %c0_134 = arith.constant 0 : index
    %223 = vector.load %arg12[%c56, %c0_134] : memref<64x32xf32, #tpu.memory_space<vmem>>, vector<8x32xf32>
    %224 = arith.addf %223, %219 : vector<8x32xf32>
    %225 = arith.negf %224 : vector<8x32xf32>
    %226 = math.exp %225 : vector<8x32xf32>
    %cst_135 = arith.constant 1.000000e+00 : f32
    %227 = vector.broadcast %cst_135 : f32 to vector<8x32xf32>
    %228 = arith.addf %227, %226 : vector<8x32xf32>
    %229 = arith.divf %227, %228 : vector<8x32xf32>
    %c56_136 = arith.constant 56 : index
    %c0_137 = arith.constant 0 : index
    %230 = vector.load %arg13[%c56_136, %c0_137] : memref<64x32xf32, #tpu.memory_space<vmem>>, vector<8x32xf32>
    %231 = arith.addf %230, %220 : vector<8x32xf32>
    %232 = arith.negf %231 : vector<8x32xf32>
    %233 = math.exp %232 : vector<8x32xf32>
    %cst_138 = arith.constant 1.000000e+00 : f32
    %234 = vector.broadcast %cst_138 : f32 to vector<8x32xf32>
    %235 = arith.addf %234, %233 : vector<8x32xf32>
    %236 = arith.divf %234, %235 : vector<8x32xf32>
    %c56_139 = arith.constant 56 : index
    %c0_140 = arith.constant 0 : index
    %237 = vector.load %arg14[%c56_139, %c0_140] : memref<64x32xf32, #tpu.memory_space<vmem>>, vector<8x32xf32>
    %238 = arith.mulf %229, %222 : vector<8x32xf32>
    %239 = arith.addf %237, %238 : vector<8x32xf32>
    %240 = math.tanh %239 : vector<8x32xf32>
    %241 = arith.subf %217, %240 : vector<8x32xf32>
    %242 = arith.mulf %236, %241 : vector<8x32xf32>
    %243 = arith.addf %240, %242 : vector<8x32xf32>
    %c56_141 = arith.constant 56 : index
    %c0_142 = arith.constant 0 : index
    %244 = vector.load %arg11[%c56_141, %c0_142] : memref<64x32xf32, #tpu.memory_space<vmem>>, vector<8x32xf32>
    tpu.vector_store %arg11[%c56_141, %c0_142], %243 {strides = array<i32>} : memref<64x32xf32, #tpu.memory_space<vmem>>, vector<8x32xf32>,
    %c0_143 = arith.constant 0 : index
    %c0_144 = arith.constant 0 : index
    %c0_145 = arith.constant 0 : index
    %245 = vector.load %arg10[%c0_143, %c0_144, %c0_145] : memref<2x8x32xf32, #tpu.memory_space<vmem>>, vector<1x8x32xf32>
    %246 = vector.shape_cast %245 : vector<1x8x32xf32> to vector<8x32xf32>
    %247 = vector.shape_cast %243 : vector<8x32xf32> to vector<1x8x32xf32>
    tpu.vector_store %arg10[%c0_143, %c0_144, %c0_145], %247 {strides = array<i32>} : memref<2x8x32xf32, #tpu.memory_space<vmem>>, vector<1x8x32xf32>,
    %c0_146 = arith.constant 0 : index
    %c0_147 = arith.constant 0 : index
    %248 = vector.load %arg11[%c0_146, %c0_147] : memref<64x32xf32, #tpu.memory_space<vmem>>, vector<64x32xf32>
    %c0_148 = arith.constant 0 : index
    %c0_149 = arith.constant 0 : index
    %c0_150 = arith.constant 0 : index
    %249 = vector.load %arg3[%c0_148, %c0_149, %c0_150] : memref<3x32x32xf32, #tpu.memory_space<vmem>>, vector<1x32x32xf32>
    %250 = vector.shape_cast %249 : vector<1x32x32xf32> to vector<32x32xf32>
    %cst_151 = arith.constant dense<0.000000e+00> : vector<64x32xf32>
    %251 = tpu.matmul %248, %250, %cst_151 {dimension_numbers = #tpu.dot_dimension_numbers<[1], [0], [0], [1], [0, 0, 1, 1], [], []>} : vector<64x32xf32>, vector<32x32xf32>, vector<64x32xf32> -> vector<64x32xf32>
    %c1_152 = arith.constant 1 : index
    %c0_153 = arith.constant 0 : index
    %c0_154 = arith.constant 0 : index
    %c0_155 = arith.constant 0 : index
    %252 = vector.load %arg5[%c1_152, %c0_153, %c0_154, %c0_155] : memref<2x3x1x32xf32, #tpu.memory_space<vmem>>, vector<1x1x1x32xf32>
    %253 = vector.shape_cast %252 : vector<1x1x1x32xf32> to vector<1x32xf32>
    %254 = vector.broadcast %253 : vector<1x32xf32> to vector<64x32xf32>
    %255 = arith.addf %251, %254 : vector<64x32xf32>
    %c0_156 = arith.constant 0 : index
    %c0_157 = arith.constant 0 : index
    %256 = vector.load %arg12[%c0_156, %c0_157] : memref<64x32xf32, #tpu.memory_space<vmem>>, vector<64x32xf32>
    tpu.vector_store %arg12[%c0_156, %c0_157], %255 {strides = array<i32>} : memref<64x32xf32, #tpu.memory_space<vmem>>, vector<64x32xf32>,
    %c1_158 = arith.constant 1 : index
    %c0_159 = arith.constant 0 : index
    %c0_160 = arith.constant 0 : index
    %257 = vector.load %arg3[%c1_158, %c0_159, %c0_160] : memref<3x32x32xf32, #tpu.memory_space<vmem>>, vector<1x32x32xf32>
    %258 = vector.shape_cast %257 : vector<1x32x32xf32> to vector<32x32xf32>
    %cst_161 = arith.constant dense<0.000000e+00> : vector<64x32xf32>
    %259 = tpu.matmul %248, %258, %cst_161 {dimension_numbers = #tpu.dot_dimension_numbers<[1], [0], [0], [1], [0, 0, 1, 1], [], []>} : vector<64x32xf32>, vector<32x32xf32>, vector<64x32xf32> -> vector<64x32xf32>
    %c1_162 = arith.constant 1 : index
    %c1_163 = arith.constant 1 : index
    %c0_164 = arith.constant 0 : index
    %c0_165 = arith.constant 0 : index
    %260 = vector.load %arg5[%c1_162, %c1_163, %c0_164, %c0_165] : memref<2x3x1x32xf32, #tpu.memory_space<vmem>>, vector<1x1x1x32xf32>
    %261 = vector.shape_cast %260 : vector<1x1x1x32xf32> to vector<1x32xf32>
    %262 = vector.broadcast %261 : vector<1x32xf32> to vector<64x32xf32>
    %263 = arith.addf %259, %262 : vector<64x32xf32>
    %c0_166 = arith.constant 0 : index
    %c0_167 = arith.constant 0 : index
    %264 = vector.load %arg13[%c0_166, %c0_167] : memref<64x32xf32, #tpu.memory_space<vmem>>, vector<64x32xf32>
    tpu.vector_store %arg13[%c0_166, %c0_167], %263 {strides = array<i32>} : memref<64x32xf32, #tpu.memory_space<vmem>>, vector<64x32xf32>,
    %c2_168 = arith.constant 2 : index
    %c0_169 = arith.constant 0 : index
    %c0_170 = arith.constant 0 : index
    %265 = vector.load %arg3[%c2_168, %c0_169, %c0_170] : memref<3x32x32xf32, #tpu.memory_space<vmem>>, vector<1x32x32xf32>
    %266 = vector.shape_cast %265 : vector<1x32x32xf32> to vector<32x32xf32>
    %cst_171 = arith.constant dense<0.000000e+00> : vector<64x32xf32>
    %267 = tpu.matmul %248, %266, %cst_171 {dimension_numbers = #tpu.dot_dimension_numbers<[1], [0], [0], [1], [0, 0, 1, 1], [], []>} : vector<64x32xf32>, vector<32x32xf32>, vector<64x32xf32> -> vector<64x32xf32>
    %c1_172 = arith.constant 1 : index
    %c2_173 = arith.constant 2 : index
    %c0_174 = arith.constant 0 : index
    %c0_175 = arith.constant 0 : index
    %268 = vector.load %arg5[%c1_172, %c2_173, %c0_174, %c0_175] : memref<2x3x1x32xf32, #tpu.memory_space<vmem>>, vector<1x1x1x32xf32>
    %269 = vector.shape_cast %268 : vector<1x1x1x32xf32> to vector<1x32xf32>
    %270 = vector.broadcast %269 : vector<1x32xf32> to vector<64x32xf32>
    %271 = arith.addf %267, %270 : vector<64x32xf32>
    %c0_176 = arith.constant 0 : index
    %c0_177 = arith.constant 0 : index
    %272 = vector.load %arg14[%c0_176, %c0_177] : memref<64x32xf32, #tpu.memory_space<vmem>>, vector<64x32xf32>
    tpu.vector_store %arg14[%c0_176, %c0_177], %271 {strides = array<i32>} : memref<64x32xf32, #tpu.memory_space<vmem>>, vector<64x32xf32>,
    %c1_178 = arith.constant 1 : index
    %c0_179 = arith.constant 0 : index
    %c0_180 = arith.constant 0 : index
    %c0_181 = arith.constant 0 : index
    %273 = vector.load %arg4[%c1_178, %c0_179, %c0_180, %c0_181] : memref<2x3x32x32xf32, #tpu.memory_space<vmem>>, vector<1x1x32x32xf32>
    %274 = vector.shape_cast %273 : vector<1x1x32x32xf32> to vector<32x32xf32>
    %c1_182 = arith.constant 1 : index
    %c1_183 = arith.constant 1 : index
    %c0_184 = arith.constant 0 : index
    %c0_185 = arith.constant 0 : index
    %275 = vector.load %arg4[%c1_182, %c1_183, %c0_184, %c0_185] : memref<2x3x32x32xf32, #tpu.memory_space<vmem>>, vector<1x1x32x32xf32>
    %276 = vector.shape_cast %275 : vector<1x1x32x32xf32> to vector<32x32xf32>
    %c1_186 = arith.constant 1 : index
    %c2_187 = arith.constant 2 : index
    %c0_188 = arith.constant 0 : index
    %c0_189 = arith.constant 0 : index
    %277 = vector.load %arg4[%c1_186, %c2_187, %c0_188, %c0_189] : memref<2x3x32x32xf32, #tpu.memory_space<vmem>>, vector<1x1x32x32xf32>
    %278 = vector.shape_cast %277 : vector<1x1x32x32xf32> to vector<32x32xf32>
    %c1_190 = arith.constant 1 : index
    %c0_191 = arith.constant 0 : index
    %c0_192 = arith.constant 0 : index
    %279 = vector.load %arg6[%c1_190, %c0_191, %c0_192] : memref<2x1x32xf32, #tpu.memory_space<vmem>>, vector<1x1x32xf32>
    %280 = vector.shape_cast %279 : vector<1x1x32xf32> to vector<1x32xf32>
    %281 = vector.shape_cast %280 : vector<1x32xf32> to vector<1x32xf32>
    %282 = vector.broadcast %281 : vector<1x32xf32> to vector<8x32xf32>
    %c1_193 = arith.constant 1 : index
    %c0_194 = arith.constant 0 : index
    %c0_195 = arith.constant 0 : index
    %283 = vector.load %arg1[%c1_193, %c0_194, %c0_195] : memref<2x8x32xf32, #tpu.memory_space<vmem>>, vector<1x8x32xf32>
    %284 = vector.shape_cast %283 : vector<1x8x32xf32> to vector<8x32xf32>
    %cst_196 = arith.constant dense<0.000000e+00> : vector<8x32xf32>
    %285 = tpu.matmul %284, %274, %cst_196 {dimension_numbers = #tpu.dot_dimension_numbers<[1], [0], [0], [1], [0, 0, 1, 1], [], []>} : vector<8x32xf32>, vector<32x32xf32>, vector<8x32xf32> -> vector<8x32xf32>
    %cst_197 = arith.constant dense<0.000000e+00> : vector<8x32xf32>
    %286 = tpu.matmul %284, %276, %cst_197 {dimension_numbers = #tpu.dot_dimension_numbers<[1], [0], [0], [1], [0, 0, 1, 1], [], []>} : vector<8x32xf32>, vector<32x32xf32>, vector<8x32xf32> -> vector<8x32xf32>
    %cst_198 = arith.constant dense<0.000000e+00> : vector<8x32xf32>
    %287 = tpu.matmul %284, %278, %cst_198 {dimension_numbers = #tpu.dot_dimension_numbers<[1], [0], [0], [1], [0, 0, 1, 1], [], []>} : vector<8x32xf32>, vector<32x32xf32>, vector<8x32xf32> -> vector<8x32xf32>
    %288 = arith.addf %287, %282 : vector<8x32xf32>
    %c0_199 = arith.constant 0 : index
    %c0_200 = arith.constant 0 : index
    %289 = vector.load %arg12[%c0_199, %c0_200] : memref<64x32xf32, #tpu.memory_space<vmem>>, vector<8x32xf32>
    %290 = arith.addf %289, %285 : vector<8x32xf32>
    %291 = arith.negf %290 : vector<8x32xf32>
    %292 = math.exp %291 : vector<8x32xf32>
    %cst_201 = arith.constant 1.000000e+00 : f32
    %293 = vector.broadcast %cst_201 : f32 to vector<8x32xf32>
    %294 = arith.addf %293, %292 : vector<8x32xf32>
    %295 = arith.divf %293, %294 : vector<8x32xf32>
    %c0_202 = arith.constant 0 : index
    %c0_203 = arith.constant 0 : index
    %296 = vector.load %arg13[%c0_202, %c0_203] : memref<64x32xf32, #tpu.memory_space<vmem>>, vector<8x32xf32>
    %297 = arith.addf %296, %286 : vector<8x32xf32>
    %298 = arith.negf %297 : vector<8x32xf32>
    %299 = math.exp %298 : vector<8x32xf32>
    %cst_204 = arith.constant 1.000000e+00 : f32
    %300 = vector.broadcast %cst_204 : f32 to vector<8x32xf32>
    %301 = arith.addf %300, %299 : vector<8x32xf32>
    %302 = arith.divf %300, %301 : vector<8x32xf32>
    %c0_205 = arith.constant 0 : index
    %c0_206 = arith.constant 0 : index
    %303 = vector.load %arg14[%c0_205, %c0_206] : memref<64x32xf32, #tpu.memory_space<vmem>>, vector<8x32xf32>
    %304 = arith.mulf %295, %288 : vector<8x32xf32>
    %305 = arith.addf %303, %304 : vector<8x32xf32>
    %306 = math.tanh %305 : vector<8x32xf32>
    %307 = arith.subf %284, %306 : vector<8x32xf32>
    %308 = arith.mulf %302, %307 : vector<8x32xf32>
    %309 = arith.addf %306, %308 : vector<8x32xf32>
    %cst_207 = arith.constant dense<0.000000e+00> : vector<8x32xf32>
    %310 = tpu.matmul %309, %274, %cst_207 {dimension_numbers = #tpu.dot_dimension_numbers<[1], [0], [0], [1], [0, 0, 1, 1], [], []>} : vector<8x32xf32>, vector<32x32xf32>, vector<8x32xf32> -> vector<8x32xf32>
    %cst_208 = arith.constant dense<0.000000e+00> : vector<8x32xf32>
    %311 = tpu.matmul %309, %276, %cst_208 {dimension_numbers = #tpu.dot_dimension_numbers<[1], [0], [0], [1], [0, 0, 1, 1], [], []>} : vector<8x32xf32>, vector<32x32xf32>, vector<8x32xf32> -> vector<8x32xf32>
    %cst_209 = arith.constant dense<0.000000e+00> : vector<8x32xf32>
    %312 = tpu.matmul %309, %278, %cst_209 {dimension_numbers = #tpu.dot_dimension_numbers<[1], [0], [0], [1], [0, 0, 1, 1], [], []>} : vector<8x32xf32>, vector<32x32xf32>, vector<8x32xf32> -> vector<8x32xf32>
    %313 = arith.addf %312, %282 : vector<8x32xf32>
    %c8_210 = arith.constant 8 : index
    %c0_211 = arith.constant 0 : index
    %314 = vector.load %arg12[%c8_210, %c0_211] : memref<64x32xf32, #tpu.memory_space<vmem>>, vector<8x32xf32>
    %315 = arith.addf %314, %310 : vector<8x32xf32>
    %316 = arith.negf %315 : vector<8x32xf32>
    %317 = math.exp %316 : vector<8x32xf32>
    %cst_212 = arith.constant 1.000000e+00 : f32
    %318 = vector.broadcast %cst_212 : f32 to vector<8x32xf32>
    %319 = arith.addf %318, %317 : vector<8x32xf32>
    %320 = arith.divf %318, %319 : vector<8x32xf32>
    %c8_213 = arith.constant 8 : index
    %c0_214 = arith.constant 0 : index
    %321 = vector.load %arg13[%c8_213, %c0_214] : memref<64x32xf32, #tpu.memory_space<vmem>>, vector<8x32xf32>
    %322 = arith.addf %321, %311 : vector<8x32xf32>
    %323 = arith.negf %322 : vector<8x32xf32>
    %324 = math.exp %323 : vector<8x32xf32>
    %cst_215 = arith.constant 1.000000e+00 : f32
    %325 = vector.broadcast %cst_215 : f32 to vector<8x32xf32>
    %326 = arith.addf %325, %324 : vector<8x32xf32>
    %327 = arith.divf %325, %326 : vector<8x32xf32>
    %c8_216 = arith.constant 8 : index
    %c0_217 = arith.constant 0 : index
    %328 = vector.load %arg14[%c8_216, %c0_217] : memref<64x32xf32, #tpu.memory_space<vmem>>, vector<8x32xf32>
    %329 = arith.mulf %320, %313 : vector<8x32xf32>
    %330 = arith.addf %328, %329 : vector<8x32xf32>
    %331 = math.tanh %330 : vector<8x32xf32>
    %332 = arith.subf %309, %331 : vector<8x32xf32>
    %333 = arith.mulf %327, %332 : vector<8x32xf32>
    %334 = arith.addf %331, %333 : vector<8x32xf32>
    %cst_218 = arith.constant dense<0.000000e+00> : vector<8x32xf32>
    %335 = tpu.matmul %334, %274, %cst_218 {dimension_numbers = #tpu.dot_dimension_numbers<[1], [0], [0], [1], [0, 0, 1, 1], [], []>} : vector<8x32xf32>, vector<32x32xf32>, vector<8x32xf32> -> vector<8x32xf32>
    %cst_219 = arith.constant dense<0.000000e+00> : vector<8x32xf32>
    %336 = tpu.matmul %334, %276, %cst_219 {dimension_numbers = #tpu.dot_dimension_numbers<[1], [0], [0], [1], [0, 0, 1, 1], [], []>} : vector<8x32xf32>, vector<32x32xf32>, vector<8x32xf32> -> vector<8x32xf32>
    %cst_220 = arith.constant dense<0.000000e+00> : vector<8x32xf32>
    %337 = tpu.matmul %334, %278, %cst_220 {dimension_numbers = #tpu.dot_dimension_numbers<[1], [0], [0], [1], [0, 0, 1, 1], [], []>} : vector<8x32xf32>, vector<32x32xf32>, vector<8x32xf32> -> vector<8x32xf32>
    %338 = arith.addf %337, %282 : vector<8x32xf32>
    %c16_221 = arith.constant 16 : index
    %c0_222 = arith.constant 0 : index
    %339 = vector.load %arg12[%c16_221, %c0_222] : memref<64x32xf32, #tpu.memory_space<vmem>>, vector<8x32xf32>
    %340 = arith.addf %339, %335 : vector<8x32xf32>
    %341 = arith.negf %340 : vector<8x32xf32>
    %342 = math.exp %341 : vector<8x32xf32>
    %cst_223 = arith.constant 1.000000e+00 : f32
    %343 = vector.broadcast %cst_223 : f32 to vector<8x32xf32>
    %344 = arith.addf %343, %342 : vector<8x32xf32>
    %345 = arith.divf %343, %344 : vector<8x32xf32>
    %c16_224 = arith.constant 16 : index
    %c0_225 = arith.constant 0 : index
    %346 = vector.load %arg13[%c16_224, %c0_225] : memref<64x32xf32, #tpu.memory_space<vmem>>, vector<8x32xf32>
    %347 = arith.addf %346, %336 : vector<8x32xf32>
    %348 = arith.negf %347 : vector<8x32xf32>
    %349 = math.exp %348 : vector<8x32xf32>
    %cst_226 = arith.constant 1.000000e+00 : f32
    %350 = vector.broadcast %cst_226 : f32 to vector<8x32xf32>
    %351 = arith.addf %350, %349 : vector<8x32xf32>
    %352 = arith.divf %350, %351 : vector<8x32xf32>
    %c16_227 = arith.constant 16 : index
    %c0_228 = arith.constant 0 : index
    %353 = vector.load %arg14[%c16_227, %c0_228] : memref<64x32xf32, #tpu.memory_space<vmem>>, vector<8x32xf32>
    %354 = arith.mulf %345, %338 : vector<8x32xf32>
    %355 = arith.addf %353, %354 : vector<8x32xf32>
    %356 = math.tanh %355 : vector<8x32xf32>
    %357 = arith.subf %334, %356 : vector<8x32xf32>
    %358 = arith.mulf %352, %357 : vector<8x32xf32>
    %359 = arith.addf %356, %358 : vector<8x32xf32>
    %cst_229 = arith.constant dense<0.000000e+00> : vector<8x32xf32>
    %360 = tpu.matmul %359, %274, %cst_229 {dimension_numbers = #tpu.dot_dimension_numbers<[1], [0], [0], [1], [0, 0, 1, 1], [], []>} : vector<8x32xf32>, vector<32x32xf32>, vector<8x32xf32> -> vector<8x32xf32>
    %cst_230 = arith.constant dense<0.000000e+00> : vector<8x32xf32>
    %361 = tpu.matmul %359, %276, %cst_230 {dimension_numbers = #tpu.dot_dimension_numbers<[1], [0], [0], [1], [0, 0, 1, 1], [], []>} : vector<8x32xf32>, vector<32x32xf32>, vector<8x32xf32> -> vector<8x32xf32>
    %cst_231 = arith.constant dense<0.000000e+00> : vector<8x32xf32>
    %362 = tpu.matmul %359, %278, %cst_231 {dimension_numbers = #tpu.dot_dimension_numbers<[1], [0], [0], [1], [0, 0, 1, 1], [], []>} : vector<8x32xf32>, vector<32x32xf32>, vector<8x32xf32> -> vector<8x32xf32>
    %363 = arith.addf %362, %282 : vector<8x32xf32>
    %c24_232 = arith.constant 24 : index
    %c0_233 = arith.constant 0 : index
    %364 = vector.load %arg12[%c24_232, %c0_233] : memref<64x32xf32, #tpu.memory_space<vmem>>, vector<8x32xf32>
    %365 = arith.addf %364, %360 : vector<8x32xf32>
    %366 = arith.negf %365 : vector<8x32xf32>
    %367 = math.exp %366 : vector<8x32xf32>
    %cst_234 = arith.constant 1.000000e+00 : f32
    %368 = vector.broadcast %cst_234 : f32 to vector<8x32xf32>
    %369 = arith.addf %368, %367 : vector<8x32xf32>
    %370 = arith.divf %368, %369 : vector<8x32xf32>
    %c24_235 = arith.constant 24 : index
    %c0_236 = arith.constant 0 : index
    %371 = vector.load %arg13[%c24_235, %c0_236] : memref<64x32xf32, #tpu.memory_space<vmem>>, vector<8x32xf32>
    %372 = arith.addf %371, %361 : vector<8x32xf32>
    %373 = arith.negf %372 : vector<8x32xf32>
    %374 = math.exp %373 : vector<8x32xf32>
    %cst_237 = arith.constant 1.000000e+00 : f32
    %375 = vector.broadcast %cst_237 : f32 to vector<8x32xf32>
    %376 = arith.addf %375, %374 : vector<8x32xf32>
    %377 = arith.divf %375, %376 : vector<8x32xf32>
    %c24_238 = arith.constant 24 : index
    %c0_239 = arith.constant 0 : index
    %378 = vector.load %arg14[%c24_238, %c0_239] : memref<64x32xf32, #tpu.memory_space<vmem>>, vector<8x32xf32>
    %379 = arith.mulf %370, %363 : vector<8x32xf32>
    %380 = arith.addf %378, %379 : vector<8x32xf32>
    %381 = math.tanh %380 : vector<8x32xf32>
    %382 = arith.subf %359, %381 : vector<8x32xf32>
    %383 = arith.mulf %377, %382 : vector<8x32xf32>
    %384 = arith.addf %381, %383 : vector<8x32xf32>
    %cst_240 = arith.constant dense<0.000000e+00> : vector<8x32xf32>
    %385 = tpu.matmul %384, %274, %cst_240 {dimension_numbers = #tpu.dot_dimension_numbers<[1], [0], [0], [1], [0, 0, 1, 1], [], []>} : vector<8x32xf32>, vector<32x32xf32>, vector<8x32xf32> -> vector<8x32xf32>
    %cst_241 = arith.constant dense<0.000000e+00> : vector<8x32xf32>
    %386 = tpu.matmul %384, %276, %cst_241 {dimension_numbers = #tpu.dot_dimension_numbers<[1], [0], [0], [1], [0, 0, 1, 1], [], []>} : vector<8x32xf32>, vector<32x32xf32>, vector<8x32xf32> -> vector<8x32xf32>
    %cst_242 = arith.constant dense<0.000000e+00> : vector<8x32xf32>
    %387 = tpu.matmul %384, %278, %cst_242 {dimension_numbers = #tpu.dot_dimension_numbers<[1], [0], [0], [1], [0, 0, 1, 1], [], []>} : vector<8x32xf32>, vector<32x32xf32>, vector<8x32xf32> -> vector<8x32xf32>
    %388 = arith.addf %387, %282 : vector<8x32xf32>
    %c32_243 = arith.constant 32 : index
    %c0_244 = arith.constant 0 : index
    %389 = vector.load %arg12[%c32_243, %c0_244] : memref<64x32xf32, #tpu.memory_space<vmem>>, vector<8x32xf32>
    %390 = arith.addf %389, %385 : vector<8x32xf32>
    %391 = arith.negf %390 : vector<8x32xf32>
    %392 = math.exp %391 : vector<8x32xf32>
    %cst_245 = arith.constant 1.000000e+00 : f32
    %393 = vector.broadcast %cst_245 : f32 to vector<8x32xf32>
    %394 = arith.addf %393, %392 : vector<8x32xf32>
    %395 = arith.divf %393, %394 : vector<8x32xf32>
    %c32_246 = arith.constant 32 : index
    %c0_247 = arith.constant 0 : index
    %396 = vector.load %arg13[%c32_246, %c0_247] : memref<64x32xf32, #tpu.memory_space<vmem>>, vector<8x32xf32>
    %397 = arith.addf %396, %386 : vector<8x32xf32>
    %398 = arith.negf %397 : vector<8x32xf32>
    %399 = math.exp %398 : vector<8x32xf32>
    %cst_248 = arith.constant 1.000000e+00 : f32
    %400 = vector.broadcast %cst_248 : f32 to vector<8x32xf32>
    %401 = arith.addf %400, %399 : vector<8x32xf32>
    %402 = arith.divf %400, %401 : vector<8x32xf32>
    %c32_249 = arith.constant 32 : index
    %c0_250 = arith.constant 0 : index
    %403 = vector.load %arg14[%c32_249, %c0_250] : memref<64x32xf32, #tpu.memory_space<vmem>>, vector<8x32xf32>
    %404 = arith.mulf %395, %388 : vector<8x32xf32>
    %405 = arith.addf %403, %404 : vector<8x32xf32>
    %406 = math.tanh %405 : vector<8x32xf32>
    %407 = arith.subf %384, %406 : vector<8x32xf32>
    %408 = arith.mulf %402, %407 : vector<8x32xf32>
    %409 = arith.addf %406, %408 : vector<8x32xf32>
    %cst_251 = arith.constant dense<0.000000e+00> : vector<8x32xf32>
    %410 = tpu.matmul %409, %274, %cst_251 {dimension_numbers = #tpu.dot_dimension_numbers<[1], [0], [0], [1], [0, 0, 1, 1], [], []>} : vector<8x32xf32>, vector<32x32xf32>, vector<8x32xf32> -> vector<8x32xf32>
    %cst_252 = arith.constant dense<0.000000e+00> : vector<8x32xf32>
    %411 = tpu.matmul %409, %276, %cst_252 {dimension_numbers = #tpu.dot_dimension_numbers<[1], [0], [0], [1], [0, 0, 1, 1], [], []>} : vector<8x32xf32>, vector<32x32xf32>, vector<8x32xf32> -> vector<8x32xf32>
    %cst_253 = arith.constant dense<0.000000e+00> : vector<8x32xf32>
    %412 = tpu.matmul %409, %278, %cst_253 {dimension_numbers = #tpu.dot_dimension_numbers<[1], [0], [0], [1], [0, 0, 1, 1], [], []>} : vector<8x32xf32>, vector<32x32xf32>, vector<8x32xf32> -> vector<8x32xf32>
    %413 = arith.addf %412, %282 : vector<8x32xf32>
    %c40_254 = arith.constant 40 : index
    %c0_255 = arith.constant 0 : index
    %414 = vector.load %arg12[%c40_254, %c0_255] : memref<64x32xf32, #tpu.memory_space<vmem>>, vector<8x32xf32>
    %415 = arith.addf %414, %410 : vector<8x32xf32>
    %416 = arith.negf %415 : vector<8x32xf32>
    %417 = math.exp %416 : vector<8x32xf32>
    %cst_256 = arith.constant 1.000000e+00 : f32
    %418 = vector.broadcast %cst_256 : f32 to vector<8x32xf32>
    %419 = arith.addf %418, %417 : vector<8x32xf32>
    %420 = arith.divf %418, %419 : vector<8x32xf32>
    %c40_257 = arith.constant 40 : index
    %c0_258 = arith.constant 0 : index
    %421 = vector.load %arg13[%c40_257, %c0_258] : memref<64x32xf32, #tpu.memory_space<vmem>>, vector<8x32xf32>
    %422 = arith.addf %421, %411 : vector<8x32xf32>
    %423 = arith.negf %422 : vector<8x32xf32>
    %424 = math.exp %423 : vector<8x32xf32>
    %cst_259 = arith.constant 1.000000e+00 : f32
    %425 = vector.broadcast %cst_259 : f32 to vector<8x32xf32>
    %426 = arith.addf %425, %424 : vector<8x32xf32>
    %427 = arith.divf %425, %426 : vector<8x32xf32>
    %c40_260 = arith.constant 40 : index
    %c0_261 = arith.constant 0 : index
    %428 = vector.load %arg14[%c40_260, %c0_261] : memref<64x32xf32, #tpu.memory_space<vmem>>, vector<8x32xf32>
    %429 = arith.mulf %420, %413 : vector<8x32xf32>
    %430 = arith.addf %428, %429 : vector<8x32xf32>
    %431 = math.tanh %430 : vector<8x32xf32>
    %432 = arith.subf %409, %431 : vector<8x32xf32>
    %433 = arith.mulf %427, %432 : vector<8x32xf32>
    %434 = arith.addf %431, %433 : vector<8x32xf32>
    %cst_262 = arith.constant dense<0.000000e+00> : vector<8x32xf32>
    %435 = tpu.matmul %434, %274, %cst_262 {dimension_numbers = #tpu.dot_dimension_numbers<[1], [0], [0], [1], [0, 0, 1, 1], [], []>} : vector<8x32xf32>, vector<32x32xf32>, vector<8x32xf32> -> vector<8x32xf32>
    %cst_263 = arith.constant dense<0.000000e+00> : vector<8x32xf32>
    %436 = tpu.matmul %434, %276, %cst_263 {dimension_numbers = #tpu.dot_dimension_numbers<[1], [0], [0], [1], [0, 0, 1, 1], [], []>} : vector<8x32xf32>, vector<32x32xf32>, vector<8x32xf32> -> vector<8x32xf32>
    %cst_264 = arith.constant dense<0.000000e+00> : vector<8x32xf32>
    %437 = tpu.matmul %434, %278, %cst_264 {dimension_numbers = #tpu.dot_dimension_numbers<[1], [0], [0], [1], [0, 0, 1, 1], [], []>} : vector<8x32xf32>, vector<32x32xf32>, vector<8x32xf32> -> vector<8x32xf32>
    %438 = arith.addf %437, %282 : vector<8x32xf32>
    %c48_265 = arith.constant 48 : index
    %c0_266 = arith.constant 0 : index
    %439 = vector.load %arg12[%c48_265, %c0_266] : memref<64x32xf32, #tpu.memory_space<vmem>>, vector<8x32xf32>
    %440 = arith.addf %439, %435 : vector<8x32xf32>
    %441 = arith.negf %440 : vector<8x32xf32>
    %442 = math.exp %441 : vector<8x32xf32>
    %cst_267 = arith.constant 1.000000e+00 : f32
    %443 = vector.broadcast %cst_267 : f32 to vector<8x32xf32>
    %444 = arith.addf %443, %442 : vector<8x32xf32>
    %445 = arith.divf %443, %444 : vector<8x32xf32>
    %c48_268 = arith.constant 48 : index
    %c0_269 = arith.constant 0 : index
    %446 = vector.load %arg13[%c48_268, %c0_269] : memref<64x32xf32, #tpu.memory_space<vmem>>, vector<8x32xf32>
    %447 = arith.addf %446, %436 : vector<8x32xf32>
    %448 = arith.negf %447 : vector<8x32xf32>
    %449 = math.exp %448 : vector<8x32xf32>
    %cst_270 = arith.constant 1.000000e+00 : f32
    %450 = vector.broadcast %cst_270 : f32 to vector<8x32xf32>
    %451 = arith.addf %450, %449 : vector<8x32xf32>
    %452 = arith.divf %450, %451 : vector<8x32xf32>
    %c48_271 = arith.constant 48 : index
    %c0_272 = arith.constant 0 : index
    %453 = vector.load %arg14[%c48_271, %c0_272] : memref<64x32xf32, #tpu.memory_space<vmem>>, vector<8x32xf32>
    %454 = arith.mulf %445, %438 : vector<8x32xf32>
    %455 = arith.addf %453, %454 : vector<8x32xf32>
    %456 = math.tanh %455 : vector<8x32xf32>
    %457 = arith.subf %434, %456 : vector<8x32xf32>
    %458 = arith.mulf %452, %457 : vector<8x32xf32>
    %459 = arith.addf %456, %458 : vector<8x32xf32>
    %cst_273 = arith.constant dense<0.000000e+00> : vector<8x32xf32>
    %460 = tpu.matmul %459, %274, %cst_273 {dimension_numbers = #tpu.dot_dimension_numbers<[1], [0], [0], [1], [0, 0, 1, 1], [], []>} : vector<8x32xf32>, vector<32x32xf32>, vector<8x32xf32> -> vector<8x32xf32>
    %cst_274 = arith.constant dense<0.000000e+00> : vector<8x32xf32>
    %461 = tpu.matmul %459, %276, %cst_274 {dimension_numbers = #tpu.dot_dimension_numbers<[1], [0], [0], [1], [0, 0, 1, 1], [], []>} : vector<8x32xf32>, vector<32x32xf32>, vector<8x32xf32> -> vector<8x32xf32>
    %cst_275 = arith.constant dense<0.000000e+00> : vector<8x32xf32>
    %462 = tpu.matmul %459, %278, %cst_275 {dimension_numbers = #tpu.dot_dimension_numbers<[1], [0], [0], [1], [0, 0, 1, 1], [], []>} : vector<8x32xf32>, vector<32x32xf32>, vector<8x32xf32> -> vector<8x32xf32>
    %463 = arith.addf %462, %282 : vector<8x32xf32>
    %c56_276 = arith.constant 56 : index
    %c0_277 = arith.constant 0 : index
    %464 = vector.load %arg12[%c56_276, %c0_277] : memref<64x32xf32, #tpu.memory_space<vmem>>, vector<8x32xf32>
    %465 = arith.addf %464, %460 : vector<8x32xf32>
    %466 = arith.negf %465 : vector<8x32xf32>
    %467 = math.exp %466 : vector<8x32xf32>
    %cst_278 = arith.constant 1.000000e+00 : f32
    %468 = vector.broadcast %cst_278 : f32 to vector<8x32xf32>
    %469 = arith.addf %468, %467 : vector<8x32xf32>
    %470 = arith.divf %468, %469 : vector<8x32xf32>
    %c56_279 = arith.constant 56 : index
    %c0_280 = arith.constant 0 : index
    %471 = vector.load %arg13[%c56_279, %c0_280] : memref<64x32xf32, #tpu.memory_space<vmem>>, vector<8x32xf32>
    %472 = arith.addf %471, %461 : vector<8x32xf32>
    %473 = arith.negf %472 : vector<8x32xf32>
    %474 = math.exp %473 : vector<8x32xf32>
    %cst_281 = arith.constant 1.000000e+00 : f32
    %475 = vector.broadcast %cst_281 : f32 to vector<8x32xf32>
    %476 = arith.addf %475, %474 : vector<8x32xf32>
    %477 = arith.divf %475, %476 : vector<8x32xf32>
    %c56_282 = arith.constant 56 : index
    %c0_283 = arith.constant 0 : index
    %478 = vector.load %arg14[%c56_282, %c0_283] : memref<64x32xf32, #tpu.memory_space<vmem>>, vector<8x32xf32>
    %479 = arith.mulf %470, %463 : vector<8x32xf32>
    %480 = arith.addf %478, %479 : vector<8x32xf32>
    %481 = math.tanh %480 : vector<8x32xf32>
    %482 = arith.subf %459, %481 : vector<8x32xf32>
    %483 = arith.mulf %477, %482 : vector<8x32xf32>
    %484 = arith.addf %481, %483 : vector<8x32xf32>
    %c1_284 = arith.constant 1 : index
    %c0_285 = arith.constant 0 : index
    %c0_286 = arith.constant 0 : index
    %485 = vector.load %arg10[%c1_284, %c0_285, %c0_286] : memref<2x8x32xf32, #tpu.memory_space<vmem>>, vector<1x8x32xf32>
    %486 = vector.shape_cast %485 : vector<1x8x32xf32> to vector<8x32xf32>
    %487 = vector.shape_cast %484 : vector<8x32xf32> to vector<1x8x32xf32>
    tpu.vector_store %arg10[%c1_284, %c0_285, %c0_286], %487 {strides = array<i32>} : memref<2x8x32xf32, #tpu.memory_space<vmem>>, vector<1x8x32xf32>,
    %c0_287 = arith.constant 0 : index
    %c0_288 = arith.constant 0 : index
    %488 = vector.load %arg7[%c0_287, %c0_288] : memref<32x128xf32, #tpu.memory_space<vmem>>, vector<32x128xf32>
    %cst_289 = arith.constant dense<0.000000e+00> : vector<8x128xf32>
    %489 = tpu.matmul %484, %488, %cst_289 {dimension_numbers = #tpu.dot_dimension_numbers<[1], [0], [0], [1], [0, 0, 1, 1], [], []>} : vector<8x32xf32>, vector<32x128xf32>, vector<8x128xf32> -> vector<8x128xf32>
    %c0_290 = arith.constant 0 : index
    %c0_291 = arith.constant 0 : index
    %490 = vector.load %arg8[%c0_290, %c0_291] : memref<1x128xf32, #tpu.memory_space<vmem>>, vector<1x128xf32>
    %491 = vector.broadcast %490 : vector<1x128xf32> to vector<8x128xf32>
    %492 = arith.addf %489, %491 : vector<8x128xf32>
    %493 = arith.negf %492 : vector<8x128xf32>
    %494 = math.exp %493 : vector<8x128xf32>
    %cst_292 = arith.constant 1.000000e+00 : f32
    %495 = vector.broadcast %cst_292 : f32 to vector<8x128xf32>
    %496 = arith.addf %495, %494 : vector<8x128xf32>
    %497 = arith.divf %495, %496 : vector<8x128xf32>
    %c0_293 = arith.constant 0 : index
    %c0_294 = arith.constant 0 : index
    %498 = vector.load %arg9[%c0_293, %c0_294] : memref<8x128xf32, #tpu.memory_space<vmem>>, vector<8x128xf32>
    tpu.vector_store %arg9[%c0_293, %c0_294], %497 {strides = array<i32>} : memref<8x128xf32, #tpu.memory_space<vmem>>, vector<8x128xf32>,
    return
  }
}

</mosaic_0001>

<bundles_post_ra>
// kernel: tpu_custom_call.1
= control target key start
LH: loop header
LB: loop body
LE: loop exit
PB: predicated region body
PF: predicated region fallthrough
CT: control target
= control target key end

     0   :  { %16 = vsyncpa [#allocation7], 0  ;;  %s7378_s0 = inlined_call_operand.vmem [shape: f32[64,16], index: 0, kind: input, shape index: {}]   ;;  %s7379_s1 = inlined_call_operand.hbm [shape: f32[2,8,32], index: 1, kind: input, shape index: {}]   ;;  %s7380_s2 = inlined_call_operand.vmem [shape: f32[3,16,32], index: 2, kind: input, shape index: {}]   ;;  %s7381_s3 = inlined_call_operand.hbm [shape: f32[3,32,32], index: 3, kind: input, shape index: {}]   ;;  %s7382_s4 = inlined_call_operand.hbm [shape: f32[2,3,32,32], index: 4, kind: input, shape index: {}]   ;;  %s7383_s5 = inlined_call_operand.vmem [shape: f32[2,3,1,32], index: 5, kind: input, shape index: {}]   ;;  %s7384_s6 = inlined_call_operand.vmem [shape: f32[2,1,32], index: 6, kind: input, shape index: {}]   ;;  %s7385_s7 = inlined_call_operand.vmem [shape: f32[32,128], index: 7, kind: input, shape index: {}]   ;;  %s7386_s8 = inlined_call_operand.vmem [shape: f32[1,128], index: 8, kind: input, shape index: {}]   ;;  %s7387_s9 = inlined_call_operand.hbm [shape: f32[8,128], index: 9, kind: output, shape index: {0}]   ;;  %s7388_s10 = inlined_call_operand.hbm [shape: f32[2,8,32], index: 10, kind: output, shape index: {1}]  }
   0x1   :  { %17 = vsyncpa [#allocation10], 0 }
   0x2   :  { %18 = vsyncpa [#allocation8], 0 }
   0x3   :  { %19 = vsyncpa [#allocation14], 0  ;;  %s6578_s13 = smov [#allocation9]   ;;  %s6579_s15 = smov [#allocation6]  }
   0x4   :  { %s41_s14 = sshll.u32 %s6578_s13, 4  ;;  %s27_s16 = sshll.u32 %s6579_s15, 4  ;;  %s42_s14 = int_to_ptr.vmem [resolvable:$true] %s41_s14  ;;  %s6643_s16 = int_to_ptr.vmem [resolvable:$true] %s27_s16 }
   0x5   :  { %s6460_s19 = scalar_lea.hbm %s7381_s3, 1536 }
   0x6   :  { %p6461_p0 = scmp.ne.s32.totalorder %s7381_s3, %s6460_s19  ;;  %p6464_p1 = scmp.lt.u32.totalorder %s6460_s19, %s7381_s3 }
   0x8   :  { %p6466_p2 = pnand %p6464_p1, %p6461_p0 }
   0xa   :  { %6469 = shalt.err (!%p6466_p2)
}
   0xb   :  { %s6470_s24 = scalar_lea.vmem %s42_s14, 1536  ;;  %p6475_p4 = scmp.lt.s32.totalorder %s42_s14, %s42_s14 }
   0xc   :  { %p6471_p3 = scmp.ne.s32.totalorder %s42_s14, %s6470_s24  ;;  %p6476_p5 = scmp.lt.s32.totalorder %s6470_s24, %s6470_s24 }
   0xe   :  { %p6477_p6 = por %p6476_p5, %p6475_p4 }
  0x10   :  { %p6478_p7 = pnand %p6477_p6, %p6471_p3 }
  0x12   :  { %6481 = shalt.err (!%p6478_p7)
}
  0x13   :  { %s6580_s25 = smov 128   ;;  %s6581_s26 = smov 8  }
  0x14   :  { %47 = dma.hbm_to_vmem [thread:$0]  %s7381_s3, 1536, %s42_s14, [#allocation10], %s6580_s25, %s6580_s25, %s6581_s26  }
  0x15   :  { %s6482_s11 = scalar_lea.hbm %s7379_s1, 256 }
  0x16   :  { %p6483_p8 = scmp.ne.s32.totalorder %s7379_s1, %s6482_s11  ;;  %p6486_p9 = scmp.lt.u32.totalorder %s6482_s11, %s7379_s1 }
  0x18   :  { %p6488_p10 = pnand %p6486_p9, %p6483_p8 }
  0x1a   :  { %6491 = shalt.err (!%p6488_p10)
}
  0x1b   :  { %s6492_s18 = scalar_lea.vmem %s6643_s16, 256  ;;  %p6497_p12 = scmp.lt.s32.totalorder %s6643_s16, %s6643_s16 }
  0x1c   :  { %p6493_p11 = scmp.ne.s32.totalorder %s6643_s16, %s6492_s18  ;;  %p6498_p13 = scmp.lt.s32.totalorder %s6492_s18, %s6492_s18 }
  0x1e   :  { %p6499_p0 = por %p6498_p13, %p6497_p12 }
  0x20   :  { %p6500_p1 = pnand %p6499_p0, %p6493_p11 }
  0x22   :  { %6503 = shalt.err (!%p6500_p1)
}
  0x23   :  { %33 = dma.hbm_to_vmem [thread:$0]  %s7379_s1, 256, %s6643_s16, [#allocation7], %s6580_s25, %s6580_s25, %s6581_s26  }
  0x24   :  { %s6582_s19 = smov [#allocation11]   ;;  %s6504_s23 = scalar_lea.hbm %s7382_s4, 3072 }
  0x25   :  { %s53_s20 = sshll.u32 %s6582_s19, 4  ;;  %p6505_p2 = scmp.ne.s32.totalorder %s7382_s4, %s6504_s23  ;;  %s54_s20 = int_to_ptr.vmem [resolvable:$true] %s53_s20 }
  0x26   :  { %p6508_p3 = scmp.lt.u32.totalorder %s6504_s23, %s7382_s4 }
  0x28   :  { %p6510_p4 = pnand %p6508_p3, %p6505_p2 }
  0x2a   :  { %6513 = shalt.err (!%p6510_p4)
}
  0x2b   :  { %s6514_s30 = scalar_lea.vmem %s54_s20, 3072  ;;  %p6519_p6 = scmp.lt.s32.totalorder %s54_s20, %s54_s20 }
  0x2c   :  { %p6515_p5 = scmp.ne.s32.totalorder %s54_s20, %s6514_s30  ;;  %p6520_p7 = scmp.lt.s32.totalorder %s6514_s30, %s6514_s30 }
  0x2e   :  { %p6521_p8 = por %p6520_p7, %p6519_p6 }
  0x30   :  { %p6522_p9 = pnand %p6521_p8, %p6515_p5 }
  0x32   :  { %6525 = shalt.err (!%p6522_p9)
}
  0x33   :  { %59 = dma.hbm_to_vmem [thread:$0]  %s7382_s4, 3072, %s54_s20, [#allocation10], %s6580_s25, %s6580_s25, %s6581_s26  }
  0x34   :  { %6570 = dma.done.wait [#allocation7], 256  }
  0x35   :  { %6571 = vsyncadd [#allocation7], 4294967040 }
  0x36   :  { %6572 = dma.done.wait [#allocation10], 4608  }
  0x37   :  { %6573 = vsyncadd [#allocation10], 4294962688  ;;  %vm94_vm0 = vcmask 130048   ;;  %v85_v0 = vld [vmem:[%s7380_s2] sm:$0xff]  ;;  %v86_v1 = vld [vmem:[%s7380_s2 + $0x8] sm:$0xff]  ;;  %v6583_v16 = vmov 0.0|0.0  }
  0x38   :  { %v6704_v2 = vld [vmem:[%s7378_s0 + $0x30] sm:$0xff]  ;;  %v5954_v3 = vpack.c.bf16 %v86_v1, %v85_v0  ;;  %v4857_v5 = vld [vmem:[%s7380_s2 + $0x18] sm:$0xff]  ;;  %v77_v8 = vld [vmem:[%s7378_s0] sm:$0xff]  ;;  %vm6584_vm1 = vmmov 0   ;;  %v6585_v32 = vmov 0.0   ;;  %vm224_vm2 = vcmask 261120  }
  0x39   :  { %5320 = vmatprep.mubr.msk.f32.mxu1 %vm94_vm0, %v6704_v2  ;;  %v4856_v4 = vld [vmem:[%s7380_s2 + $0x10] sm:$0xff]  ;;  %v6717_v7 = vld [vmem:[%s7378_s0 + $0x38] sm:$0xff]  ;;  %v481_v9 = vld [vmem:[#allocation11] sm:$0xff]  ;;  %5311 = vmatprep.mubr.msk.f32.mxu0 %vm94_vm0, %v77_v8 }
  0x3a   :  { %v5958_v6 = vpack.c.bf16 %v4857_v5, %v4856_v4  ;;  %6284 = vmatprep.subr.bf16.mxu1 %v5954_v3  ;;  %5955 = vmatprep.subr.bf16.mxu0 %v5954_v3  ;;  %v482_v10 = vld [vmem:[#allocation11 + $0x8] sm:$0xff]  ;;  %v4868_v11 = vld [vmem:[%s7380_s2 + $0x20] sm:$0xff]  ;;  %v79_v17 = vld [vmem:[%s7378_s0 + $0x10] sm:$0xff] }
  0x3b   :  { %6285 = vmatpush3.bf16.msra.mxu1 %v5954_v3  ;;  %5957 = vmatpush3.bf16.msra.mxu0 %v5954_v3  ;;  %v4869_v12 = vld [vmem:[%s7380_s2 + $0x28] sm:$0xff]  ;;  %v6736_v15 = vpack.c.bf16 %v482_v10, %v481_v9  ;;  %v483_v18 = vld [vmem:[#allocation11 + $0x10] sm:$0xff]  ;;  %v484_v19 = vld [vmem:[#allocation11 + $0x18] sm:$0xff] }
  0x3c   :  { %5959 = vmatprep.subr.bf16.mxu1 %v5958_v6  ;;  %v78_v13 = vld [vmem:[%s7378_s0 + $0x8] sm:$0xff]  ;;  %v5962_v14 = vpack.c.bf16 %v4869_v12, %v4868_v11  ;;  %v80_v20 = vld [vmem:[%s7378_s0 + $0x18] sm:$0xff]  ;;  %v81_v21 = vld [vmem:[%s7378_s0 + $0x20] sm:$0xff]  ;;  %v6753_v22 = vpack.c.bf16 %v484_v19, %v483_v18 }
  0x3d   :  { %v491_v23 = vld [vmem:[#allocation11 + $0x40] sm:$0xff]  ;;  %v492_v24 = vld [vmem:[#allocation11 + $0x48] sm:$0xff]  ;;  %v493_v27 = vld [vmem:[#allocation11 + $0x50] sm:$0xff] }
  0x3e   :  { %5321 = vmatmul.mubr.msk.f32.vlgmr.msra.gmra.mrb[0].mxu1 %vm94_vm0, %v6717_v7  ;;  %5312 = vmatmul.mubr.msk.f32.vlgmr.msra.gmra.mrb[0].mxu0 %vm94_vm0, %v78_v13  ;;  %v82_v25 = vld [vmem:[%s7378_s0 + $0x28] sm:$0xff]  ;;  %v6765_v26 = vpack.c.bf16 %v492_v24, %v491_v23  ;;  %v494_v28 = vld [vmem:[#allocation11 + $0x58] sm:$0xff]  ;;  %v486_v29 = vld [vmem:[#allocation11 + $0x20] sm:$0xff] }
  0x3f   :  { %5961 = vmatpush3.bf16.msra.mxu1 %v5958_v6  ;;  %5327 = vmatprep.mubr.msk.f32.mxu1 %vm94_vm0, %v77_v8  ;;  %v487_v30 = vld [vmem:[#allocation11 + $0x28] sm:$0xff]  ;;  %v6776_v31 = vpack.c.bf16 %v494_v28, %v493_v27  ;;  %v6783_v33 = vld [vmem:[#allocation6] sm:$0xff]  ;;  %v489_v36 = vld [vmem:[#allocation11 + $0x38] sm:$0xff] }
  0x40   :  { %5966 = vmatprep.subr.bf16.mxu1 %v6583_v16  ;;  %5963 = vmatprep.subr.bf16.mxu0 %v5962_v14  ;;  %v6785_v34 = vpack.c.bf16 %v487_v30, %v486_v29  ;;  %v488_v35 = vld [vmem:[#allocation11 + $0x30] sm:$0xff]  ;;  %v4847_v38 = vld [vmem:[%s7383_s5] ss:$0 sm:$0xff]  ;;  %v4859_v46 = vld [vmem:[%s7383_s5 + $0x1] ss:$0 sm:$0xff] }
  0x41   :  { %5965 = vmatpush3.bf16.msra.mxu0 %v5962_v14  ;;  %5314 = vmatprep.mubr.msk.f32.mxu0 %vm94_vm0, %v79_v17  ;;  %v6794_v37 = vpack.c.bf16 %v489_v36, %v488_v35  ;;  %v4871_v0 = vld [vmem:[%s7383_s5 + $0x2] ss:$0 sm:$0xff] }
  0x42   :  { %5328 = vmatmul.mubr.msk.f32.vlgmr.msra.gmra.mrb[2].mxu1 %vm94_vm0, %v78_v13  ;;  %5315 = vmatmul.mubr.msk.f32.gmra.mrb[2].mxu0 %vm94_vm0, %v80_v20 }
  0x43   :  { %5968 = vmatpush3.bf16.msra.mxu1 %v6736_v15  ;;  %5330 = vmatprep.mubr.msk.f32.mxu1 %vm94_vm0, %v79_v17 }
  0x44   :  { %5969 = vmatprep.subr.bf16.mxu1 %v6583_v16  ;;  %5317 = vmatprep.mubr.msk.f32.mxu0 %vm94_vm0, %v81_v21 }
  0x45   :  { %5978 = vmatprep.subr.bf16.mxu0 %v6583_v16 }
  0x46   :  { %5331 = vmatmul.mubr.msk.f32.gmra.mrb[4].mxu1 %vm94_vm0, %v80_v20  ;;  %5318 = vmatmul.mubr.msk.f32.gmra.mrb[4].mxu0 %vm94_vm0, %v82_v25 }
  0x47   :  { %5333 = vmatprep.mubr.msk.f32.mxu1 %vm94_vm0, %v81_v21  ;;  %5971 = vmatpush3.bf16.msra.mxu1 %v6753_v22 }
  0x48   :  { %5972 = vmatprep.subr.bf16.mxu1 %v6583_v16  ;;  %5343 = vmatprep.mubr.msk.f32.mxu0 %vm94_vm0, %v77_v8 }
  0x4a   :  { %5334 = vmatmul.mubr.msk.f32.gmra.mrb[6].mxu1 %vm94_vm0, %v82_v25  ;;  %5344 = vmatmul.mubr.msk.f32.vlgmr.msra.gmra.mrb[6].mxu0 %vm94_vm0, %v78_v13 }
  0x4b   :  { %5336 = vmatprep.mubr.msk.f32.mxu1 %vm94_vm0, %v6704_v2  ;;  %5980 = vmatpush3.bf16.msra.mxu0 %v6765_v26 }
  0x4c   :  { %5346 = vmatprep.mubr.msk.f32.mxu0 %vm94_vm0, %v79_v17  ;;  %5981 = vmatprep.subr.bf16.mxu0 %v6583_v16 }
  0x4e   :  { %5337 = vmatmul.mubr.msk.f32.gmra.mrb[8].mxu1 %vm94_vm0, %v6717_v7  ;;  %5347 = vmatmul.mubr.msk.f32.gmra.mrb[8].mxu0 %vm94_vm0, %v80_v20 }
  0x4f   :  { %5363 = vmatprep.mubr.msk.f32.mxu1 %vm6584_vm1, %v6585_v32  ;;  %5349 = vmatprep.mubr.msk.f32.mxu0 %vm94_vm0, %v81_v21 }
  0x50   :  { %5983 = vmatpush3.bf16.msra.mxu0 %v6776_v31 }
  0x51   :  { %5990 = vmatprep.subr.bf16.mxu0 %v6583_v16 }
  0x52   :  { %5364 = vmatmul.mubr.msk.f32.vlgmr.msra.gmra.mrb[10].mxu1 %vm224_vm2, %v6783_v33  ;;  %5350 = vmatmul.mubr.msk.f32.gmra.mrb[10].mxu0 %vm94_vm0, %v82_v25 }
  0x53   :  { %5974 = vmatpush3.bf16.msra.mxu1 %v6785_v34  ;;  %5374 = vmatprep.mubr.msk.f32.mxu1 %vm6584_vm1, %v6585_v32 }
  0x54   :  { %5975 = vmatprep.subr.bf16.mxu1 %v6583_v16  ;;  %5352 = vmatprep.mubr.msk.f32.mxu0 %vm94_vm0, %v6704_v2 }
  0x56   :  { %5353 = vmatmul.mubr.msk.f32.gmra.mrb[12].mxu0 %vm94_vm0, %v6717_v7 }
  0x57   :  { %5977 = vmatpush3.bf16.msra.mxu1 %v6794_v37  ;;  %5385 = vmatprep.mubr.msk.f32.mxu0 %vm6584_vm1, %v6585_v32 }
  0x58   :  { %5984 = vmatprep.subr.bf16.mxu1 %v6583_v16 }
  0x5a   :  { %5375 = vmatmul.mubr.msk.f32.vlgmr.msra.gmra.mrb[12].mxu1 %vm224_vm2, %v6783_v33  ;;  %5386 = vmatmul.mubr.msk.f32.vlgmr.msra.gmra.mrb[14].mxu0 %vm224_vm2, %v6783_v33 }
  0x5b   :  { %5986 = vmatpush3.bf16.msra.mxu1 %v6736_v15  ;;  %5992 = vmatpush3.bf16.msra.mxu0 %v6785_v34 }
  0x5c   :  { %5987 = vmatprep.subr.bf16.mxu1 %v6583_v16  ;;  %5993 = vmatprep.subr.bf16.mxu0 %v6583_v16 }
  0x5d   :  { %5396 = vmatprep.mubr.msk.f32.mxu1 %vm6584_vm1, %v6585_v32  ;;  %5407 = vmatprep.mubr.msk.f32.mxu0 %vm6584_vm1, %v6585_v32 }
  0x5f   :  { %5989 = vmatpush3.bf16.msra.mxu1 %v6753_v22  ;;  %5995 = vmatpush3.bf16.msra.mxu0 %v6794_v37 }
  0x60   :  { %5996 = vmatprep.subr.bf16.mxu1 %v6583_v16  ;;  %6002 = vmatprep.subr.bf16.mxu0 %v6583_v16 }
 0x111   :  { %v5322_v39 = vpop.f32.mrb[0].mxu1  ;;  %v5313_v40 = vpop.f32.mrb[0].mxu0 }
 0x112   :  { %v221_v41 = vadd.f32 %v5322_v39, %v4847_v38  ;;  %v215_v42 = vpop.f32.mrb[1].mxu1  ;;  %v191_v43 = vadd.f32 %v5313_v40, %v4847_v38  ;;  %v185_v44 = vpop.f32.mrb[1].mxu0 }
 0x113   :  { %v216_v45 = vadd.f32 %v4847_v38, %v215_v42  ;;  %v186_v47 = vadd.f32 %v4847_v38, %v185_v44 }
 0x114   :  { %232 = vst.msk [vmem:[#allocation3 + $0x38] sm:$0xff] %vm224_vm2, %v221_v41  ;;  %226 = vst.msk [vmem:[#allocation3 + $0x8] sm:$0xff] %vm224_vm2, %v191_v43 }
 0x115   :  { %231 = vst.msk [vmem:[#allocation3 + $0x30] sm:$0xff] %vm224_vm2, %v216_v45  ;;  %v5329_v48 = vpop.f32.mrb[2].mxu1  ;;  %225 = vst.msk [vmem:[#allocation3] sm:$0xff] %vm224_vm2, %v186_v47  ;;  %v5316_v49 = vpop.f32.mrb[2].mxu0 }
 0x116   :  { %v316_v50 = vadd.f32 %v5329_v48, %v4859_v46  ;;  %v310_v51 = vpop.f32.mrb[3].mxu1  ;;  %v201_v52 = vadd.f32 %v5316_v49, %v4847_v38  ;;  %v195_v53 = vpop.f32.mrb[3].mxu0  ;;  %v6859_v48 = vld [vmem:[%s7384_s6] ss:$0 sm:$0xff] }
 0x117   :  { %v311_v54 = vadd.f32 %v4859_v46, %v310_v51  ;;  %v196_v55 = vadd.f32 %v4847_v38, %v195_v53 }
 0x118   :  { %350 = vst.msk [vmem:[#allocation4 + $0x8] sm:$0xff] %vm224_vm2, %v316_v50  ;;  %228 = vst.msk [vmem:[#allocation3 + $0x18] sm:$0xff] %vm224_vm2, %v201_v52 }
 0x119   :  { %349 = vst.msk [vmem:[#allocation4] sm:$0xff] %vm224_vm2, %v311_v54  ;;  %v5332_v56 = vpop.f32.mrb[4].mxu1  ;;  %227 = vst.msk [vmem:[#allocation3 + $0x10] sm:$0xff] %vm224_vm2, %v196_v55  ;;  %v5319_v57 = vpop.f32.mrb[4].mxu0 }
 0x11a   :  { %v326_v58 = vadd.f32 %v5332_v56, %v4859_v46  ;;  %v320_v59 = vpop.f32.mrb[5].mxu1  ;;  %v211_v60 = vadd.f32 %v5319_v57, %v4847_v38  ;;  %v205_v61 = vpop.f32.mrb[5].mxu0 }
 0x11b   :  { %v321_v62 = vadd.f32 %v4859_v46, %v320_v59  ;;  %v206_v63 = vadd.f32 %v4847_v38, %v205_v61  ;;  %v953_v61 = vld [vmem:[#allocation3 + $0x8] sm:$0xff] }
 0x11c   :  { %352 = vst.msk [vmem:[#allocation4 + $0x18] sm:$0xff] %vm224_vm2, %v326_v58  ;;  %230 = vst.msk [vmem:[#allocation3 + $0x28] sm:$0xff] %vm224_vm2, %v211_v60  ;;  %v716_v18 = vld [vmem:[#allocation3] sm:$0xff] }
 0x11d   :  { %351 = vst.msk [vmem:[#allocation4 + $0x10] sm:$0xff] %vm224_vm2, %v321_v62  ;;  %v5335_v1 = vpop.f32.mrb[6].mxu1  ;;  %229 = vst.msk [vmem:[#allocation3 + $0x20] sm:$0xff] %vm224_vm2, %v206_v63  ;;  %v5345_v2 = vpop.f32.mrb[6].mxu0 }
 0x11e   :  { %v336_v3 = vadd.f32 %v5335_v1, %v4859_v46  ;;  %v330_v4 = vpop.f32.mrb[7].mxu1  ;;  %v440_v5 = vadd.f32 %v5345_v2, %v4871_v0  ;;  %v434_v6 = vpop.f32.mrb[7].mxu0 }
 0x11f   :  { %v331_v7 = vadd.f32 %v4859_v46, %v330_v4  ;;  %v435_v8 = vadd.f32 %v4871_v0, %v434_v6 }
 0x120   :  { %354 = vst.msk [vmem:[#allocation4 + $0x28] sm:$0xff] %vm224_vm2, %v336_v3  ;;  %474 = vst.msk [vmem:[#allocation5 + $0x8] sm:$0xff] %vm224_vm2, %v440_v5  ;;  %v724_v40 = vld [vmem:[#allocation4] sm:$0xff]  ;;  %v961_v3 = vld [vmem:[#allocation4 + $0x8] sm:$0xff] }
 0x121   :  { %353 = vst.msk [vmem:[#allocation4 + $0x20] sm:$0xff] %vm224_vm2, %v331_v7  ;;  %v5338_v9 = vpop.f32.mrb[8].mxu1  ;;  %473 = vst.msk [vmem:[#allocation5] sm:$0xff] %vm224_vm2, %v435_v8  ;;  %v5348_v10 = vpop.f32.mrb[8].mxu0 }
 0x122   :  { %v346_v11 = vadd.f32 %v5338_v9, %v4859_v46  ;;  %v340_v12 = vpop.f32.mrb[9].mxu1  ;;  %v450_v13 = vadd.f32 %v5348_v10, %v4871_v0  ;;  %v444_v14 = vpop.f32.mrb[9].mxu0 }
 0x123   :  { %v341_v17 = vadd.f32 %v4859_v46, %v340_v12  ;;  %v445_v19 = vadd.f32 %v4871_v0, %v444_v14 }
 0x124   :  { %356 = vst.msk [vmem:[#allocation4 + $0x38] sm:$0xff] %vm224_vm2, %v346_v11  ;;  %476 = vst.msk [vmem:[#allocation5 + $0x18] sm:$0xff] %vm224_vm2, %v450_v13 }
 0x125   :  { %355 = vst.msk [vmem:[#allocation4 + $0x30] sm:$0xff] %vm224_vm2, %v341_v17  ;;  %v572_v20 = vpop.f32.mrb[10].mxu1  ;;  %475 = vst.msk [vmem:[#allocation5 + $0x10] sm:$0xff] %vm224_vm2, %v445_v19  ;;  %v5351_v21 = vpop.f32.mrb[10].mxu0 }
 0x126   :  { %v717_v23 = vadd.f32 %v716_v18, %v572_v20  ;;  %v5365_v24 = vpop.f32.mrb[11].mxu1  ;;  %v460_v25 = vadd.f32 %v5351_v21, %v4871_v0  ;;  %v454_v27 = vpop.f32.mrb[11].mxu0 }
 0x127   :  { %v455_v28 = vadd.f32 %v4871_v0, %v454_v27  ;;  %v969_v14 = vld [vmem:[#allocation5 + $0x8] sm:$0xff]  ;;  %v1190_v27 = vld [vmem:[#allocation3 + $0x10] sm:$0xff] }
 0x128   :  { %v4884_v29 = vmul.f32 -1.442695, %v717_v23  ;;  %478 = vst.msk [vmem:[#allocation5 + $0x28] sm:$0xff] %vm224_vm2, %v460_v25  ;;  %v732_v53 = vld [vmem:[#allocation5] sm:$0xff] }
 0x129   :  { %477 = vst.msk [vmem:[#allocation5 + $0x20] sm:$0xff] %vm224_vm2, %v455_v28  ;;  %v5354_v30 = vpop.f32.mrb[12].mxu0 }
 0x12a   :  { %6296 = vpow2.f32 %v4884_v29  ;;  %v470_v35 = vadd.f32 %v5354_v30, %v4871_v0  ;;  %v464_v36 = vpop.f32.mrb[13].mxu0 }
 0x12b   :  { %v465_v38 = vadd.f32 %v4871_v0, %v464_v36 }
 0x12c   :  { %480 = vst.msk [vmem:[#allocation5 + $0x38] sm:$0xff] %vm224_vm2, %v470_v35 }
 0x12d   :  { %v642_v39 = vpop.f32.mrb[12].mxu1  ;;  %479 = vst.msk [vmem:[#allocation5 + $0x30] sm:$0xff] %vm224_vm2, %v465_v38  ;;  %v712_v41 = vpop.f32.mrb[14].mxu0  ;;  %v1198_v38 = vld [vmem:[#allocation4 + $0x10] sm:$0xff] }
 0x12e   :  { %v725_v42 = vadd.f32 %v724_v40, %v642_v39  ;;  %v5376_v43 = vpop.f32.mrb[13].mxu1  ;;  %v5387_v44 = vpop.f32.mrb[15].mxu0  ;;  %v713_v49 = vadd.f32 %v6859_v48, %v712_v41 }
 0x130   :  { %v4885_v45 = vmul.f32 -1.442695, %v725_v42 }
 0x132   :  { %6298 = vpow2.f32 %v4885_v45 }
 0x134   :  { %v6297_v46 = vpop.eup %6296 }
 0x135   :  { %v721_v47 = vadd.f32 1.0, %v6297_v46 }
 0x137   :  { %6300 = vrcp.f32 %v721_v47 }
 0x13c   :  { %v6299_v50 = vpop.eup %6298 }
 0x13d   :  { %v729_v54 = vadd.f32 1.0, %v6299_v50  ;;  %v1206_v50 = vld [vmem:[#allocation5 + $0x10] sm:$0xff] }
 0x141   :  { %v6301_v51 = vpop.eup %6300 }
 0x142   :  { %v733_v52 = vmul.f32 %v6301_v51, %v713_v49 }
 0x144   :  { %v734_v55 = vadd.f32 %v733_v52, %v732_v53 }
 0x146   :  { %6302 = vtanh.f32 %v734_v55 }
 0x147   :  { %6304 = vrcp.f32 %v729_v54 }
 0x150   :  { %v6303_v56 = vpop.eup %6302 }
 0x151   :  { %v736_v57 = vsub.f32 %v6783_v33, %v6303_v56  ;;  %v6305_v58 = vpop.eup %6304 }
 0x153   :  { %v737_v59 = vmul.f32 %v6305_v58, %v736_v57 }
 0x155   :  { %v738_v60 = vadd.f32 %v6303_v56, %v737_v59  ;;  %v1427_v59 = vld [vmem:[#allocation3 + $0x18] sm:$0xff] }
 0x157   :  { %739 = vst.msk [vmem:[#allocation2] sm:$0xff] %vm224_vm2, %v738_v60  ;;  %5397 = vmatmul.mubr.msk.f32.vlgmr.msra.gmra.mrb[14].mxu1 %vm224_vm2, %v738_v60  ;;  %5408 = vmatmul.mubr.msk.f32.vlgmr.msra.gmra.mrb[16].mxu0 %vm224_vm2, %v738_v60 }
 0x158   :  { %5998 = vmatpush3.bf16.msra.mxu1 %v6765_v26  ;;  %5418 = vmatprep.mubr.msk.f32.mxu1 %vm6584_vm1, %v6585_v32 }
 0x159   :  { %5999 = vmatprep.subr.bf16.mxu1 %v6583_v16  ;;  %6004 = vmatpush3.bf16.msra.mxu0 %v6736_v15 }
 0x15a   :  { %6005 = vmatprep.subr.bf16.mxu0 %v6583_v16  ;;  %5429 = vmatprep.mubr.msk.f32.mxu0 %vm6584_vm1, %v6585_v32 }
 0x15c   :  { %6001 = vmatpush3.bf16.msra.mxu1 %v6776_v31 }
 0x15d   :  { %6008 = vmatprep.subr.bf16.mxu1 %v6583_v16  ;;  %6007 = vmatpush3.bf16.msra.mxu0 %v6753_v22 }
 0x15e   :  { %6014 = vmatprep.subr.bf16.mxu0 %v6583_v16 }
 0x15f   :  { %5419 = vmatmul.mubr.msk.f32.vlgmr.msra.gmra.mrb[16].mxu1 %vm224_vm2, %v738_v60 }
 0x160   :  { %6010 = vmatpush3.bf16.msra.mxu1 %v6785_v34  ;;  %5440 = vmatprep.mubr.msk.f32.mxu1 %vm6584_vm1, %v6585_v32 }
 0x161   :  { %6011 = vmatprep.subr.bf16.mxu1 %v6583_v16 }
 0x164   :  { %6013 = vmatpush3.bf16.msra.mxu1 %v6794_v37 }
 0x165   :  { %6020 = vmatprep.subr.bf16.mxu1 %v6583_v16 }
 0x22a   :  { %v809_v33 = vpop.f32.mrb[14].mxu1  ;;  %v879_v62 = vpop.f32.mrb[16].mxu0 }
 0x22b   :  { %v954_v63 = vadd.f32 %v953_v61, %v809_v33  ;;  %v5398_v0 = vpop.f32.mrb[15].mxu1  ;;  %v5409_v1 = vpop.f32.mrb[17].mxu0  ;;  %v962_v5 = vadd.f32 %v961_v3, %v879_v62 }
 0x22c   :  { %v1435_v0 = vld [vmem:[#allocation4 + $0x18] sm:$0xff] }
 0x22d   :  { %v4889_v2 = vmul.f32 -1.442695, %v954_v63  ;;  %v4890_v7 = vmul.f32 -1.442695, %v962_v5 }
 0x22f   :  { %6306 = vpow2.f32 %v4889_v2 }
 0x230   :  { %6308 = vpow2.f32 %v4890_v7 }
 0x232   :  { %v949_v4 = vpop.f32.mrb[16].mxu1 }
 0x233   :  { %v5420_v6 = vpop.f32.mrb[17].mxu1  ;;  %v950_v11 = vadd.f32 %v6859_v48, %v949_v4 }
 0x239   :  { %v6307_v8 = vpop.eup %6306 }
 0x23a   :  { %v958_v9 = vadd.f32 1.0, %v6307_v8  ;;  %v6309_v10 = vpop.eup %6308 }
 0x23b   :  { %v966_v17 = vadd.f32 1.0, %v6309_v10 }
 0x23c   :  { %6310 = vrcp.f32 %v958_v9 }
 0x246   :  { %v6311_v12 = vpop.eup %6310 }
 0x247   :  { %v970_v13 = vmul.f32 %v6311_v12, %v950_v11  ;;  %v1443_v11 = vld [vmem:[#allocation5 + $0x18] sm:$0xff] }
 0x249   :  { %v971_v18 = vadd.f32 %v970_v13, %v969_v14 }
 0x24b   :  { %6312 = vtanh.f32 %v971_v18 }
 0x24c   :  { %6314 = vrcp.f32 %v966_v17 }
 0x255   :  { %v6313_v19 = vpop.eup %6312 }
 0x256   :  { %v973_v20 = vsub.f32 %v738_v60, %v6313_v19  ;;  %v6315_v21 = vpop.eup %6314 }
 0x258   :  { %v974_v23 = vmul.f32 %v6315_v21, %v973_v20 }
 0x25a   :  { %v975_v24 = vadd.f32 %v6313_v19, %v974_v23  ;;  %v1664_v23 = vld [vmem:[#allocation3 + $0x20] sm:$0xff] }
 0x25c   :  { %976 = vst.msk [vmem:[#allocation2 + $0x8] sm:$0xff] %vm224_vm2, %v975_v24  ;;  %5430 = vmatmul.mubr.msk.f32.vlgmr.msra.gmra.mrb[18].mxu0 %vm224_vm2, %v975_v24  ;;  %5441 = vmatmul.mubr.msk.f32.vlgmr.msra.gmra.mrb[18].mxu1 %vm224_vm2, %v975_v24 }
 0x25d   :  { %6016 = vmatpush3.bf16.msra.mxu0 %v6765_v26  ;;  %5451 = vmatprep.mubr.msk.f32.mxu0 %vm6584_vm1, %v6585_v32 }
 0x25e   :  { %6017 = vmatprep.subr.bf16.mxu0 %v6583_v16  ;;  %6022 = vmatpush3.bf16.msra.mxu1 %v6736_v15 }
 0x25f   :  { %6023 = vmatprep.subr.bf16.mxu1 %v6583_v16  ;;  %5462 = vmatprep.mubr.msk.f32.mxu1 %vm6584_vm1, %v6585_v32 }
 0x261   :  { %6019 = vmatpush3.bf16.msra.mxu0 %v6776_v31 }
 0x262   :  { %6026 = vmatprep.subr.bf16.mxu0 %v6583_v16  ;;  %6025 = vmatpush3.bf16.msra.mxu1 %v6753_v22 }
 0x263   :  { %6032 = vmatprep.subr.bf16.mxu1 %v6583_v16 }
 0x264   :  { %5452 = vmatmul.mubr.msk.f32.vlgmr.msra.gmra.mrb[20].mxu0 %vm224_vm2, %v975_v24 }
 0x265   :  { %6028 = vmatpush3.bf16.msra.mxu0 %v6785_v34  ;;  %5473 = vmatprep.mubr.msk.f32.mxu0 %vm6584_vm1, %v6585_v32 }
 0x266   :  { %6029 = vmatprep.subr.bf16.mxu0 %v6583_v16 }
 0x269   :  { %6031 = vmatpush3.bf16.msra.mxu0 %v6794_v37 }
 0x26a   :  { %6038 = vmatprep.subr.bf16.mxu0 %v6583_v16 }
 0x32f   :  { %v1046_v25 = vpop.f32.mrb[18].mxu0  ;;  %v1116_v28 = vpop.f32.mrb[18].mxu1 }
 0x330   :  { %v1191_v29 = vadd.f32 %v1190_v27, %v1046_v25  ;;  %v5431_v30 = vpop.f32.mrb[19].mxu0  ;;  %v5442_v35 = vpop.f32.mrb[19].mxu1  ;;  %v1199_v40 = vadd.f32 %v1198_v38, %v1116_v28 }
 0x331   :  { %v1672_v30 = vld [vmem:[#allocation4 + $0x20] sm:$0xff] }
 0x332   :  { %v4894_v36 = vmul.f32 -1.442695, %v1191_v29  ;;  %v4895_v42 = vmul.f32 -1.442695, %v1199_v40 }
 0x334   :  { %6316 = vpow2.f32 %v4894_v36 }
 0x335   :  { %6318 = vpow2.f32 %v4895_v42 }
 0x337   :  { %v1186_v39 = vpop.f32.mrb[20].mxu0 }
 0x338   :  { %v5453_v41 = vpop.f32.mrb[21].mxu0  ;;  %v1187_v46 = vadd.f32 %v6859_v48, %v1186_v39 }
 0x33e   :  { %v6317_v43 = vpop.eup %6316 }
 0x33f   :  { %v1195_v44 = vadd.f32 1.0, %v6317_v43  ;;  %v6319_v45 = vpop.eup %6318 }
 0x340   :  { %v1203_v51 = vadd.f32 1.0, %v6319_v45 }
 0x341   :  { %6320 = vrcp.f32 %v1195_v44 }
 0x34b   :  { %v6321_v47 = vpop.eup %6320 }
 0x34c   :  { %v1207_v49 = vmul.f32 %v6321_v47, %v1187_v46  ;;  %v1680_v46 = vld [vmem:[#allocation5 + $0x20] sm:$0xff] }
 0x34e   :  { %v1208_v52 = vadd.f32 %v1207_v49, %v1206_v50 }
 0x350   :  { %6322 = vtanh.f32 %v1208_v52 }
 0x351   :  { %6324 = vrcp.f32 %v1203_v51 }
 0x35a   :  { %v6323_v53 = vpop.eup %6322 }
 0x35b   :  { %v1210_v54 = vsub.f32 %v975_v24, %v6323_v53  ;;  %v6325_v55 = vpop.eup %6324 }
 0x35d   :  { %v1211_v56 = vmul.f32 %v6325_v55, %v1210_v54 }
 0x35f   :  { %v1212_v57 = vadd.f32 %v6323_v53, %v1211_v56  ;;  %v1901_v56 = vld [vmem:[#allocation3 + $0x28] sm:$0xff] }
 0x361   :  { %1213 = vst.msk [vmem:[#allocation2 + $0x10] sm:$0xff] %vm224_vm2, %v1212_v57  ;;  %5463 = vmatmul.mubr.msk.f32.vlgmr.msra.gmra.mrb[20].mxu1 %vm224_vm2, %v1212_v57  ;;  %5474 = vmatmul.mubr.msk.f32.vlgmr.msra.gmra.mrb[22].mxu0 %vm224_vm2, %v1212_v57 }
 0x362   :  { %6034 = vmatpush3.bf16.msra.mxu1 %v6765_v26  ;;  %5484 = vmatprep.mubr.msk.f32.mxu1 %vm6584_vm1, %v6585_v32 }
 0x363   :  { %6035 = vmatprep.subr.bf16.mxu1 %v6583_v16  ;;  %6040 = vmatpush3.bf16.msra.mxu0 %v6736_v15 }
 0x364   :  { %6041 = vmatprep.subr.bf16.mxu0 %v6583_v16  ;;  %5495 = vmatprep.mubr.msk.f32.mxu0 %vm6584_vm1, %v6585_v32 }
 0x366   :  { %6037 = vmatpush3.bf16.msra.mxu1 %v6776_v31 }
 0x367   :  { %6044 = vmatprep.subr.bf16.mxu1 %v6583_v16  ;;  %6043 = vmatpush3.bf16.msra.mxu0 %v6753_v22 }
 0x368   :  { %6050 = vmatprep.subr.bf16.mxu0 %v6583_v16 }
 0x369   :  { %5485 = vmatmul.mubr.msk.f32.vlgmr.msra.gmra.mrb[22].mxu1 %vm224_vm2, %v1212_v57 }
 0x36a   :  { %6046 = vmatpush3.bf16.msra.mxu1 %v6785_v34  ;;  %5506 = vmatprep.mubr.msk.f32.mxu1 %vm6584_vm1, %v6585_v32 }
 0x36b   :  { %6047 = vmatprep.subr.bf16.mxu1 %v6583_v16 }
 0x36e   :  { %6049 = vmatpush3.bf16.msra.mxu1 %v6794_v37 }
 0x36f   :  { %6056 = vmatprep.subr.bf16.mxu1 %v6583_v16 }
 0x434   :  { %v1283_v58 = vpop.f32.mrb[20].mxu1  ;;  %v1353_v60 = vpop.f32.mrb[22].mxu0 }
 0x435   :  { %v1428_v33 = vadd.f32 %v1427_v59, %v1283_v58  ;;  %v5464_v61 = vpop.f32.mrb[21].mxu1  ;;  %v5475_v62 = vpop.f32.mrb[23].mxu0  ;;  %v1436_v2 = vadd.f32 %v1435_v0, %v1353_v60 }
 0x436   :  { %v1909_v61 = vld [vmem:[#allocation4 + $0x28] sm:$0xff] }
 0x437   :  { %v4899_v63 = vmul.f32 -1.442695, %v1428_v33  ;;  %v4900_v4 = vmul.f32 -1.442695, %v1436_v2 }
 0x439   :  { %6326 = vpow2.f32 %v4899_v63 }
 0x43a   :  { %6328 = vpow2.f32 %v4900_v4 }
 0x43c   :  { %v1423_v1 = vpop.f32.mrb[22].mxu1 }
 0x43d   :  { %v5486_v3 = vpop.f32.mrb[23].mxu1  ;;  %v1424_v8 = vadd.f32 %v6859_v48, %v1423_v1 }
 0x443   :  { %v6327_v5 = vpop.eup %6326 }
 0x444   :  { %v1432_v6 = vadd.f32 1.0, %v6327_v5  ;;  %v6329_v7 = vpop.eup %6328 }
 0x445   :  { %v1440_v12 = vadd.f32 1.0, %v6329_v7 }
 0x446   :  { %6330 = vrcp.f32 %v1432_v6 }
 0x450   :  { %v6331_v9 = vpop.eup %6330 }
 0x451   :  { %v1444_v10 = vmul.f32 %v6331_v9, %v1424_v8  ;;  %v1917_v8 = vld [vmem:[#allocation5 + $0x28] sm:$0xff] }
 0x453   :  { %v1445_v13 = vadd.f32 %v1444_v10, %v1443_v11 }
 0x455   :  { %6332 = vtanh.f32 %v1445_v13 }
 0x456   :  { %6334 = vrcp.f32 %v1440_v12 }
 0x45f   :  { %v6333_v14 = vpop.eup %6332 }
 0x460   :  { %v1447_v17 = vsub.f32 %v1212_v57, %v6333_v14  ;;  %v6335_v18 = vpop.eup %6334 }
 0x462   :  { %v1448_v19 = vmul.f32 %v6335_v18, %v1447_v17  ;;  %v2409_v18 = vld [vmem:[#allocation9 + $0x8] sm:$0xff] }
 0x464   :  { %v1449_v20 = vadd.f32 %v6333_v14, %v1448_v19 }
 0x466   :  { %1450 = vst.msk [vmem:[#allocation2 + $0x18] sm:$0xff] %vm224_vm2, %v1449_v20  ;;  %5496 = vmatmul.mubr.msk.f32.vlgmr.msra.gmra.mrb[24].mxu0 %vm224_vm2, %v1449_v20  ;;  %5507 = vmatmul.mubr.msk.f32.vlgmr.msra.gmra.mrb[24].mxu1 %vm224_vm2, %v1449_v20 }
 0x467   :  { %6052 = vmatpush3.bf16.msra.mxu0 %v6765_v26  ;;  %5517 = vmatprep.mubr.msk.f32.mxu0 %vm6584_vm1, %v6585_v32 }
 0x468   :  { %6053 = vmatprep.subr.bf16.mxu0 %v6583_v16  ;;  %6058 = vmatpush3.bf16.msra.mxu1 %v6736_v15 }
 0x469   :  { %6059 = vmatprep.subr.bf16.mxu1 %v6583_v16  ;;  %5528 = vmatprep.mubr.msk.f32.mxu1 %vm6584_vm1, %v6585_v32 }
 0x46b   :  { %6055 = vmatpush3.bf16.msra.mxu0 %v6776_v31 }
 0x46c   :  { %6062 = vmatprep.subr.bf16.mxu0 %v6583_v16  ;;  %6061 = vmatpush3.bf16.msra.mxu1 %v6753_v22 }
 0x46d   :  { %6068 = vmatprep.subr.bf16.mxu1 %v6583_v16 }
 0x46e   :  { %5518 = vmatmul.mubr.msk.f32.vlgmr.msra.gmra.mrb[26].mxu0 %vm224_vm2, %v1449_v20 }
 0x46f   :  { %6064 = vmatpush3.bf16.msra.mxu0 %v6785_v34  ;;  %5539 = vmatprep.mubr.msk.f32.mxu0 %vm6584_vm1, %v6585_v32 }
 0x470   :  { %6065 = vmatprep.subr.bf16.mxu0 %v6583_v16 }
 0x473   :  { %6067 = vmatpush3.bf16.msra.mxu0 %v6794_v37 }
 0x474   :  { %6074 = vmatprep.subr.bf16.mxu0 %v6583_v16 }
 0x539   :  { %v1520_v21 = vpop.f32.mrb[24].mxu0  ;;  %v1590_v24 = vpop.f32.mrb[24].mxu1 }
 0x53a   :  { %v1665_v25 = vadd.f32 %v1664_v23, %v1520_v21  ;;  %v5497_v27 = vpop.f32.mrb[25].mxu0  ;;  %v5508_v28 = vpop.f32.mrb[25].mxu1  ;;  %v1673_v36 = vadd.f32 %v1672_v30, %v1590_v24  ;;  %v2138_v21 = vld [vmem:[#allocation3 + $0x30] sm:$0xff] }
 0x53c   :  { %v4904_v29 = vmul.f32 -1.442695, %v1665_v25  ;;  %v4905_v39 = vmul.f32 -1.442695, %v1673_v36 }
 0x53e   :  { %6336 = vpow2.f32 %v4904_v29 }
 0x53f   :  { %6338 = vpow2.f32 %v4905_v39 }
 0x541   :  { %v1660_v35 = vpop.f32.mrb[26].mxu0 }
 0x542   :  { %v5519_v38 = vpop.f32.mrb[27].mxu0  ;;  %v1661_v43 = vadd.f32 %v6859_v48, %v1660_v35 }
 0x548   :  { %v6337_v40 = vpop.eup %6336 }
 0x549   :  { %v1669_v41 = vadd.f32 1.0, %v6337_v40  ;;  %v6339_v42 = vpop.eup %6338 }
 0x54a   :  { %v1677_v47 = vadd.f32 1.0, %v6339_v42  ;;  %v2154_v42 = vld [vmem:[#allocation5 + $0x30] sm:$0xff] }
 0x54b   :  { %6340 = vrcp.f32 %v1669_v41 }
 0x555   :  { %v6341_v44 = vpop.eup %6340 }
 0x556   :  { %v1681_v45 = vmul.f32 %v6341_v44, %v1661_v43 }
 0x558   :  { %v1682_v49 = vadd.f32 %v1681_v45, %v1680_v46 }
 0x55a   :  { %6342 = vtanh.f32 %v1682_v49 }
 0x55b   :  { %6344 = vrcp.f32 %v1677_v47 }
 0x564   :  { %v6343_v50 = vpop.eup %6342 }
 0x565   :  { %v1684_v51 = vsub.f32 %v1449_v20, %v6343_v50  ;;  %v6345_v52 = vpop.eup %6344 }
 0x567   :  { %v1685_v53 = vmul.f32 %v6345_v52, %v1684_v51  ;;  %v2411_v51 = vld [vmem:[#allocation9 + $0x18] sm:$0xff] }
 0x569   :  { %v1686_v54 = vadd.f32 %v6343_v50, %v1685_v53  ;;  %v2410_v50 = vld [vmem:[#allocation9 + $0x10] sm:$0xff] }
 0x56a   :  { %v6114_v53 = vpack.c.bf16 %v2411_v51, %v2410_v50 }
 0x56b   :  { %1687 = vst.msk [vmem:[#allocation2 + $0x20] sm:$0xff] %vm224_vm2, %v1686_v54  ;;  %5529 = vmatmul.mubr.msk.f32.vlgmr.msra.gmra.mrb[26].mxu1 %vm224_vm2, %v1686_v54  ;;  %5540 = vmatmul.mubr.msk.f32.vlgmr.msra.gmra.mrb[28].mxu0 %vm224_vm2, %v1686_v54 }
 0x56c   :  { %6070 = vmatpush3.bf16.msra.mxu1 %v6765_v26  ;;  %5550 = vmatprep.mubr.msk.f32.mxu1 %vm6584_vm1, %v6585_v32 }
 0x56d   :  { %6071 = vmatprep.subr.bf16.mxu1 %v6583_v16  ;;  %6076 = vmatpush3.bf16.msra.mxu0 %v6736_v15 }
 0x56e   :  { %6077 = vmatprep.subr.bf16.mxu0 %v6583_v16  ;;  %5561 = vmatprep.mubr.msk.f32.mxu0 %vm6584_vm1, %v6585_v32 }
 0x570   :  { %6073 = vmatpush3.bf16.msra.mxu1 %v6776_v31 }
 0x571   :  { %6080 = vmatprep.subr.bf16.mxu1 %v6583_v16  ;;  %6079 = vmatpush3.bf16.msra.mxu0 %v6753_v22 }
 0x572   :  { %6086 = vmatprep.subr.bf16.mxu0 %v6583_v16 }
 0x573   :  { %5551 = vmatmul.mubr.msk.f32.vlgmr.msra.gmra.mrb[28].mxu1 %vm224_vm2, %v1686_v54 }
 0x574   :  { %6082 = vmatpush3.bf16.msra.mxu1 %v6785_v34  ;;  %5572 = vmatprep.mubr.msk.f32.mxu1 %vm6584_vm1, %v6585_v32 }
 0x575   :  { %6083 = vmatprep.subr.bf16.mxu1 %v6583_v16 }
 0x578   :  { %6085 = vmatpush3.bf16.msra.mxu1 %v6794_v37 }
 0x579   :  { %6092 = vmatprep.subr.bf16.mxu1 %v6583_v16 }
 0x63e   :  { %v1757_v55 = vpop.f32.mrb[26].mxu1  ;;  %v1827_v57 = vpop.f32.mrb[28].mxu0 }
 0x63f   :  { %v1902_v58 = vadd.f32 %v1901_v56, %v1757_v55  ;;  %v5530_v59 = vpop.f32.mrb[27].mxu1  ;;  %v5541_v60 = vpop.f32.mrb[29].mxu0  ;;  %v1910_v63 = vadd.f32 %v1909_v61, %v1827_v57  ;;  %v2559_v55 = vld [vmem:[#allocation9 + $0x28] sm:$0xff]  ;;  %v7009_v56 = vld [vmem:[#allocation2] sm:$0xff] }
 0x640   :  { %v2561_v59 = vld [vmem:[#allocation9 + $0x38] sm:$0xff]  ;;  %v7033_v61 = vld [vmem:[#allocation2 + $0x20] sm:$0xff] }
 0x641   :  { %v4909_v33 = vmul.f32 -1.442695, %v1902_v58  ;;  %v4910_v1 = vmul.f32 -1.442695, %v1910_v63  ;;  %v2560_v58 = vld [vmem:[#allocation9 + $0x30] sm:$0xff]  ;;  %v7017_v60 = vld [vmem:[#allocation2 + $0x8] sm:$0xff] }
 0x643   :  { %6346 = vpow2.f32 %v4909_v33  ;;  %v7023_v33 = vld [vmem:[#allocation2 + $0x10] sm:$0xff] }
 0x644   :  { %6348 = vpow2.f32 %v4910_v1  ;;  %v2811_v1 = vld [vmem:[#allocation11 + $0x68] sm:$0xff] }
 0x646   :  { %v1897_v62 = vpop.f32.mrb[28].mxu1 }
 0x647   :  { %v5552_v0 = vpop.f32.mrb[29].mxu1  ;;  %v1898_v5 = vadd.f32 %v6859_v48, %v1897_v62 }
 0x648   :  { %v2810_v0 = vld [vmem:[#allocation11 + $0x60] sm:$0xff] }
 0x64d   :  { %v6347_v2 = vpop.eup %6346 }
 0x64e   :  { %v1906_v3 = vadd.f32 1.0, %v6347_v2  ;;  %v6349_v4 = vpop.eup %6348  ;;  %v2684_v2 = vld [vmem:[#allocation9 + $0x40] sm:$0xff] }
 0x64f   :  { %v1914_v9 = vadd.f32 1.0, %v6349_v4  ;;  %v2685_v4 = vld [vmem:[#allocation9 + $0x48] sm:$0xff] }
 0x650   :  { %6350 = vrcp.f32 %v1906_v3  ;;  %v7058_v3 = vpack.c.bf16 %v2811_v1, %v2810_v0 }
 0x65a   :  { %v6351_v6 = vpop.eup %6350 }
 0x65b   :  { %v1918_v7 = vmul.f32 %v6351_v6, %v1898_v5  ;;  %v2812_v5 = vld [vmem:[#allocation11 + $0x70] sm:$0xff]  ;;  %v2813_v6 = vld [vmem:[#allocation11 + $0x78] sm:$0xff] }
 0x65d   :  { %v1919_v10 = vadd.f32 %v1918_v7, %v1917_v8  ;;  %v6126_v7 = vpack.c.bf16 %v2685_v4, %v2684_v2  ;;  %v7061_v8 = vpack.c.bf16 %v2813_v6, %v2812_v5  ;;  %v2391_v4 = vld [vmem:[#allocation5 + $0x38] sm:$0xff] }
 0x65f   :  { %6352 = vtanh.f32 %v1919_v10  ;;  %v2687_v10 = vld [vmem:[#allocation9 + $0x58] sm:$0xff] }
 0x660   :  { %6354 = vrcp.f32 %v1914_v9  ;;  %v2686_v9 = vld [vmem:[#allocation9 + $0x50] sm:$0xff] }
 0x669   :  { %v6353_v11 = vpop.eup %6352 }
 0x66a   :  { %v1921_v12 = vsub.f32 %v1686_v54, %v6353_v11  ;;  %v6355_v13 = vpop.eup %6354  ;;  %v2558_v54 = vld [vmem:[#allocation9 + $0x20] sm:$0xff] }
 0x66b   :  { %v6118_v57 = vpack.c.bf16 %v2559_v55, %v2558_v54 }
 0x66c   :  { %v1922_v14 = vmul.f32 %v6355_v13, %v1921_v12  ;;  %v2375_v13 = vld [vmem:[#allocation3 + $0x38] sm:$0xff] }
 0x66e   :  { %v1923_v17 = vadd.f32 %v6353_v11, %v1922_v14  ;;  %v6130_v11 = vpack.c.bf16 %v2687_v10, %v2686_v9 }
 0x670   :  { %1924 = vst.msk [vmem:[#allocation2 + $0x28] sm:$0xff] %vm224_vm2, %v1923_v17  ;;  %5562 = vmatmul.mubr.msk.f32.vlgmr.msra.gmra.mrb[30].mxu0 %vm224_vm2, %v1923_v17  ;;  %5573 = vmatmul.mubr.msk.f32.vlgmr.msra.gmra.mrb[30].mxu1 %vm224_vm2, %v1923_v17 }
 0x671   :  { %6088 = vmatpush3.bf16.msra.mxu0 %v6765_v26  ;;  %5583 = vmatprep.mubr.msk.f32.mxu0 %vm6584_vm1, %v6585_v32 }
 0x672   :  { %6089 = vmatprep.subr.bf16.mxu0 %v6583_v16  ;;  %6094 = vmatpush3.bf16.msra.mxu1 %v6736_v15  ;;  %v2408_v15 = vld [vmem:[#allocation9] sm:$0xff] }
 0x673   :  { %6095 = vmatprep.subr.bf16.mxu1 %v6583_v16  ;;  %5594 = vmatprep.mubr.msk.f32.mxu1 %vm6584_vm1, %v6585_v32  ;;  %v6110_v19 = vpack.c.bf16 %v2409_v18, %v2408_v15 }
 0x675   :  { %6091 = vmatpush3.bf16.msra.mxu0 %v6776_v31 }
 0x676   :  { %6098 = vmatprep.subr.bf16.mxu0 %v6583_v16  ;;  %6097 = vmatpush3.bf16.msra.mxu1 %v6753_v22 }
 0x677   :  { %6104 = vmatprep.subr.bf16.mxu1 %v6583_v16  ;;  %v7038_v62 = vld [vmem:[#allocation2 + $0x28] sm:$0xff] }
 0x678   :  { %5584 = vmatmul.mubr.msk.f32.vlgmr.msra.gmra.mrb[32].mxu0 %vm224_vm2, %v1923_v17 }
 0x679   :  { %6100 = vmatpush3.bf16.msra.mxu0 %v6785_v34  ;;  %5605 = vmatprep.mubr.msk.f32.mxu0 %vm6584_vm1, %v6585_v32  ;;  %v2146_v34 = vld [vmem:[#allocation4 + $0x30] sm:$0xff] }
 0x67a   :  { %6101 = vmatprep.subr.bf16.mxu0 %v6583_v16 }
 0x67d   :  { %6103 = vmatpush3.bf16.msra.mxu0 %v6794_v37 }
 0x67e   :  { %6111 = vmatprep.subr.bf16.mxu0 %v6110_v19 }
 0x743   :  { %v1994_v20 = vpop.f32.mrb[30].mxu0  ;;  %v2064_v22 = vpop.f32.mrb[30].mxu1 }
 0x744   :  { %v2139_v23 = vadd.f32 %v2138_v21, %v1994_v20  ;;  %v5563_v24 = vpop.f32.mrb[31].mxu0  ;;  %v5574_v25 = vpop.f32.mrb[31].mxu1  ;;  %v2147_v29 = vadd.f32 %v2146_v34, %v2064_v22  ;;  %v7070_v20 = vld [vmem:[%s7383_s5 + $0x3] ss:$0 sm:$0xff]  ;;  %v2383_v21 = vld [vmem:[#allocation4 + $0x38] sm:$0xff] }
 0x746   :  { %v4914_v27 = vmul.f32 -1.442695, %v2139_v23  ;;  %v4915_v35 = vmul.f32 -1.442695, %v2147_v29 }
 0x748   :  { %6356 = vpow2.f32 %v4914_v27 }
 0x749   :  { %6358 = vpow2.f32 %v4915_v35 }
 0x74b   :  { %v2134_v28 = vpop.f32.mrb[32].mxu0 }
 0x74c   :  { %v5585_v30 = vpop.f32.mrb[33].mxu0  ;;  %v2135_v39 = vadd.f32 %v6859_v48, %v2134_v28 }
 0x752   :  { %v6357_v36 = vpop.eup %6356 }
 0x753   :  { %v2143_v38 = vadd.f32 1.0, %v6357_v36  ;;  %v6359_v37 = vpop.eup %6358 }
 0x754   :  { %v2151_v43 = vadd.f32 1.0, %v6359_v37  ;;  %v7081_v37 = vld [vmem:[%s7383_s5 + $0x4] ss:$0 sm:$0xff] }
 0x755   :  { %6360 = vrcp.f32 %v2143_v38 }
 0x75f   :  { %v6361_v40 = vpop.eup %6360 }
 0x760   :  { %v2155_v41 = vmul.f32 %v6361_v40, %v2135_v39 }
 0x762   :  { %v2156_v44 = vadd.f32 %v2155_v41, %v2154_v42 }
 0x764   :  { %6362 = vtanh.f32 %v2156_v44 }
 0x765   :  { %6364 = vrcp.f32 %v2151_v43 }
 0x76e   :  { %v6363_v45 = vpop.eup %6362 }
 0x76f   :  { %v2158_v46 = vsub.f32 %v1923_v17, %v6363_v45  ;;  %v6365_v47 = vpop.eup %6364 }
 0x771   :  { %v2159_v49 = vmul.f32 %v6365_v47, %v2158_v46 }
 0x773   :  { %v7000_v52 = vadd.f32 %v6363_v45, %v2159_v49 }
 0x775   :  { %2161 = vst.msk [vmem:[#allocation2 + $0x30] sm:$0xff] %vm224_vm2, %v7000_v52  ;;  %5595 = vmatmul.mubr.msk.f32.vlgmr.msra.gmra.mrb[32].mxu1 %vm224_vm2, %v7000_v52  ;;  %5606 = vmatmul.mubr.msk.f32.vlgmr.msra.gmra.mrb[34].mxu0 %vm224_vm2, %v7000_v52 }
 0x776   :  { %6106 = vmatpush3.bf16.msra.mxu1 %v6765_v26  ;;  %6113 = vmatpush3.bf16.msra.mxu0 %v6110_v19  ;;  %v6122_v26 = vpack.c.bf16 %v2561_v59, %v2560_v58 }
 0x777   :  { %5627 = vmatprep.mubr.msk.f32.mxu0 %vm224_vm2, %v7009_v56  ;;  %6107 = vmatprep.subr.bf16.mxu1 %v6583_v16 }
 0x778   :  { %6115 = vmatprep.subr.bf16.mxu0 %v6114_v53  ;;  %5616 = vmatprep.mubr.msk.f32.mxu1 %vm6584_vm1, %v6585_v32 }
 0x77a   :  { %6109 = vmatpush3.bf16.msra.mxu1 %v6776_v31  ;;  %6117 = vmatpush3.bf16.msra.mxu0 %v6114_v53  ;;  %v7029_v31 = vld [vmem:[#allocation2 + $0x18] sm:$0xff] }
 0x77b   :  { %6119 = vmatprep.subr.bf16.mxu1 %v6118_v57  ;;  %6127 = vmatprep.subr.bf16.mxu0 %v6126_v7 }
 0x77c   :  { %v7044_v63 = vld [vmem:[#allocation2 + $0x30] sm:$0xff] }
 0x77d   :  { %5617 = vmatmul.mubr.msk.f32.vlgmr.msra.gmra.mrb[34].mxu1 %vm224_vm2, %v7000_v52  ;;  %5628 = vmatmul.mubr.msk.f32.vlgmr.msra.gmra.mrb[36].mxu0 %vm224_vm2, %v7017_v60 }
 0x77e   :  { %5630 = vmatprep.mubr.msk.f32.mxu0 %vm224_vm2, %v7023_v33  ;;  %6121 = vmatpush3.bf16.msra.mxu1 %v6118_v57 }
 0x77f   :  { %5647 = vmatprep.mubr.msk.f32.mxu1 %vm224_vm2, %v7009_v56  ;;  %6123 = vmatprep.subr.bf16.mxu1 %v6122_v26 }
 0x780   :  { %6129 = vmatpush3.bf16.msra.mxu0 %v6126_v7 }
 0x781   :  { %5631 = vmatmul.mubr.msk.f32.gmra.mrb[38].mxu0 %vm224_vm2, %v7029_v31  ;;  %6131 = vmatprep.subr.bf16.mxu0 %v6130_v11 }
 0x782   :  { %5633 = vmatprep.mubr.msk.f32.mxu0 %vm224_vm2, %v7033_v61  ;;  %6125 = vmatpush3.bf16.msra.mxu1 %v6122_v26 }
 0x783   :  { %6134 = vmatprep.subr.bf16.mxu1 %v6583_v16 }
 0x784   :  { %6133 = vmatpush3.bf16.msra.mxu0 %v6130_v11 }
 0x785   :  { %5634 = vmatmul.mubr.msk.f32.gmra.mrb[40].mxu0 %vm224_vm2, %v7038_v62  ;;  %5648 = vmatmul.mubr.msk.f32.vlgmr.msra.gmra.mrb[36].mxu1 %vm224_vm2, %v7017_v60 }
 0x786   :  { %5636 = vmatprep.mubr.msk.f32.mxu0 %vm224_vm2, %v7044_v63  ;;  %5650 = vmatprep.mubr.msk.f32.mxu1 %vm224_vm2, %v7023_v33 }
 0x787   :  { %6136 = vmatpush3.bf16.msra.mxu1 %v7058_v3  ;;  %6146 = vmatprep.subr.bf16.mxu0 %v6583_v16 }
 0x788   :  { %6137 = vmatprep.subr.bf16.mxu1 %v6583_v16 }
 0x789   :  { %5651 = vmatmul.mubr.msk.f32.gmra.mrb[38].mxu1 %vm224_vm2, %v7029_v31 }
 0x78a   :  { %5653 = vmatprep.mubr.msk.f32.mxu1 %vm224_vm2, %v7033_v61 }
 0x78b   :  { %6139 = vmatpush3.bf16.msra.mxu1 %v7061_v8 }
 0x78c   :  { %6140 = vmatprep.subr.bf16.mxu1 %v6583_v16 }
 0x78d   :  { %5654 = vmatmul.mubr.msk.f32.gmra.mrb[40].mxu1 %vm224_vm2, %v7038_v62 }
 0x78e   :  { %5656 = vmatprep.mubr.msk.f32.mxu1 %vm224_vm2, %v7044_v63 }
 0x848   :  { %v2231_v12 = vpop.f32.mrb[32].mxu1  ;;  %v2301_v14 = vpop.f32.mrb[34].mxu0 }
 0x849   :  { %v2376_v17 = vadd.f32 %v2375_v13, %v2231_v12  ;;  %v5596_v15 = vpop.f32.mrb[33].mxu1  ;;  %v5607_v18 = vpop.f32.mrb[35].mxu0  ;;  %v2384_v24 = vadd.f32 %v2383_v21, %v2301_v14  ;;  %v2816_v13 = vld [vmem:[#allocation11 + $0x88] sm:$0xff]  ;;  %v2818_v21 = vld [vmem:[#allocation11 + $0x98] sm:$0xff] }
 0x84a   :  { %v2821_v15 = vld [vmem:[#allocation11 + $0xa8] sm:$0xff] }
 0x84b   :  { %v4919_v19 = vmul.f32 -1.442695, %v2376_v17  ;;  %v4920_v30 = vmul.f32 -1.442695, %v2384_v24  ;;  %v2820_v17 = vld [vmem:[#allocation11 + $0xa0] sm:$0xff]  ;;  %v2823_v24 = vld [vmem:[#allocation11 + $0xb8] sm:$0xff] }
 0x84d   :  { %6366 = vpow2.f32 %v4919_v19  ;;  %v2817_v19 = vld [vmem:[#allocation11 + $0x90] sm:$0xff] }
 0x84e   :  { %6368 = vpow2.f32 %v4920_v30 }
 0x850   :  { %v2371_v22 = vpop.f32.mrb[34].mxu1  ;;  %v5629_v23 = vpop.f32.mrb[36].mxu0 }
 0x851   :  { %v2516_v25 = vadd.f32 %v5629_v23, %v7070_v20  ;;  %v5618_v27 = vpop.f32.mrb[35].mxu1  ;;  %v2510_v34 = vpop.f32.mrb[37].mxu0  ;;  %v2372_v0 = vadd.f32 %v6859_v48, %v2371_v22  ;;  %v2815_v48 = vld [vmem:[#allocation11 + $0x80] sm:$0xff]  ;;  %v7115_v22 = vpack.c.bf16 %v2821_v15, %v2820_v17  ;;  %v2822_v23 = vld [vmem:[#allocation11 + $0xb0] sm:$0xff] }
 0x852   :  { %v2511_v28 = vadd.f32 %v7070_v20, %v2510_v34  ;;  %v7113_v18 = vpack.c.bf16 %v2816_v13, %v2815_v48 }
 0x853   :  { %2550 = vst.msk [vmem:[#allocation3 + $0x8] sm:$0xff] %vm224_vm2, %v2516_v25 }
 0x854   :  { %2549 = vst.msk [vmem:[#allocation3] sm:$0xff] %vm224_vm2, %v2511_v28  ;;  %v5632_v29 = vpop.f32.mrb[38].mxu0  ;;  %v4942_v28 = vld [vmem:[%s7383_s5 + $0x5] ss:$0 sm:$0xff] }
 0x855   :  { %v2526_v35 = vadd.f32 %v5632_v29, %v7070_v20  ;;  %v2520_v36 = vpop.f32.mrb[39].mxu0 }
 0x856   :  { %v2521_v38 = vadd.f32 %v7070_v20, %v2520_v36 }
 0x857   :  { %v6367_v39 = vpop.eup %6366  ;;  %2552 = vst.msk [vmem:[#allocation3 + $0x18] sm:$0xff] %vm224_vm2, %v2526_v35 }
 0x858   :  { %v2380_v40 = vadd.f32 1.0, %v6367_v39  ;;  %2551 = vst.msk [vmem:[#allocation3 + $0x10] sm:$0xff] %vm224_vm2, %v2521_v38  ;;  %v5635_v41 = vpop.f32.mrb[40].mxu0  ;;  %v5649_v42 = vpop.f32.mrb[36].mxu1 }
 0x859   :  { %v2536_v43 = vadd.f32 %v5635_v41, %v7070_v20  ;;  %v2642_v44 = vadd.f32 %v5649_v42, %v7081_v37  ;;  %v2530_v45 = vpop.f32.mrb[41].mxu0  ;;  %v2636_v46 = vpop.f32.mrb[37].mxu1 }
 0x85a   :  { %6370 = vrcp.f32 %v2380_v40  ;;  %v2531_v47 = vadd.f32 %v7070_v20, %v2530_v45  ;;  %v2637_v49 = vadd.f32 %v7081_v37, %v2636_v46  ;;  %v6369_v26 = vpop.eup %6368 }
 0x85b   :  { %2554 = vst.msk [vmem:[#allocation3 + $0x28] sm:$0xff] %vm224_vm2, %v2536_v43  ;;  %2676 = vst.msk [vmem:[#allocation4 + $0x8] sm:$0xff] %vm224_vm2, %v2642_v44  ;;  %v2388_v5 = vadd.f32 1.0, %v6369_v26  ;;  %v3047_v35 = vld [vmem:[#allocation3] sm:$0xff] }
 0x85c   :  { %2553 = vst.msk [vmem:[#allocation3 + $0x20] sm:$0xff] %vm224_vm2, %v2531_v47  ;;  %2675 = vst.msk [vmem:[#allocation4] sm:$0xff] %vm224_vm2, %v2637_v49  ;;  %v5652_v50 = vpop.f32.mrb[38].mxu1 }
 0x85d   :  { %v2652_v51 = vadd.f32 %v5652_v50, %v7081_v37  ;;  %v2646_v53 = vpop.f32.mrb[39].mxu1 }
 0x85e   :  { %v2647_v54 = vadd.f32 %v7081_v37, %v2646_v53 }
 0x85f   :  { %2678 = vst.msk [vmem:[#allocation4 + $0x18] sm:$0xff] %vm224_vm2, %v2652_v51 }
 0x860   :  { %2677 = vst.msk [vmem:[#allocation4 + $0x10] sm:$0xff] %vm224_vm2, %v2647_v54  ;;  %v5655_v55 = vpop.f32.mrb[40].mxu1 }
 0x861   :  { %v2662_v57 = vadd.f32 %v5655_v55, %v7081_v37  ;;  %v2656_v58 = vpop.f32.mrb[41].mxu1 }
 0x862   :  { %v2657_v59 = vadd.f32 %v7081_v37, %v2656_v58 }
 0x863   :  { %2680 = vst.msk [vmem:[#allocation4 + $0x28] sm:$0xff] %vm224_vm2, %v2662_v57  ;;  %v3055_v46 = vld [vmem:[#allocation4] sm:$0xff] }
 0x864   :  { %v6371_v1 = vpop.eup %6370  ;;  %2679 = vst.msk [vmem:[#allocation4 + $0x20] sm:$0xff] %vm224_vm2, %v2657_v59 }
 0x865   :  { %v2392_v2 = vmul.f32 %v6371_v1, %v2372_v0 }
 0x867   :  { %v2393_v6 = vadd.f32 %v2392_v2, %v2391_v4 }
 0x869   :  { %6372 = vtanh.f32 %v2393_v6 }
 0x86a   :  { %6374 = vrcp.f32 %v2388_v5  ;;  %v7186_v5 = vld [vmem:[%s7384_s6 + $0x1] ss:$0 sm:$0xff] }
 0x873   :  { %v6373_v7 = vpop.eup %6372 }
 0x874   :  { %v2395_v9 = vsub.f32 %v7000_v52, %v6373_v7  ;;  %v6375_v10 = vpop.eup %6374  ;;  %v7111_v52 = vld [vmem:[#allocation6 + $0x8] sm:$0xff] }
 0x876   :  { %v2396_v11 = vmul.f32 %v6375_v10, %v2395_v9 }
 0x878   :  { %v2397_v12 = vadd.f32 %v6373_v7, %v2396_v11 }
 0x87a   :  { %2398 = vst.msk [vmem:[#allocation2 + $0x38] sm:$0xff] %vm224_vm2, %v2397_v12  ;;  %2399 = vst.msk [vmem:[#allocation13] sm:$0xff] %vm224_vm2, %v2397_v12 }
 0x881   :  { %v2407_v14 = vld [vmem:[#allocation2 + $0x38] sm:$0xff] }
 0x882   :  { %5637 = vmatmul.mubr.msk.f32.gmra.mrb[42].mxu0 %vm224_vm2, %v2407_v14  ;;  %5657 = vmatmul.mubr.msk.f32.gmra.mrb[42].mxu1 %vm224_vm2, %v2407_v14 }
 0x883   :  { %5667 = vmatprep.mubr.msk.f32.mxu0 %vm224_vm2, %v7009_v56  ;;  %5687 = vmatprep.mubr.msk.f32.mxu1 %vm6584_vm1, %v6585_v32  ;;  %v7124_v56 = vpack.c.bf16 %v2818_v21, %v2817_v19  ;;  %v3283_v21 = vld [vmem:[#allocation3 + $0x8] sm:$0xff] }
 0x886   :  { %5668 = vmatmul.mubr.msk.f32.vlgmr.msra.gmra.mrb[44].mxu0 %vm224_vm2, %v7017_v60  ;;  %5688 = vmatmul.mubr.msk.f32.vlgmr.msra.gmra.mrb[44].mxu1 %vm224_vm2, %v7111_v52  ;;  %v7130_v60 = vpack.c.bf16 %v2823_v24, %v2822_v23 }
 0x887   :  { %6142 = vmatpush3.bf16.msra.mxu1 %v7113_v18  ;;  %5670 = vmatprep.mubr.msk.f32.mxu0 %vm224_vm2, %v7023_v33 }
 0x888   :  { %6143 = vmatprep.subr.bf16.mxu1 %v6583_v16  ;;  %5698 = vmatprep.mubr.msk.f32.mxu1 %vm6584_vm1, %v6585_v32 }
 0x889   :  { %6148 = vmatpush3.bf16.msra.mxu0 %v7115_v22 }
 0x88a   :  { %5671 = vmatmul.mubr.msk.f32.gmra.mrb[46].mxu0 %vm224_vm2, %v7029_v31  ;;  %6149 = vmatprep.subr.bf16.mxu0 %v6583_v16 }
 0x88b   :  { %6145 = vmatpush3.bf16.msra.mxu1 %v7124_v56  ;;  %5673 = vmatprep.mubr.msk.f32.mxu0 %vm224_vm2, %v7033_v61 }
 0x88c   :  { %6152 = vmatprep.subr.bf16.mxu1 %v6583_v16 }
 0x88d   :  { %6151 = vmatpush3.bf16.msra.mxu0 %v7130_v60 }
 0x88e   :  { %5699 = vmatmul.mubr.msk.f32.vlgmr.msra.gmra.mrb[46].mxu1 %vm224_vm2, %v7111_v52  ;;  %5674 = vmatmul.mubr.msk.f32.gmra.mrb[48].mxu0 %vm224_vm2, %v7038_v62 }
 0x88f   :  { %5676 = vmatprep.mubr.msk.f32.mxu0 %vm224_vm2, %v7044_v63  ;;  %6154 = vmatpush3.bf16.msra.mxu1 %v7058_v3 }
 0x890   :  { %6158 = vmatprep.subr.bf16.mxu0 %v6583_v16  ;;  %6155 = vmatprep.subr.bf16.mxu1 %v6583_v16 }
 0x891   :  { %5720 = vmatprep.mubr.msk.f32.mxu1 %vm6584_vm1, %v6585_v32 }
 0x892   :  { %5677 = vmatmul.mubr.msk.f32.gmra.mrb[50].mxu0 %vm224_vm2, %v2407_v14 }
 0x893   :  { %5709 = vmatprep.mubr.msk.f32.mxu0 %vm6584_vm1, %v6585_v32  ;;  %6157 = vmatpush3.bf16.msra.mxu1 %v7061_v8 }
 0x894   :  { %6164 = vmatprep.subr.bf16.mxu1 %v6583_v16 }
 0x896   :  { %5710 = vmatmul.mubr.msk.f32.vlgmr.msra.gmra.mrb[52].mxu0 %vm224_vm2, %v7111_v52 }
 0x897   :  { %6160 = vmatpush3.bf16.msra.mxu0 %v7113_v18  ;;  %5731 = vmatprep.mubr.msk.f32.mxu0 %vm6584_vm1, %v6585_v32 }
 0x898   :  { %6161 = vmatprep.subr.bf16.mxu0 %v6583_v16 }
 0x89b   :  { %6163 = vmatpush3.bf16.msra.mxu0 %v7124_v56 }
 0x89c   :  { %6170 = vmatprep.subr.bf16.mxu0 %v6583_v16 }
 0x955   :  { %v5638_v33 = vpop.f32.mrb[42].mxu0  ;;  %v5658_v31 = vpop.f32.mrb[42].mxu1 }
 0x956   :  { %v2546_v61 = vadd.f32 %v5638_v33, %v7070_v20  ;;  %v2672_v62 = vadd.f32 %v5658_v31, %v7081_v37  ;;  %v2540_v63 = vpop.f32.mrb[43].mxu0  ;;  %v2666_v25 = vpop.f32.mrb[43].mxu1 }
 0x957   :  { %v2541_v27 = vadd.f32 %v7070_v20, %v2540_v63  ;;  %v2667_v34 = vadd.f32 %v7081_v37, %v2666_v25 }
 0x958   :  { %2556 = vst.msk [vmem:[#allocation3 + $0x38] sm:$0xff] %vm224_vm2, %v2546_v61  ;;  %2682 = vst.msk [vmem:[#allocation4 + $0x38] sm:$0xff] %vm224_vm2, %v2672_v62  ;;  %v3291_v62 = vld [vmem:[#allocation4 + $0x8] sm:$0xff] }
 0x959   :  { %2555 = vst.msk [vmem:[#allocation3 + $0x30] sm:$0xff] %vm224_vm2, %v2541_v27  ;;  %2681 = vst.msk [vmem:[#allocation4 + $0x30] sm:$0xff] %vm224_vm2, %v2667_v34  ;;  %v5669_v29 = vpop.f32.mrb[44].mxu0  ;;  %v2903_v30 = vpop.f32.mrb[44].mxu1 }
 0x95a   :  { %v2768_v36 = vadd.f32 %v5669_v29, %v4942_v28  ;;  %v3048_v38 = vadd.f32 %v3047_v35, %v2903_v30  ;;  %v2762_v20 = vpop.f32.mrb[45].mxu0  ;;  %v5689_v39 = vpop.f32.mrb[45].mxu1 }
 0x95b   :  { %v2763_v37 = vadd.f32 %v4942_v28, %v2762_v20 }
 0x95c   :  { %2802 = vst.msk [vmem:[#allocation5 + $0x8] sm:$0xff] %vm224_vm2, %v2768_v36  ;;  %v4956_v40 = vmul.f32 -1.442695, %v3048_v38 }
 0x95d   :  { %2801 = vst.msk [vmem:[#allocation5] sm:$0xff] %vm224_vm2, %v2763_v37  ;;  %v5672_v41 = vpop.f32.mrb[46].mxu0 }
 0x95e   :  { %6376 = vpow2.f32 %v4956_v40  ;;  %v2778_v42 = vadd.f32 %v5672_v41, %v4942_v28  ;;  %v2772_v43 = vpop.f32.mrb[47].mxu0 }
 0x95f   :  { %v2773_v44 = vadd.f32 %v4942_v28, %v2772_v43 }
 0x960   :  { %2804 = vst.msk [vmem:[#allocation5 + $0x18] sm:$0xff] %vm224_vm2, %v2778_v42 }
 0x961   :  { %2803 = vst.msk [vmem:[#allocation5 + $0x10] sm:$0xff] %vm224_vm2, %v2773_v44  ;;  %v2973_v45 = vpop.f32.mrb[46].mxu1  ;;  %v5675_v47 = vpop.f32.mrb[48].mxu0 }
 0x962   :  { %v3056_v49 = vadd.f32 %v3055_v46, %v2973_v45  ;;  %v2788_v50 = vadd.f32 %v5675_v47, %v4942_v28  ;;  %v2782_v51 = vpop.f32.mrb[49].mxu0  ;;  %v5700_v53 = vpop.f32.mrb[47].mxu1  ;;  %v3519_v46 = vld [vmem:[#allocation3 + $0x10] sm:$0xff] }
 0x963   :  { %v2783_v54 = vadd.f32 %v4942_v28, %v2782_v51  ;;  %v3299_v20 = vld [vmem:[#allocation5 + $0x8] sm:$0xff] }
 0x964   :  { %2806 = vst.msk [vmem:[#allocation5 + $0x28] sm:$0xff] %vm224_vm2, %v2788_v50  ;;  %v4957_v57 = vmul.f32 -1.442695, %v3056_v49  ;;  %v3063_v11 = vld [vmem:[#allocation5] sm:$0xff] }
 0x965   :  { %2805 = vst.msk [vmem:[#allocation5 + $0x20] sm:$0xff] %vm224_vm2, %v2783_v54  ;;  %v5678_v55 = vpop.f32.mrb[50].mxu0  ;;  %v3527_v54 = vld [vmem:[#allocation4 + $0x10] sm:$0xff] }
 0x966   :  { %v2798_v58 = vadd.f32 %v5678_v55, %v4942_v28  ;;  %v2792_v59 = vpop.f32.mrb[51].mxu0  ;;  %6378 = vpow2.f32 %v4957_v57 }
 0x967   :  { %v2793_v26 = vadd.f32 %v4942_v28, %v2792_v59 }
 0x968   :  { %v6377_v0 = vpop.eup %6376  ;;  %2808 = vst.msk [vmem:[#allocation5 + $0x38] sm:$0xff] %vm224_vm2, %v2798_v58 }
 0x969   :  { %v3052_v1 = vadd.f32 1.0, %v6377_v0  ;;  %2807 = vst.msk [vmem:[#allocation5 + $0x30] sm:$0xff] %vm224_vm2, %v2793_v26  ;;  %v3043_v2 = vpop.f32.mrb[52].mxu0 }
 0x96a   :  { %v5711_v4 = vpop.f32.mrb[53].mxu0  ;;  %v3044_v6 = vadd.f32 %v7186_v5, %v3043_v2 }
 0x96b   :  { %6380 = vrcp.f32 %v3052_v1 }
 0x970   :  { %v6379_v7 = vpop.eup %6378 }
 0x971   :  { %v3060_v12 = vadd.f32 1.0, %v6379_v7  ;;  %v3535_v7 = vld [vmem:[#allocation5 + $0x10] sm:$0xff] }
 0x975   :  { %v6381_v9 = vpop.eup %6380 }
 0x976   :  { %v3064_v10 = vmul.f32 %v6381_v9, %v3044_v6 }
 0x978   :  { %v3065_v48 = vadd.f32 %v3064_v10, %v3063_v11 }
 0x97a   :  { %6382 = vtanh.f32 %v3065_v48 }
 0x97b   :  { %6384 = vrcp.f32 %v3060_v12 }
 0x984   :  { %v6383_v13 = vpop.eup %6382 }
 0x985   :  { %v3067_v14 = vsub.f32 %v7111_v52, %v6383_v13  ;;  %v6385_v17 = vpop.eup %6384 }
 0x987   :  { %v3068_v15 = vmul.f32 %v6385_v17, %v3067_v14 }
 0x989   :  { %v3069_v19 = vadd.f32 %v6383_v13, %v3068_v15  ;;  %v3755_v15 = vld [vmem:[#allocation3 + $0x18] sm:$0xff] }
 0x98b   :  { %5721 = vmatmul.mubr.msk.f32.vlgmr.msra.gmra.mrb[48].mxu1 %vm224_vm2, %v3069_v19  ;;  %5732 = vmatmul.mubr.msk.f32.vlgmr.msra.gmra.mrb[54].mxu0 %vm224_vm2, %v3069_v19 }
 0x98c   :  { %6166 = vmatpush3.bf16.msra.mxu1 %v7115_v22  ;;  %5742 = vmatprep.mubr.msk.f32.mxu1 %vm6584_vm1, %v6585_v32 }
 0x98d   :  { %6167 = vmatprep.subr.bf16.mxu1 %v6583_v16  ;;  %6172 = vmatpush3.bf16.msra.mxu0 %v7058_v3 }
 0x98e   :  { %6173 = vmatprep.subr.bf16.mxu0 %v6583_v16  ;;  %5753 = vmatprep.mubr.msk.f32.mxu0 %vm6584_vm1, %v6585_v32 }
 0x990   :  { %6169 = vmatpush3.bf16.msra.mxu1 %v7130_v60 }
 0x991   :  { %6176 = vmatprep.subr.bf16.mxu1 %v6583_v16  ;;  %6175 = vmatpush3.bf16.msra.mxu0 %v7061_v8 }
 0x992   :  { %6182 = vmatprep.subr.bf16.mxu0 %v6583_v16 }
 0x993   :  { %5743 = vmatmul.mubr.msk.f32.vlgmr.msra.gmra.mrb[50].mxu1 %vm224_vm2, %v3069_v19 }
 0x994   :  { %6178 = vmatpush3.bf16.msra.mxu1 %v7113_v18  ;;  %5764 = vmatprep.mubr.msk.f32.mxu1 %vm6584_vm1, %v6585_v32 }
 0x995   :  { %6179 = vmatprep.subr.bf16.mxu1 %v6583_v16 }
 0x998   :  { %6181 = vmatpush3.bf16.msra.mxu1 %v7124_v56 }
 0x999   :  { %6188 = vmatprep.subr.bf16.mxu1 %v6583_v16 }
 0xa5e   :  { %v3139_v52 = vpop.f32.mrb[48].mxu1  ;;  %v3209_v23 = vpop.f32.mrb[54].mxu0 }
 0xa5f   :  { %v3284_v24 = vadd.f32 %v3283_v21, %v3139_v52  ;;  %v5722_v33 = vpop.f32.mrb[49].mxu1  ;;  %v5733_v31 = vpop.f32.mrb[55].mxu0  ;;  %v3292_v25 = vadd.f32 %v3291_v62, %v3209_v23 }
 0xa60   :  { %v3763_v33 = vld [vmem:[#allocation4 + $0x18] sm:$0xff] }
 0xa61   :  { %v4961_v61 = vmul.f32 -1.442695, %v3284_v24  ;;  %v4962_v34 = vmul.f32 -1.442695, %v3292_v25 }
 0xa63   :  { %6386 = vpow2.f32 %v4961_v61 }
 0xa64   :  { %6388 = vpow2.f32 %v4962_v34 }
 0xa66   :  { %v3279_v63 = vpop.f32.mrb[50].mxu1 }
 0xa67   :  { %v5744_v27 = vpop.f32.mrb[51].mxu1  ;;  %v3280_v35 = vadd.f32 %v7186_v5, %v3279_v63 }
 0xa6d   :  { %v6387_v28 = vpop.eup %6386 }
 0xa6e   :  { %v3288_v29 = vadd.f32 1.0, %v6387_v28  ;;  %v6389_v30 = vpop.eup %6388 }
 0xa6f   :  { %v3296_v39 = vadd.f32 1.0, %v6389_v30 }
 0xa70   :  { %6390 = vrcp.f32 %v3288_v29 }
 0xa7a   :  { %v6391_v36 = vpop.eup %6390 }
 0xa7b   :  { %v3300_v38 = vmul.f32 %v6391_v36, %v3280_v35  ;;  %v3771_v35 = vld [vmem:[#allocation5 + $0x18] sm:$0xff] }
 0xa7d   :  { %v3301_v37 = vadd.f32 %v3300_v38, %v3299_v20 }
 0xa7f   :  { %6392 = vtanh.f32 %v3301_v37 }
 0xa80   :  { %6394 = vrcp.f32 %v3296_v39 }
 0xa89   :  { %v6393_v40 = vpop.eup %6392 }
 0xa8a   :  { %v3303_v41 = vsub.f32 %v3069_v19, %v6393_v40  ;;  %v6395_v42 = vpop.eup %6394 }
 0xa8c   :  { %v3304_v43 = vmul.f32 %v6395_v42, %v3303_v41 }
 0xa8e   :  { %v3305_v44 = vadd.f32 %v6393_v40, %v3304_v43  ;;  %v3991_v43 = vld [vmem:[#allocation3 + $0x20] sm:$0xff] }
 0xa90   :  { %5754 = vmatmul.mubr.msk.f32.vlgmr.msra.gmra.mrb[56].mxu0 %vm224_vm2, %v3305_v44  ;;  %5765 = vmatmul.mubr.msk.f32.vlgmr.msra.gmra.mrb[52].mxu1 %vm224_vm2, %v3305_v44 }
 0xa91   :  { %6184 = vmatpush3.bf16.msra.mxu0 %v7115_v22  ;;  %5775 = vmatprep.mubr.msk.f32.mxu0 %vm6584_vm1, %v6585_v32 }
 0xa92   :  { %6185 = vmatprep.subr.bf16.mxu0 %v6583_v16  ;;  %6190 = vmatpush3.bf16.msra.mxu1 %v7058_v3 }
 0xa93   :  { %6191 = vmatprep.subr.bf16.mxu1 %v6583_v16  ;;  %5786 = vmatprep.mubr.msk.f32.mxu1 %vm6584_vm1, %v6585_v32 }
 0xa95   :  { %6187 = vmatpush3.bf16.msra.mxu0 %v7130_v60 }
 0xa96   :  { %6194 = vmatprep.subr.bf16.mxu0 %v6583_v16  ;;  %6193 = vmatpush3.bf16.msra.mxu1 %v7061_v8 }
 0xa97   :  { %6200 = vmatprep.subr.bf16.mxu1 %v6583_v16 }
 0xa98   :  { %5776 = vmatmul.mubr.msk.f32.vlgmr.msra.gmra.mrb[58].mxu0 %vm224_vm2, %v3305_v44 }
 0xa99   :  { %6196 = vmatpush3.bf16.msra.mxu0 %v7113_v18  ;;  %5797 = vmatprep.mubr.msk.f32.mxu0 %vm6584_vm1, %v6585_v32 }
 0xa9a   :  { %6197 = vmatprep.subr.bf16.mxu0 %v6583_v16 }
 0xa9d   :  { %6199 = vmatpush3.bf16.msra.mxu0 %v7124_v56 }
 0xa9e   :  { %6206 = vmatprep.subr.bf16.mxu0 %v6583_v16 }
 0xb63   :  { %v3375_v45 = vpop.f32.mrb[56].mxu0  ;;  %v3445_v47 = vpop.f32.mrb[52].mxu1 }
 0xb64   :  { %v3520_v49 = vadd.f32 %v3519_v46, %v3375_v45  ;;  %v5755_v50 = vpop.f32.mrb[57].mxu0  ;;  %v5766_v51 = vpop.f32.mrb[53].mxu1  ;;  %v3528_v57 = vadd.f32 %v3527_v54, %v3445_v47 }
 0xb65   :  { %v3999_v50 = vld [vmem:[#allocation4 + $0x20] sm:$0xff] }
 0xb66   :  { %v4966_v53 = vmul.f32 -1.442695, %v3520_v49  ;;  %v4967_v59 = vmul.f32 -1.442695, %v3528_v57 }
 0xb68   :  { %6396 = vpow2.f32 %v4966_v53 }
 0xb69   :  { %6398 = vpow2.f32 %v4967_v59 }
 0xb6b   :  { %v3515_v55 = vpop.f32.mrb[58].mxu0 }
 0xb6c   :  { %v5777_v58 = vpop.f32.mrb[59].mxu0  ;;  %v3516_v2 = vadd.f32 %v7186_v5, %v3515_v55 }
 0xb72   :  { %v6397_v26 = vpop.eup %6396 }
 0xb73   :  { %v3524_v0 = vadd.f32 1.0, %v6397_v26  ;;  %v6399_v1 = vpop.eup %6398 }
 0xb74   :  { %v3532_v9 = vadd.f32 1.0, %v6399_v1 }
 0xb75   :  { %6400 = vrcp.f32 %v3524_v0 }
 0xb7f   :  { %v6401_v4 = vpop.eup %6400 }
 0xb80   :  { %v3536_v6 = vmul.f32 %v6401_v4, %v3516_v2  ;;  %v4007_v2 = vld [vmem:[#allocation5 + $0x20] sm:$0xff] }
 0xb82   :  { %v3537_v10 = vadd.f32 %v3536_v6, %v3535_v7 }
 0xb84   :  { %6402 = vtanh.f32 %v3537_v10 }
 0xb85   :  { %6404 = vrcp.f32 %v3532_v9 }
 0xb8e   :  { %v6403_v11 = vpop.eup %6402 }
 0xb8f   :  { %v3539_v12 = vsub.f32 %v3305_v44, %v6403_v11  ;;  %v6405_v48 = vpop.eup %6404 }
 0xb91   :  { %v3540_v13 = vmul.f32 %v6405_v48, %v3539_v12 }
 0xb93   :  { %v3541_v14 = vadd.f32 %v6403_v11, %v3540_v13  ;;  %v4227_v13 = vld [vmem:[#allocation3 + $0x28] sm:$0xff] }
 0xb95   :  { %5787 = vmatmul.mubr.msk.f32.vlgmr.msra.gmra.mrb[54].mxu1 %vm224_vm2, %v3541_v14  ;;  %5798 = vmatmul.mubr.msk.f32.vlgmr.msra.gmra.mrb[60].mxu0 %vm224_vm2, %v3541_v14 }
 0xb96   :  { %6202 = vmatpush3.bf16.msra.mxu1 %v7115_v22  ;;  %5808 = vmatprep.mubr.msk.f32.mxu1 %vm6584_vm1, %v6585_v32 }
 0xb97   :  { %6203 = vmatprep.subr.bf16.mxu1 %v6583_v16  ;;  %6208 = vmatpush3.bf16.msra.mxu0 %v7058_v3 }
 0xb98   :  { %6209 = vmatprep.subr.bf16.mxu0 %v6583_v16  ;;  %5819 = vmatprep.mubr.msk.f32.mxu0 %vm6584_vm1, %v6585_v32 }
 0xb9a   :  { %6205 = vmatpush3.bf16.msra.mxu1 %v7130_v60 }
 0xb9b   :  { %6212 = vmatprep.subr.bf16.mxu1 %v6583_v16  ;;  %6211 = vmatpush3.bf16.msra.mxu0 %v7061_v8 }
 0xb9c   :  { %6218 = vmatprep.subr.bf16.mxu0 %v6583_v16 }
 0xb9d   :  { %5809 = vmatmul.mubr.msk.f32.vlgmr.msra.gmra.mrb[56].mxu1 %vm224_vm2, %v3541_v14 }
 0xb9e   :  { %6214 = vmatpush3.bf16.msra.mxu1 %v7113_v18  ;;  %5830 = vmatprep.mubr.msk.f32.mxu1 %vm6584_vm1, %v6585_v32 }
 0xb9f   :  { %6215 = vmatprep.subr.bf16.mxu1 %v6583_v16 }
 0xba2   :  { %6217 = vmatpush3.bf16.msra.mxu1 %v7124_v56 }
 0xba3   :  { %6224 = vmatprep.subr.bf16.mxu1 %v6583_v16 }
 0xc68   :  { %v3611_v17 = vpop.f32.mrb[54].mxu1  ;;  %v3681_v19 = vpop.f32.mrb[60].mxu0 }
 0xc69   :  { %v3756_v52 = vadd.f32 %v3755_v15, %v3611_v17  ;;  %v5788_v21 = vpop.f32.mrb[55].mxu1  ;;  %v5799_v23 = vpop.f32.mrb[61].mxu0  ;;  %v3764_v61 = vadd.f32 %v3763_v33, %v3681_v19 }
 0xc6a   :  { %v4235_v21 = vld [vmem:[#allocation4 + $0x28] sm:$0xff] }
 0xc6b   :  { %v4971_v24 = vmul.f32 -1.442695, %v3756_v52  ;;  %v4972_v63 = vmul.f32 -1.442695, %v3764_v61 }
 0xc6d   :  { %6406 = vpow2.f32 %v4971_v24 }
 0xc6e   :  { %6408 = vpow2.f32 %v4972_v63 }
 0xc70   :  { %v3751_v31 = vpop.f32.mrb[56].mxu1 }
 0xc71   :  { %v5810_v62 = vpop.f32.mrb[57].mxu1  ;;  %v3752_v28 = vadd.f32 %v7186_v5, %v3751_v31 }
 0xc77   :  { %v6407_v25 = vpop.eup %6406 }
 0xc78   :  { %v3760_v27 = vadd.f32 1.0, %v6407_v25  ;;  %v6409_v34 = vpop.eup %6408 }
 0xc79   :  { %v3768_v36 = vadd.f32 1.0, %v6409_v34 }
 0xc7a   :  { %6410 = vrcp.f32 %v3760_v27 }
 0xc84   :  { %v6411_v29 = vpop.eup %6410 }
 0xc85   :  { %v3772_v30 = vmul.f32 %v6411_v29, %v3752_v28  ;;  %v4243_v28 = vld [vmem:[#allocation5 + $0x28] sm:$0xff] }
 0xc87   :  { %v3773_v38 = vadd.f32 %v3772_v30, %v3771_v35 }
 0xc89   :  { %6412 = vtanh.f32 %v3773_v38 }
 0xc8a   :  { %6414 = vrcp.f32 %v3768_v36 }
 0xc93   :  { %v6413_v20 = vpop.eup %6412 }
 0xc94   :  { %v3775_v39 = vsub.f32 %v3541_v14, %v6413_v20  ;;  %v6415_v37 = vpop.eup %6414 }
 0xc96   :  { %v3776_v40 = vmul.f32 %v6415_v37, %v3775_v39  ;;  %v4463_v37 = vld [vmem:[#allocation3 + $0x30] sm:$0xff] }
 0xc98   :  { %v3777_v41 = vadd.f32 %v6413_v20, %v3776_v40 }
 0xc9a   :  { %5820 = vmatmul.mubr.msk.f32.vlgmr.msra.gmra.mrb[62].mxu0 %vm224_vm2, %v3777_v41  ;;  %5831 = vmatmul.mubr.msk.f32.vlgmr.msra.gmra.mrb[58].mxu1 %vm224_vm2, %v3777_v41 }
 0xc9b   :  { %6220 = vmatpush3.bf16.msra.mxu0 %v7115_v22  ;;  %5841 = vmatprep.mubr.msk.f32.mxu0 %vm6584_vm1, %v6585_v32 }
 0xc9c   :  { %6221 = vmatprep.subr.bf16.mxu0 %v6583_v16  ;;  %6226 = vmatpush3.bf16.msra.mxu1 %v7058_v3 }
 0xc9d   :  { %6227 = vmatprep.subr.bf16.mxu1 %v6583_v16  ;;  %5852 = vmatprep.mubr.msk.f32.mxu1 %vm6584_vm1, %v6585_v32 }
 0xc9f   :  { %6223 = vmatpush3.bf16.msra.mxu0 %v7130_v60 }
 0xca0   :  { %6230 = vmatprep.subr.bf16.mxu0 %v6583_v16  ;;  %6229 = vmatpush3.bf16.msra.mxu1 %v7061_v8 }
 0xca1   :  { %6236 = vmatprep.subr.bf16.mxu1 %v6583_v16 }
 0xca2   :  { %5842 = vmatmul.mubr.msk.f32.vlgmr.msra.gmra.mrb[64].mxu0 %vm224_vm2, %v3777_v41 }
 0xca3   :  { %6232 = vmatpush3.bf16.msra.mxu0 %v7113_v18  ;;  %5863 = vmatprep.mubr.msk.f32.mxu0 %vm6584_vm1, %v6585_v32 }
 0xca4   :  { %6233 = vmatprep.subr.bf16.mxu0 %v6583_v16 }
 0xca7   :  { %6235 = vmatpush3.bf16.msra.mxu0 %v7124_v56 }
 0xca8   :  { %6242 = vmatprep.subr.bf16.mxu0 %v6583_v16 }
 0xd6d   :  { %v3847_v42 = vpop.f32.mrb[62].mxu0  ;;  %v3917_v44 = vpop.f32.mrb[58].mxu1 }
 0xd6e   :  { %v3992_v45 = vadd.f32 %v3991_v43, %v3847_v42  ;;  %v5821_v46 = vpop.f32.mrb[63].mxu0  ;;  %v5832_v47 = vpop.f32.mrb[59].mxu1  ;;  %v4000_v53 = vadd.f32 %v3999_v50, %v3917_v44  ;;  %v4471_v44 = vld [vmem:[#allocation4 + $0x30] sm:$0xff] }
 0xd70   :  { %v4976_v49 = vmul.f32 -1.442695, %v3992_v45  ;;  %v4977_v55 = vmul.f32 -1.442695, %v4000_v53 }
 0xd72   :  { %6416 = vpow2.f32 %v4976_v49 }
 0xd73   :  { %6418 = vpow2.f32 %v4977_v55  ;;  %v4479_v55 = vld [vmem:[#allocation5 + $0x30] sm:$0xff] }
 0xd75   :  { %v3987_v51 = vpop.f32.mrb[64].mxu0 }
 0xd76   :  { %v5843_v54 = vpop.f32.mrb[65].mxu0  ;;  %v3988_v26 = vadd.f32 %v7186_v5, %v3987_v51 }
 0xd7c   :  { %v6417_v57 = vpop.eup %6416 }
 0xd7d   :  { %v3996_v58 = vadd.f32 1.0, %v6417_v57  ;;  %v6419_v59 = vpop.eup %6418 }
 0xd7e   :  { %v4004_v4 = vadd.f32 1.0, %v6419_v59 }
 0xd7f   :  { %6420 = vrcp.f32 %v3996_v58 }
 0xd89   :  { %v6421_v0 = vpop.eup %6420 }
 0xd8a   :  { %v4008_v1 = vmul.f32 %v6421_v0, %v3988_v26 }
 0xd8c   :  { %v4009_v6 = vadd.f32 %v4008_v1, %v4007_v2 }
 0xd8e   :  { %6422 = vtanh.f32 %v4009_v6  ;;  %v4726_v6 = vld [vmem:[%s7385_s7 + $0x10] sm:$0xff] }
 0xd8f   :  { %6424 = vrcp.f32 %v4004_v4  ;;  %v4724_v4 = vld [vmem:[%s7385_s7] sm:$0xff] }
 0xd98   :  { %v6423_v7 = vpop.eup %6422 }
 0xd99   :  { %v4011_v9 = vsub.f32 %v3777_v41, %v6423_v7  ;;  %v6425_v10 = vpop.eup %6424 }
 0xd9b   :  { %v4012_v11 = vmul.f32 %v6425_v10, %v4011_v9  ;;  %v4699_v10 = vld [vmem:[#allocation3 + $0x38] sm:$0xff] }
 0xd9d   :  { %v4013_v12 = vadd.f32 %v6423_v7, %v4012_v11 }
 0xd9f   :  { %5853 = vmatmul.mubr.msk.f32.vlgmr.msra.gmra.mrb[60].mxu1 %vm224_vm2, %v4013_v12  ;;  %5864 = vmatmul.mubr.msk.f32.vlgmr.msra.gmra.mrb[66].mxu0 %vm224_vm2, %v4013_v12 }
 0xda0   :  { %6238 = vmatpush3.bf16.msra.mxu1 %v7115_v22  ;;  %5874 = vmatprep.mubr.msk.f32.mxu1 %vm6584_vm1, %v6585_v32 }
 0xda1   :  { %6239 = vmatprep.subr.bf16.mxu1 %v6583_v16  ;;  %6244 = vmatpush3.bf16.msra.mxu0 %v7058_v3 }
 0xda2   :  { %6245 = vmatprep.subr.bf16.mxu0 %v6583_v16  ;;  %5885 = vmatprep.mubr.msk.f32.mxu0 %vm6584_vm1, %v6585_v32 }
 0xda4   :  { %6241 = vmatpush3.bf16.msra.mxu1 %v7130_v60 }
 0xda5   :  { %6248 = vmatprep.subr.bf16.mxu1 %v6583_v16  ;;  %6247 = vmatpush3.bf16.msra.mxu0 %v7061_v8 }
 0xda6   :  { %6254 = vmatprep.subr.bf16.mxu0 %v6583_v16 }
 0xda7   :  { %5875 = vmatmul.mubr.msk.f32.vlgmr.msra.gmra.mrb[62].mxu1 %vm224_vm2, %v4013_v12 }
 0xda8   :  { %6250 = vmatpush3.bf16.msra.mxu1 %v7113_v18  ;;  %5896 = vmatprep.mubr.msk.f32.mxu1 %vm6584_vm1, %v6585_v32 }
 0xda9   :  { %6251 = vmatprep.subr.bf16.mxu1 %v6583_v16 }
 0xdac   :  { %6253 = vmatpush3.bf16.msra.mxu1 %v7124_v56 }
 0xdad   :  { %6260 = vmatprep.subr.bf16.mxu1 %v6583_v16 }
 0xe72   :  { %v4083_v48 = vpop.f32.mrb[60].mxu1  ;;  %v4153_v14 = vpop.f32.mrb[66].mxu0 }
 0xe73   :  { %v4228_v17 = vadd.f32 %v4227_v13, %v4083_v48  ;;  %v5854_v15 = vpop.f32.mrb[61].mxu1  ;;  %v5865_v19 = vpop.f32.mrb[67].mxu0  ;;  %v4236_v24 = vadd.f32 %v4235_v21, %v4153_v14 }
 0xe75   :  { %v4981_v52 = vmul.f32 -1.442695, %v4228_v17  ;;  %v4982_v31 = vmul.f32 -1.442695, %v4236_v24  ;;  %v4707_v17 = vld [vmem:[#allocation4 + $0x38] sm:$0xff] }
 0xe77   :  { %6426 = vpow2.f32 %v4981_v52 }
 0xe78   :  { %6428 = vpow2.f32 %v4982_v31 }
 0xe7a   :  { %v4223_v23 = vpop.f32.mrb[62].mxu1 }
 0xe7b   :  { %v5876_v33 = vpop.f32.mrb[63].mxu1  ;;  %v4224_v25 = vadd.f32 %v7186_v5, %v4223_v23 }
 0xe81   :  { %v6427_v61 = vpop.eup %6426 }
 0xe82   :  { %v4232_v62 = vadd.f32 1.0, %v6427_v61  ;;  %v6429_v63 = vpop.eup %6428 }
 0xe83   :  { %v4240_v29 = vadd.f32 1.0, %v6429_v63 }
 0xe84   :  { %6430 = vrcp.f32 %v4232_v62  ;;  %v4715_v62 = vld [vmem:[#allocation5 + $0x38] sm:$0xff] }
 0xe8e   :  { %v6431_v27 = vpop.eup %6430 }
 0xe8f   :  { %v4244_v34 = vmul.f32 %v6431_v27, %v4224_v25 }
 0xe91   :  { %v4245_v30 = vadd.f32 %v4244_v34, %v4243_v28 }
 0xe93   :  { %6432 = vtanh.f32 %v4245_v30 }
 0xe94   :  { %6434 = vrcp.f32 %v4240_v29 }
 0xe9d   :  { %v6433_v35 = vpop.eup %6432 }
 0xe9e   :  { %v4247_v36 = vsub.f32 %v4013_v12, %v6433_v35  ;;  %v6435_v38 = vpop.eup %6434 }
 0xea0   :  { %v4248_v20 = vmul.f32 %v6435_v38, %v4247_v36 }
 0xea2   :  { %v4249_v39 = vadd.f32 %v6433_v35, %v4248_v20 }
 0xea4   :  { %5886 = vmatmul.mubr.msk.f32.vlgmr.msra.gmra.mrb[68].mxu0 %vm224_vm2, %v4249_v39  ;;  %5897 = vmatmul.mubr.msk.f32.vlgmr.msra.gmra.mrb[64].mxu1 %vm224_vm2, %v4249_v39 }
 0xea5   :  { %6256 = vmatpush3.bf16.msra.mxu0 %v7115_v22  ;;  %5907 = vmatprep.mubr.msk.f32.mxu0 %vm6584_vm1, %v6585_v32 }
 0xea6   :  { %6257 = vmatprep.subr.bf16.mxu0 %v6583_v16  ;;  %6262 = vmatpush3.bf16.msra.mxu1 %v7058_v3 }
 0xea7   :  { %6263 = vmatprep.subr.bf16.mxu1 %v6583_v16  ;;  %5918 = vmatprep.mubr.msk.f32.mxu1 %vm6584_vm1, %v6585_v32 }
 0xea9   :  { %6259 = vmatpush3.bf16.msra.mxu0 %v7130_v60 }
 0xeaa   :  { %6266 = vmatprep.subr.bf16.mxu0 %v6583_v16  ;;  %6265 = vmatpush3.bf16.msra.mxu1 %v7061_v8 }
 0xeab   :  { %6272 = vmatprep.subr.bf16.mxu1 %v6583_v16 }
 0xeac   :  { %5908 = vmatmul.mubr.msk.f32.vlgmr.msra.gmra.mrb[70].mxu0 %vm224_vm2, %v4249_v39 }
 0xead   :  { %6268 = vmatpush3.bf16.msra.mxu0 %v7113_v18  ;;  %5929 = vmatprep.mubr.msk.f32.mxu0 %vm6584_vm1, %v6585_v32 }
 0xeae   :  { %6269 = vmatprep.subr.bf16.mxu0 %v6583_v16 }
 0xeb1   :  { %6271 = vmatpush3.bf16.msra.mxu0 %v7124_v56 }
 0xeb2   :  { %6278 = vmatprep.subr.bf16.mxu0 %v6583_v16 }
 0xf77   :  { %v4319_v3 = vpop.f32.mrb[68].mxu0  ;;  %v4389_v40 = vpop.f32.mrb[64].mxu1 }
 0xf78   :  { %v4464_v41 = vadd.f32 %v4463_v37, %v4319_v3  ;;  %v5887_v8 = vpop.f32.mrb[69].mxu0  ;;  %v5898_v42 = vpop.f32.mrb[65].mxu1  ;;  %v4472_v18 = vadd.f32 %v4471_v44, %v4389_v40 }
 0xf7a   :  { %v4986_v43 = vmul.f32 -1.442695, %v4464_v41  ;;  %v4987_v47 = vmul.f32 -1.442695, %v4472_v18 }
 0xf7c   :  { %6436 = vpow2.f32 %v4986_v43 }
 0xf7d   :  { %6438 = vpow2.f32 %v4987_v47 }
 0xf7f   :  { %v4459_v45 = vpop.f32.mrb[70].mxu0 }
 0xf80   :  { %v5909_v46 = vpop.f32.mrb[71].mxu0  ;;  %v4460_v51 = vadd.f32 %v7186_v5, %v4459_v45 }
 0xf86   :  { %v6437_v49 = vpop.eup %6436 }
 0xf87   :  { %v4468_v50 = vadd.f32 1.0, %v6437_v49  ;;  %v6439_v56 = vpop.eup %6438 }
 0xf88   :  { %v4476_v57 = vadd.f32 1.0, %v6439_v56 }
 0xf89   :  { %6440 = vrcp.f32 %v4468_v50 }
 0xf93   :  { %v6441_v53 = vpop.eup %6440 }
 0xf94   :  { %v4480_v54 = vmul.f32 %v6441_v53, %v4460_v51 }
 0xf96   :  { %v4481_v58 = vadd.f32 %v4480_v54, %v4479_v55 }
 0xf98   :  { %6442 = vtanh.f32 %v4481_v58 }
 0xf99   :  { %6444 = vrcp.f32 %v4476_v57 }
 0xfa2   :  { %v6443_v59 = vpop.eup %6442 }
 0xfa3   :  { %v4483_v26 = vsub.f32 %v4249_v39, %v6443_v59  ;;  %v6445_v0 = vpop.eup %6444 }
 0xfa5   :  { %v4484_v1 = vmul.f32 %v6445_v0, %v4483_v26 }
 0xfa7   :  { %v4485_v2 = vadd.f32 %v6443_v59, %v4484_v1 }
 0xfa9   :  { %5919 = vmatmul.mubr.msk.f32.vlgmr.msra.gmra.mrb[66].mxu1 %vm224_vm2, %v4485_v2  ;;  %5930 = vmatmul.mubr.msk.f32.vlgmr.msra.gmra.mrb[72].mxu0 %vm224_vm2, %v4485_v2 }
 0xfaa   :  { %6274 = vmatpush3.bf16.msra.mxu1 %v7115_v22  ;;  %5940 = vmatprep.mubr.msk.f32.mxu1 %vm6584_vm1, %v6585_v32  ;;  %v4725_v22 = vld [vmem:[%s7385_s7 + $0x8] sm:$0xff] }
 0xfab   :  { %6275 = vmatprep.subr.bf16.mxu1 %v6583_v16  ;;  %5951 = vmatprep.mubr.msk.f32.mxu0 %vm6584_vm1, %v6585_v32  ;;  %v6279_v7 = vpack.c.bf16 %v4725_v22, %v4724_v4  ;;  %v4727_v32 = vld [vmem:[%s7385_s7 + $0x18] sm:$0xff]  ;;  %s6586_s7 = smov [#allocation13]  }
 0xfac   :  { %s4830_s18 = sshll.u32 %s6586_s7, 4  ;;  %s4831_s18 = int_to_ptr.vmem [resolvable:$true] %s4830_s18 }
 0xfad   :  { %6280 = vmatpush3.bf16.msra.mxu0 %v6279_v7  ;;  %s6526_s0 = scalar_lea.vmem %s4831_s18, 256  ;;  %p6531_p11 = scmp.lt.s32.totalorder %s4831_s18, %s4831_s18 }
 0xfae   :  { %6277 = vmatpush3.bf16.msra.mxu1 %v7130_v60  ;;  %v6282_v60 = vpack.c.bf16 %v4727_v32, %v4726_v6  ;;  %6281 = vmatprep.subr.bf16.mxu0 %v6583_v16  ;;  %p6527_p10 = scmp.ne.s32.totalorder %s4831_s18, %s6526_s0  ;;  %p6532_p12 = scmp.lt.s32.totalorder %s6526_s0, %s6526_s0 }
 0xfb0   :  { %p6533_p13 = por %p6532_p12, %p6531_p11 }
 0xfb1   :  { %5941 = vmatmul.mubr.msk.f32.vlgmr.msra.gmra.mrb[68].mxu1 %vm224_vm2, %v4485_v2  ;;  %6283 = vmatpush3.bf16.msra.mxu0 %v6282_v60 }
 0xfb2   :  { %p6534_p0 = pnand %p6533_p13, %p6527_p10 }
0x107c   :  { %v4555_v9 = vpop.f32.mrb[66].mxu1  ;;  %v4625_v11 = vpop.f32.mrb[72].mxu0 }
0x107d   :  { %v4700_v12 = vadd.f32 %v4699_v10, %v4555_v9  ;;  %v5920_v48 = vpop.f32.mrb[67].mxu1  ;;  %v5931_v13 = vpop.f32.mrb[73].mxu0  ;;  %v4708_v19 = vadd.f32 %v4707_v17, %v4625_v11 }
0x107f   :  { %v4991_v14 = vmul.f32 -1.442695, %v4700_v12  ;;  %v4992_v21 = vmul.f32 -1.442695, %v4708_v19 }
0x1081   :  { %6446 = vpow2.f32 %v4991_v14 }
0x1082   :  { %6448 = vpow2.f32 %v4992_v21 }
0x1084   :  { %v4695_v15 = vpop.f32.mrb[68].mxu1 }
0x1085   :  { %v5942_v52 = vpop.f32.mrb[69].mxu1  ;;  %v4696_v16 = vadd.f32 %v7186_v5, %v4695_v15 }
0x108b   :  { %v6447_v23 = vpop.eup %6446 }
0x108c   :  { %v4704_v24 = vadd.f32 1.0, %v6447_v23  ;;  %v6449_v33 = vpop.eup %6448 }
0x108d   :  { %v4712_v63 = vadd.f32 1.0, %v6449_v33 }
0x108e   :  { %6450 = vrcp.f32 %v4704_v24 }
0x1098   :  { %v6451_v31 = vpop.eup %6450 }
0x1099   :  { %v4716_v61 = vmul.f32 %v6451_v31, %v4696_v16 }
0x109b   :  { %v4717_v25 = vadd.f32 %v4716_v61, %v4715_v62 }
0x109d   :  { %6452 = vtanh.f32 %v4717_v25 }
0x109e   :  { %6454 = vrcp.f32 %v4712_v63 }
0x10a7   :  { %v6453_v27 = vpop.eup %6452 }
0x10a8   :  { %v4719_v34 = vsub.f32 %v4485_v2, %v6453_v27  ;;  %v6455_v28 = vpop.eup %6454 }
0x10aa   :  { %v4720_v29 = vmul.f32 %v6455_v28, %v4719_v34 }
0x10ac   :  { %v4721_v30 = vadd.f32 %v6453_v27, %v4720_v29 }
0x10ae   :  { %5952 = vmatmul.mubr.msk.f32.vlgmr.msra.gmra.mrb[74].mxu0 %vm224_vm2, %v4721_v30  ;;  %4723 = vst.msk [vmem:[#allocation13 + $0x8] sm:$0xff] %vm224_vm2, %v4721_v30 }
0x10af   :  { %6537 = shalt.err (!%p6534_p0)
}
0x10b0   :  { %s6538_s14 = scalar_lea.hbm %s7388_s10, 256 }
0x10b1   :  { %p6539_p1 = scmp.ne.s32.totalorder %s7388_s10, %s6538_s14  ;;  %p6542_p2 = scmp.lt.u32.totalorder %s6538_s14, %s7388_s10 }
0x10b3   :  { %p6544_p3 = pnand %p6542_p2, %p6539_p1 }
0x10b5   :  { %6547 = shalt.err (!%p6544_p3)
}
0x10b6   :  { %4836 = dma.vmem_to_hbm [thread:$0]  %s4831_s18, 256, %s7388_s10, [#allocation14], %s6580_s25, %s6580_s25, %s6581_s26  }
0x10b7   :  { %v4993_v5 = vld [vmem:[%s7386_s8] ss:$0 sm:$0xff]  ;;  %s6587_s29 = smov [#allocation12]  }
0x10b8   :  { %s4821_s30 = sshll.u32 %s6587_s29, 4  ;;  %s4822_s30 = int_to_ptr.vmem [resolvable:$true] %s4821_s30 }
0x10b9   :  { %s6548_s5 = scalar_lea.vmem %s4822_s30, 128  ;;  %p6553_p5 = scmp.lt.s32.totalorder %s4822_s30, %s4822_s30 }
0x10ba   :  { %p6549_p4 = scmp.ne.s32.totalorder %s4822_s30, %s6548_s5  ;;  %p6554_p6 = scmp.lt.s32.totalorder %s6548_s5, %s6548_s5 }
0x10bc   :  { %p6555_p7 = por %p6554_p6, %p6553_p5 }
0x10be   :  { %p6556_p8 = pnand %p6555_p7, %p6549_p4 }
0x1181   :  { %v4804_v35 = vpop.f32.mrb[74].mxu0 }
0x1182   :  { %v4805_v36 = vadd.f32 %v4993_v5, %v4804_v35  ;;  %v5953_v38 = vpop.f32.mrb[75].mxu0 }
0x1184   :  { %v4995_v20 = vmul.f32 -1.442695, %v4805_v36 }
0x1186   :  { %6456 = vpow2.f32 %v4995_v20 }
0x1190   :  { %v6457_v39 = vpop.eup %6456 }
0x1191   :  { %v4811_v3 = vadd.f32 1.0, %v6457_v39 }
0x1193   :  { %6458 = vrcp.f32 %v4811_v3 }
0x119d   :  { %v6459_v37 = vpop.eup %6458 }
0x119e   :  { %4814 = vst [vmem:[#allocation12] sm:$0xff] %v6459_v37 }
0x119f   :  { %6559 = shalt.err (!%p6556_p8)
}
0x11a0   :  { %s6560_s25 = scalar_lea.hbm %s7387_s9, 128 }
0x11a1   :  { %p6561_p9 = scmp.ne.s32.totalorder %s7387_s9, %s6560_s25  ;;  %p6564_p10 = scmp.lt.u32.totalorder %s6560_s25, %s7387_s9 }
0x11a3   :  { %p6566_p11 = pnand %p6564_p10, %p6561_p9 }
0x11a5   :  { %6569 = shalt.err (!%p6566_p11)
}
0x11a6   :  { %4824 = dma.vmem_to_hbm [thread:$0]  %s4822_s30, 128, %s7387_s9, [#allocation8]  }
0x11a7   :  { %6574 = dma.done.wait [#allocation8], 128  }
0x11a8   :  { %6575 = vsyncadd [#allocation8], 4294967168 }
0x11a9   :  { %6576 = dma.done.wait [#allocation14], 256  }
0x11aa   :  { %6577 = vsyncadd [#allocation14], 4294967040 }
0x11ab   :  { %4843 = vsyncpa [#allocation7], 1 }
0x11ac   :  { %4844 = vsyncpa [#allocation10], 1 }
0x11ad   :  { %4845 = vsyncpa [#allocation8], 1 }
0x11ae   :  { %4846 = vsyncpa [#allocation14], 1 }

</bundles_post_ra>
